<compile_context>
chip_gen: v6e
topology: v6e:2x2x1
jax: 0.10.0
libtpu: 0.0.40
codegen_flags: <defaults>
</compile_context>

<pallas_src>
import jax
import jax.numpy as jnp
from jax.experimental import pallas as pl
from jax.experimental.pallas import tpu as pltpu

C = 128  # fixed by the module: Conv2d(128, 128, 3, 1, 1)


def _make_kernel(H, W, Wp):
    """Builds the per-image kernel for static spatial sizes H, W, Wp."""
    R0 = (H + 2) * Wp          # rows of the extended (ring-padded) conv0 output
    R1 = H * Wp                # rows of the (width-padded) conv1 output

    def kernel(xpp_ref, w0_ref, b0_ref, w1_ref, b1_ref, out_ref, t_ref):
        """One batch element per grid step.

        xpp_ref : (1, (H+4)*Wp, C) f32   zero-padded (2 px) input, width padded
                                         to Wp (multiple of 8), rows flattened
        w0_ref  : (3*C, 3*C)       bf16  conv0 weights, [kh*C+cin, kw*C+cout]
        b0_ref  : (1, C)           f32
        w1_ref  : (3*C, 3*C)       bf16  conv1 weights, same layout
        b1_ref  : (1, C)           f32
        out_ref : (1, H*Wp, C)     f32   width-padded output (sliced outside)
        t_ref   : ((H+2)*Wp, C)    bf16  VMEM scratch: ReLU(conv0) + zero ring
        """
        # ---- conv0: kh fused into K, kw fused into N -> ONE MXU matmul -----
        lhs0 = jnp.concatenate(
            [xpp_ref[0, pl.ds(kh * Wp, R0), :].astype(jnp.bfloat16)
             for kh in range(3)], axis=-1)                       # (R0, 3C) bf16
        z0 = jnp.dot(lhs0, w0_ref[...],
                     preferred_element_type=jnp.float32)         # (R0, 3C) f32
        # kw groups are 128-lane slices; realign kw=1,2 with sublane rolls.
        acc0 = (b0_ref[...] + z0[:, :C]
                + pltpu.roll(z0[:, C:2 * C], R0 - 1, 0)
                + pltpu.roll(z0[:, 2 * C:], R0 - 2, 0))

        # ReLU, then zero the 1-px ring (= conv1's zero padding) with an
        # in-kernel iota mask; single aligned full overwrite of the scratch.
        ii = jax.lax.broadcasted_iota(jnp.int32, (H + 2, Wp, 1), 0)
        jj = jax.lax.broadcasted_iota(jnp.int32, (H + 2, Wp, 1), 1)
        keep = (ii >= 1) & (ii <= H) & (jj >= 1) & (jj <= W)
        relu3 = jnp.maximum(acc0, 0.0).reshape(H + 2, Wp, C)
        t_ref[...] = (jnp.where(keep, relu3, 0.0)
                      .astype(t_ref.dtype).reshape(R0, C))

        # ---- conv1: same structure, reading the bf16 intermediate ----------
        lhs1 = jnp.concatenate(
            [t_ref[pl.ds(kh * Wp, R1), :] for kh in range(3)], axis=-1)
        z1 = jnp.dot(lhs1, w1_ref[...],
                     preferred_element_type=jnp.float32)         # (R1, 3C) f32
        acc1 = (b1_ref[...] + z1[:, :C]
                + pltpu.roll(z1[:, C:2 * C], R1 - 1, 0)
                + pltpu.roll(z1[:, 2 * C:], R1 - 2, 0))

        # ---- residual add (exact f32) + full-width dense store --------------
        # The residual is the padded-input interior, offset by (2 rows, 2 cols)
        # = 2*Wp + 2 flat rows; an aligned slice + sublane roll realigns it.
        # Rolled-wrap rows (and the conv rolls' wrap rows) land only in the
        # discarded width-padding columns because Wp >= W + 4.
        res = pltpu.roll(xpp_ref[0, pl.ds(2 * Wp, R1), :], R1 - 2, 0)
        out_ref[0] = (acc1 + res).astype(out_ref.dtype)

    return kernel


@jax.jit
def resblock_128(x_nchw, w0, b0, w1, b1):
    """ResBlock_128 forward.  x_nchw: (N, 128, H, W) f32; w0/w1: HWIO (3,3,C,C)."""
    x = jnp.transpose(x_nchw, (0, 2, 3, 1)).astype(jnp.float32)      # NHWC
    N, H, W, c = x.shape
    assert c == C
    # TODO(synk): keep the surrounding model in NHWC to drop these transposes.

    Wp = ((W + 4 + 7) // 8) * 8                   # padded width, multiple of 8
    # Roll-wrap safety: all wrapped rows must land in discarded padding cols.
    assert Wp >= W + 4

    # Single f32 padded input (also carries the residual), rows flattened.
    xpp = jnp.pad(x, ((0, 0), (2, 2), (2, Wp - W - 2), (0, 0)))
    xpp = xpp.reshape(N, (H + 4) * Wp, C)

    # HWIO (kh,kw,cin,cout) -> fused (kh*C+cin, kw*C+cout): K=384, N=384, bf16.
    w0f = jnp.transpose(w0, (0, 2, 1, 3)).reshape(3 * C, 3 * C).astype(jnp.bfloat16)
    w1f = jnp.transpose(w1, (0, 2, 1, 3)).reshape(3 * C, 3 * C).astype(jnp.bfloat16)
    b0r = b0.reshape(1, C).astype(jnp.float32)
    b1r = b1.reshape(1, C).astype(jnp.float32)

    # ---- chip-aware VMEM request: working set clamped to ~85% of physical --
    R0 = (H + 2) * Wp
    R1 = H * Wp
    blk_io = ((H + 4) * Wp + R1) * C * 4                 # xpp + out blocks (f32)
    resident = 2 * (3 * C) * (3 * C) * 2 + 2 * C * 4     # fused weights + biases
    scratch = R0 * C * 2                                 # bf16 intermediate
    temps = (R0 + R1) * (3 * C) * (2 + 4)                # lhs (bf16) + z (f32)
    temps += (R0 + 2 * R1) * C * 4                       # acc0, acc1, residual
    working = 2 * blk_io + resident + scratch + temps + (4 << 20)
    try:
        vmem_cap = pltpu.get_tpu_info().vmem_capacity_bytes
    except Exception:  # pragma: no cover - conservative fallback
        vmem_cap = 64 << 20
    vmem_limit = int(min(max(working, 32 << 20), int(0.85 * vmem_cap)))

    out_flat = pl.pallas_call(
        _make_kernel(H, W, Wp),
        out_shape=jax.ShapeDtypeStruct((N, H * Wp, C), jnp.float32),
        grid=(N,),
        in_specs=[
            pl.BlockSpec((1, (H + 4) * Wp, C), lambda b: (b, 0, 0)),
            pl.BlockSpec((3 * C, 3 * C), lambda b: (0, 0)),
            pl.BlockSpec((1, C), lambda b: (0, 0)),
            pl.BlockSpec((3 * C, 3 * C), lambda b: (0, 0)),
            pl.BlockSpec((1, C), lambda b: (0, 0)),
        ],
        out_specs=pl.BlockSpec((1, H * Wp, C), lambda b: (b, 0, 0)),
        scratch_shapes=[pltpu.VMEM((R0, C), jnp.bfloat16)],
        compiler_params=pltpu.CompilerParams(
            dimension_semantics=("parallel",),
            vmem_limit_bytes=vmem_limit),
    )(xpp, w0f, b0r, w1f, b1r)
    # TODO(synk): add a row-block grid axis with a 2-row halo (manual DMA of
    # the overlapping rows) so the per-step footprint stays well under v7x's
    # 64 MiB VMEM at large H*W and feeds both v7x TensorCores when N is small;
    # at small images, batching several images per grid step would raise M.
    # TODO(synk): on v5e a 9x accumulating K=128,N=128 dot variant (no concat,
    # no rolls) is MXU-equivalent and lighter on the store/XLU path.

    # Drop the width padding and return to NCHW outside the kernel
    # (keeps the in-kernel store a full, unmasked lane/sublane-dense write).
    out_nhwc = out_flat.reshape(N, H, Wp, C)[:, :, :W, :]
    return jnp.transpose(out_nhwc, (0, 3, 1, 2))                     # -> NCHW


def _reference(x_nchw, w0, b0, w1, b1, compute_dtype=jnp.float32):
    """Plain-JAX reference of the PyTorch forward."""
    x = jnp.transpose(x_nchw, (0, 2, 3, 1)).astype(jnp.float32)
    dn = ("NHWC", "HWIO", "NHWC")
    y = jax.lax.conv_general_dilated(
        x.astype(compute_dtype), w0.astype(compute_dtype), (1, 1), "SAME",
        dimension_numbers=dn, preferred_element_type=jnp.float32) + b0
    y = jax.nn.relu(y)
    y = jax.lax.conv_general_dilated(
        y.astype(compute_dtype), w1.astype(compute_dtype), (1, 1), "SAME",
        dimension_numbers=dn, preferred_element_type=jnp.float32) + b1
    return jnp.transpose(x + y, (0, 3, 1, 2))


if __name__ == "__main__":
    key = jax.random.PRNGKey(0)
    kx, k0, kb0, k1, kb1 = jax.random.split(key, 5)

    N, H, W = 2, 16, 16
    x = jax.random.normal(kx, (N, C, H, W), jnp.float32)

    # Deterministic synthetic parameters (Kaiming-ish scale for 3x3x128 fan-in).
    scale = (2.0 / (9 * C)) ** 0.5
    w0 = jax.random.normal(k0, (3, 3, C, C), jnp.float32) * scale
    b0 = jax.random.normal(kb0, (C,), jnp.float32) * 0.01
    w1 = jax.random.normal(k1, (3, 3, C, C), jnp.float32) * scale
    b1 = jax.random.normal(kb1, (C,), jnp.float32) * 0.01

    out = jax.block_until_ready(resblock_128(x, w0, b0, w1, b1))
    assert out.shape == (N, C, H, W)

    # Check against a bf16-matched reference (same MXU input precision,
    # f32 accumulation / residual) -> tight tolerance.
    ref_bf16 = jax.block_until_ready(
        _reference(x, w0, b0, w1, b1, compute_dtype=jnp.bfloat16))
    assert jnp.allclose(out, ref_bf16, atol=5e-3, rtol=5e-3), \
        "mismatch vs bf16-matched reference"

    # Check against the full-f32 reference (module semantics) -> loose
    # tolerance covering the bf16 MXU inputs.
    ref_f32 = jax.block_until_ready(
        _reference(x, w0, b0, w1, b1, compute_dtype=jnp.float32))
    assert jnp.allclose(out, ref_f32, atol=5e-2, rtol=5e-2), \
        "mismatch vs float32 reference"

    print("KERNEL_OK")
</pallas_src>

<mosaic_0001>
module attributes {stable_mosaic.version = 11 : i64} {
  func.func @kernel(%arg0: i32, %arg1: memref<1x480x128xf32, #tpu.memory_space<vmem>>, %arg2: memref<384x384xbf16, #tpu.memory_space<vmem>>, %arg3: memref<1x128xf32, #tpu.memory_space<vmem>>, %arg4: memref<384x384xbf16, #tpu.memory_space<vmem>>, %arg5: memref<1x128xf32, #tpu.memory_space<vmem>>, %arg6: memref<1x384x128xf32, #tpu.memory_space<vmem>>, %arg7: memref<432x128xbf16, #tpu.memory_space<vmem>>) attributes {dimension_semantics = [#tpu.dimension_semantics<parallel>], iteration_bounds = array<i64: 2>, scalar_prefetch = 0 : i64, scratch_operands = 1 : i64, tpu.core_type = #tpu.core_type<tc>, window_params = [{transform_indices = @transform_0, window_bounds = array<i64: 1, 480, 128>}, {pipeline_mode = #tpu.pipeline_mode<synchronous>, transform_indices = @transform_1, window_bounds = array<i64: 384, 384>}, {pipeline_mode = #tpu.pipeline_mode<synchronous>, transform_indices = @transform_2, window_bounds = array<i64: 1, 128>}, {pipeline_mode = #tpu.pipeline_mode<synchronous>, transform_indices = @transform_3, window_bounds = array<i64: 384, 384>}, {pipeline_mode = #tpu.pipeline_mode<synchronous>, transform_indices = @transform_4, window_bounds = array<i64: 1, 128>}, {transform_indices = @transform_5, window_bounds = array<i64: 1, 384, 128>}]} {
    %c0 = arith.constant 0 : index
    %c0_0 = arith.constant 0 : index
    %c0_1 = arith.constant 0 : index
    %0 = vector.load %arg1[%c0, %c0_0, %c0_1] : memref<1x480x128xf32, #tpu.memory_space<vmem>>, vector<1x432x128xf32>
    %1 = vector.shape_cast %0 : vector<1x432x128xf32> to vector<432x128xf32>
    %2 = arith.truncf %1 : vector<432x128xf32> to vector<432x128xbf16>
    %c0_2 = arith.constant 0 : index
    %c24 = arith.constant 24 : index
    %c0_3 = arith.constant 0 : index
    %3 = vector.load %arg1[%c0_2, %c24, %c0_3] : memref<1x480x128xf32, #tpu.memory_space<vmem>>, vector<1x432x128xf32>
    %4 = vector.shape_cast %3 : vector<1x432x128xf32> to vector<432x128xf32>
    %5 = arith.truncf %4 : vector<432x128xf32> to vector<432x128xbf16>
    %c0_4 = arith.constant 0 : index
    %c48 = arith.constant 48 : index
    %c0_5 = arith.constant 0 : index
    %6 = vector.load %arg1[%c0_4, %c48, %c0_5] : memref<1x480x128xf32, #tpu.memory_space<vmem>>, vector<1x432x128xf32>
    %7 = vector.shape_cast %6 : vector<1x432x128xf32> to vector<432x128xf32>
    %8 = arith.truncf %7 : vector<432x128xf32> to vector<432x128xbf16>
    %9 = tpu.concatenate %2, %5, %8 in 1 : vector<432x128xbf16>, vector<432x128xbf16>, vector<432x128xbf16> -> vector<432x384xbf16>
    %c0_6 = arith.constant 0 : index
    %c0_7 = arith.constant 0 : index
    %10 = vector.load %arg2[%c0_6, %c0_7] : memref<384x384xbf16, #tpu.memory_space<vmem>>, vector<384x384xbf16>
    %cst = arith.constant dense<0.000000e+00> : vector<432x384xf32>
    %11 = tpu.matmul %9, %10, %cst {dimension_numbers = #tpu.dot_dimension_numbers<[1], [0], [0], [1], [0, 0, 1, 1], [], []>} : vector<432x384xbf16>, vector<384x384xbf16>, vector<432x384xf32> -> vector<432x384xf32>
    %c0_8 = arith.constant 0 : index
    %c0_9 = arith.constant 0 : index
    %12 = vector.load %arg3[%c0_8, %c0_9] : memref<1x128xf32, #tpu.memory_space<vmem>>, vector<1x128xf32>
    %13 = vector.extract_strided_slice %11 {offsets = [0, 0], sizes = [432, 128], strides = [1, 1]} : vector<432x384xf32> to vector<432x128xf32>
    %14 = vector.broadcast %12 : vector<1x128xf32> to vector<432x128xf32>
    %15 = arith.addf %14, %13 : vector<432x128xf32>
    %16 = vector.extract_strided_slice %11 {offsets = [0, 128], sizes = [432, 128], strides = [1, 1]} : vector<432x384xf32> to vector<432x128xf32>
    %c431_i32 = arith.constant 431 : i32
    %17 = tpu.dynamic_rotate %16 by %c431_i32 dim 0 : vector<432x128xf32>, i32 -> vector<432x128xf32>
    %18 = arith.addf %15, %17 : vector<432x128xf32>
    %19 = vector.extract_strided_slice %11 {offsets = [0, 256], sizes = [432, 128], strides = [1, 1]} : vector<432x384xf32> to vector<432x128xf32>
    %c430_i32 = arith.constant 430 : i32
    %20 = tpu.dynamic_rotate %19 by %c430_i32 dim 0 : vector<432x128xf32>, i32 -> vector<432x128xf32>
    %21 = arith.addf %18, %20 : vector<432x128xf32>
    %22 = tpu.iota {dimensions = array<i32: 0>} : vector<18x24x1xi32>
    %23 = tpu.iota {dimensions = array<i32: 1>} : vector<18x24x1xi32>
    %c1_i32 = arith.constant 1 : i32
    %24 = vector.broadcast %c1_i32 : i32 to vector<18x24x1xi32>
    %25 = arith.cmpi sge, %22, %24 : vector<18x24x1xi32>
    %c16_i32 = arith.constant 16 : i32
    %26 = vector.broadcast %c16_i32 : i32 to vector<18x24x1xi32>
    %27 = arith.cmpi sle, %22, %26 : vector<18x24x1xi32>
    %28 = arith.andi %25, %27 : vector<18x24x1xi1>
    %c1_i32_10 = arith.constant 1 : i32
    %29 = vector.broadcast %c1_i32_10 : i32 to vector<18x24x1xi32>
    %30 = arith.cmpi sge, %23, %29 : vector<18x24x1xi32>
    %31 = arith.andi %28, %30 : vector<18x24x1xi1>
    %c16_i32_11 = arith.constant 16 : i32
    %32 = vector.broadcast %c16_i32_11 : i32 to vector<18x24x1xi32>
    %33 = arith.cmpi sle, %23, %32 : vector<18x24x1xi32>
    %34 = arith.andi %31, %33 : vector<18x24x1xi1>
    %cst_12 = arith.constant 0.000000e+00 : f32
    %35 = vector.broadcast %cst_12 : f32 to vector<432x128xf32>
    %36 = arith.maximumf %21, %35 : vector<432x128xf32>
    %37 = vector.shape_cast %36 : vector<432x128xf32> to vector<18x24x128xf32>
    %cst_13 = arith.constant 0.000000e+00 : f32
    %38 = vector.shape_cast %34 : vector<18x24x1xi1> to vector<18x24x1xi1>
    %39 = vector.broadcast %38 : vector<18x24x1xi1> to vector<18x24x128xi1>
    %40 = vector.broadcast %cst_13 : f32 to vector<18x24x128xf32>
    %41 = arith.select %39, %37, %40 : vector<18x24x128xi1>, vector<18x24x128xf32>
    %42 = arith.truncf %41 : vector<18x24x128xf32> to vector<18x24x128xbf16>
    %43 = vector.shape_cast %42 : vector<18x24x128xbf16> to vector<432x128xbf16>
    %c0_14 = arith.constant 0 : index
    %c0_15 = arith.constant 0 : index
    %44 = vector.load %arg7[%c0_14, %c0_15] : memref<432x128xbf16, #tpu.memory_space<vmem>>, vector<432x128xbf16>
    tpu.vector_store %arg7[%c0_14, %c0_15], %43 {strides = array<i32>} : memref<432x128xbf16, #tpu.memory_space<vmem>>, vector<432x128xbf16>,
    %c0_16 = arith.constant 0 : index
    %c0_17 = arith.constant 0 : index
    %45 = vector.load %arg7[%c0_16, %c0_17] : memref<432x128xbf16, #tpu.memory_space<vmem>>, vector<384x128xbf16>
    %c24_18 = arith.constant 24 : index
    %c0_19 = arith.constant 0 : index
    %46 = vector.load %arg7[%c24_18, %c0_19] : memref<432x128xbf16, #tpu.memory_space<vmem>>, vector<384x128xbf16>
    %c48_20 = arith.constant 48 : index
    %c0_21 = arith.constant 0 : index
    %47 = vector.load %arg7[%c48_20, %c0_21] : memref<432x128xbf16, #tpu.memory_space<vmem>>, vector<384x128xbf16>
    %48 = tpu.concatenate %45, %46, %47 in 1 : vector<384x128xbf16>, vector<384x128xbf16>, vector<384x128xbf16> -> vector<384x384xbf16>
    %c0_22 = arith.constant 0 : index
    %c0_23 = arith.constant 0 : index
    %49 = vector.load %arg4[%c0_22, %c0_23] : memref<384x384xbf16, #tpu.memory_space<vmem>>, vector<384x384xbf16>
    %cst_24 = arith.constant dense<0.000000e+00> : vector<384x384xf32>
    %50 = tpu.matmul %48, %49, %cst_24 {dimension_numbers = #tpu.dot_dimension_numbers<[1], [0], [0], [1], [0, 0, 1, 1], [], []>} : vector<384x384xbf16>, vector<384x384xbf16>, vector<384x384xf32> -> vector<384x384xf32>
    %c0_25 = arith.constant 0 : index
    %c0_26 = arith.constant 0 : index
    %51 = vector.load %arg5[%c0_25, %c0_26] : memref<1x128xf32, #tpu.memory_space<vmem>>, vector<1x128xf32>
    %52 = vector.extract_strided_slice %50 {offsets = [0, 0], sizes = [384, 128], strides = [1, 1]} : vector<384x384xf32> to vector<384x128xf32>
    %53 = vector.broadcast %51 : vector<1x128xf32> to vector<384x128xf32>
    %54 = arith.addf %53, %52 : vector<384x128xf32>
    %55 = vector.extract_strided_slice %50 {offsets = [0, 128], sizes = [384, 128], strides = [1, 1]} : vector<384x384xf32> to vector<384x128xf32>
    %c383_i32 = arith.constant 383 : i32
    %56 = tpu.dynamic_rotate %55 by %c383_i32 dim 0 : vector<384x128xf32>, i32 -> vector<384x128xf32>
    %57 = arith.addf %54, %56 : vector<384x128xf32>
    %58 = vector.extract_strided_slice %50 {offsets = [0, 256], sizes = [384, 128], strides = [1, 1]} : vector<384x384xf32> to vector<384x128xf32>
    %c382_i32 = arith.constant 382 : i32
    %59 = tpu.dynamic_rotate %58 by %c382_i32 dim 0 : vector<384x128xf32>, i32 -> vector<384x128xf32>
    %60 = arith.addf %57, %59 : vector<384x128xf32>
    %c0_27 = arith.constant 0 : index
    %c48_28 = arith.constant 48 : index
    %c0_29 = arith.constant 0 : index
    %61 = vector.load %arg1[%c0_27, %c48_28, %c0_29] : memref<1x480x128xf32, #tpu.memory_space<vmem>>, vector<1x384x128xf32>
    %62 = vector.shape_cast %61 : vector<1x384x128xf32> to vector<384x128xf32>
    %c382_i32_30 = arith.constant 382 : i32
    %63 = tpu.dynamic_rotate %62 by %c382_i32_30 dim 0 : vector<384x128xf32>, i32 -> vector<384x128xf32>
    %64 = arith.addf %60, %63 : vector<384x128xf32>
    %c0_31 = arith.constant 0 : index
    %c0_32 = arith.constant 0 : index
    %c0_33 = arith.constant 0 : index
    %65 = vector.load %arg6[%c0_31, %c0_32, %c0_33] : memref<1x384x128xf32, #tpu.memory_space<vmem>>, vector<1x384x128xf32>
    %66 = vector.shape_cast %65 : vector<1x384x128xf32> to vector<384x128xf32>
    %67 = vector.shape_cast %64 : vector<384x128xf32> to vector<1x384x128xf32>
    tpu.vector_store %arg6[%c0_31, %c0_32, %c0_33], %67 {strides = array<i32>} : memref<1x384x128xf32, #tpu.memory_space<vmem>>, vector<1x384x128xf32>,
    return
  }
  func.func @transform_0(%arg0: i32) -> (i32, i32, i32) {
    %c0_i32 = arith.constant 0 : i32
    %c0_i32_0 = arith.constant 0 : i32
    %c0_i32_1 = arith.constant 0 : i32
    return %arg0, %c0_i32, %c0_i32_0 : i32, i32, i32
  }
  func.func @transform_1(%arg0: i32) -> (i32, i32) {
    %c0_i32 = arith.constant 0 : i32
    %c0_i32_0 = arith.constant 0 : i32
    %c0_i32_1 = arith.constant 0 : i32
    return %c0_i32, %c0_i32_0 : i32, i32
  }
  func.func @transform_2(%arg0: i32) -> (i32, i32) {
    %c0_i32 = arith.constant 0 : i32
    %c0_i32_0 = arith.constant 0 : i32
    %c0_i32_1 = arith.constant 0 : i32
    return %c0_i32, %c0_i32_0 : i32, i32
  }
  func.func @transform_3(%arg0: i32) -> (i32, i32) {
    %c0_i32 = arith.constant 0 : i32
    %c0_i32_0 = arith.constant 0 : i32
    %c0_i32_1 = arith.constant 0 : i32
    return %c0_i32, %c0_i32_0 : i32, i32
  }
  func.func @transform_4(%arg0: i32) -> (i32, i32) {
    %c0_i32 = arith.constant 0 : i32
    %c0_i32_0 = arith.constant 0 : i32
    %c0_i32_1 = arith.constant 0 : i32
    return %c0_i32, %c0_i32_0 : i32, i32
  }
  func.func @transform_5(%arg0: i32) -> (i32, i32, i32) {
    %c0_i32 = arith.constant 0 : i32
    %c0_i32_0 = arith.constant 0 : i32
    %c0_i32_1 = arith.constant 0 : i32
    return %arg0, %c0_i32, %c0_i32_0 : i32, i32, i32
  }
}

</mosaic_0001>

<bundles_post_ra>
// kernel: resblock_128.1
= control target key start
LH: loop header
LB: loop body
LE: loop exit
PB: predicated region body
PF: predicated region fallthrough
CT: control target
= control target key end

     0   :  { %s6442_s18 = smov 0   ;;  %s9351_s0 = inlined_call_operand.vmem [shape: f32[2,480,128], index: 0, kind: input, shape index: {}]   ;;  %s9352_s1 = inlined_call_operand.vmem [shape: bf16[384,384], index: 1, kind: input, shape index: {}]   ;;  %s9353_s2 = inlined_call_operand.vmem [shape: f32[1,128], index: 2, kind: input, shape index: {}]   ;;  %s9354_s3 = inlined_call_operand.vmem [shape: bf16[384,384], index: 3, kind: input, shape index: {}]   ;;  %s9355_s4 = inlined_call_operand.vmem [shape: f32[1,128], index: 4, kind: input, shape index: {}]   ;;  %s9356_s5 = inlined_call_operand.vmem [shape: f32[2,384,128], index: 5, kind: output, shape index: {}]  }
   0x1 LB: > { %s5374_s19 = sadd.s32 4294967295, %s6406_s18   ;;  %p5378_p0 = scmp.ge.s32.totalorder %s6406_s18, 1  ;;  %s6406_s18 = sphi %s6442_s18, %s15_s18  }
   0x2   : > { %p187_p1 = scmp.lt.s32.totalorder %s6406_s18, 3 }
   0x4   : > { %p188_p2 = pnand %p5378_p0, %p187_p1 }
   0x6   : > { %191 = sbr.rel (%p188_p2) target bundleno = 1147 (0x47b), region = 40 }
   0xb   : > { %v6126_v0 = vld [vmem:[%s9352_s1 + $0xac] ss:$12 sps:$4 sm:$0xff]   ;;  %v6128_v1 = vld [vmem:[%s9352_s1 + $0xa8] ss:$12 sps:$4 sm:$0xff]   ;;  %v9368_v2 = vmov 0   ;;  %p215_p3 = scmp.lt.s32.totalorder %s5374_s19, 1 }
   0xc   : > { %1273 = vmatprep.mubr.bf16.mxu1 %v9368_v2  ;;  %898 = vmatprep.subr.bf16.mxu0 %v6126_v0  ;;  %v6129_v3 = vld [vmem:[%s9352_s1 + $0x94] ss:$12 sps:$4 sm:$0xff]   ;;  %v6131_v4 = vld [vmem:[%s9352_s1 + $0x90] ss:$12 sps:$4 sm:$0xff]   ;;  %v6134_v6 = vld [vmem:[%s9352_s1 + $0x78] ss:$12 sps:$4 sm:$0xff]  }
   0xd   : > { %899 = vmatpush1.bf16.msra.mxu0 %v6128_v1  ;;  %v6132_v5 = vld [vmem:[%s9352_s1 + $0x7c] ss:$12 sps:$4 sm:$0xff]   ;;  %v6135_v7 = vld [vmem:[%s9352_s1 + $0x64] ss:$12 sps:$4 sm:$0xff]   ;;  %s9610_s19 = smov (!%p215_p3, %s5374_s19), 1  ;;  %vm6410_vm1 = vmmov 0  }
   0xe   : > { %900 = vmatprep.subr.bf16.mxu0 %v6129_v3  ;;  %v6137_v8 = vld [vmem:[%s9352_s1 + $0x60] ss:$12 sps:$4 sm:$0xff]   ;;  %s6112_s13 = smul.u32 480, %s9610_s19  ;;  %v6140_v10 = vld [vmem:[%s9352_s1 + $0x48] ss:$12 sps:$4 sm:$0xff]  }
   0xf   : > { %v6138_v9 = vld [vmem:[%s9352_s1 + $0x4c] ss:$12 sps:$4 sm:$0xff]   ;;  %v6141_v11 = vld [vmem:[%s9352_s1 + $0x34] ss:$12 sps:$4 sm:$0xff]   ;;  %v6143_v12 = vld [vmem:[%s9352_s1 + $0x30] ss:$12 sps:$4 sm:$0xff]  }
  0x10   : > { %s6490_s22 = scalar_lea.vmem %s9351_s0, %s6112_s13  ;;  %v6144_v13 = vld [vmem:[%s9352_s1 + $0x1c] ss:$12 sps:$4 sm:$0xff]   ;;  %v6146_v15 = vld [vmem:[%s9352_s1 + $0x18] ss:$12 sps:$4 sm:$0xff]   ;;  %v6528_v21 = vld [vmem:[%s9352_s1 + $0x214] ss:$12 sps:$4 sm:$0xff]  }
  0x11   : > { %901 = vmatpush1.bf16.msra.mxu0 %v6131_v4  ;;  %v6499_v14 = vld [vmem:[%s6490_s22 + $0x18] sm:$0xff]  ;;  %v6505_v16 = vld [vmem:[%s6490_s22 + $0x20] sm:$0xff]  ;;  %v6517_v19 = vld [vmem:[%s9352_s1 + $0x228] ss:$12 sps:$4 sm:$0xff]   ;;  %s6113_s8 = smul.u32 384, %s9610_s19 }
  0x12   : > { %902 = vmatprep.subr.bf16.mxu0 %v6132_v5  ;;  %v6147_v17 = vld [vmem:[%s9352_s1 + $0x4] ss:$12 sps:$4 sm:$0xff]   ;;  %v6512_v18 = vpack.c.bf16 %v6505_v16, %v6499_v14  ;;  %v6522_v20 = vld [vmem:[%s9352_s1 + $0x22c] ss:$12 sps:$4 sm:$0xff]   ;;  %v6547_v25 = vld [vmem:[%s9352_s1 + $0x1fc] ss:$12 sps:$4 sm:$0xff]  }
  0x13   : > { %6096 = vmatprep.subr.bf16.mxu1 %v6522_v20  ;;  %v6149_v22 = vld [vmem:[%s9352_s1] ss:$12 sps:$4 sm:$0xff]   ;;  %v6538_v23 = vld [vmem:[%s9352_s1 + $0x210] ss:$12 sps:$4 sm:$0xff]   ;;  %v6152_v26 = vld [vmem:[%s9352_s1 + $0x168] ss:$12 sps:$4 sm:$0xff]   ;;  %s9027_s10 = scalar_lea.vmem %s9356_s5, %s6113_s8 }
  0x14   : > { %930 = vmatprep.mubr.bf16.mxu0 %v6512_v18  ;;  %6104 = vmatpush1.bf16.msra.mxu1 %v6517_v19  ;;  %v6150_v24 = vld [vmem:[%s9352_s1 + $0x16c] ss:$12 sps:$4 sm:$0xff]   ;;  %v6153_v28 = vld [vmem:[%s9352_s1 + $0x154] ss:$12 sps:$4 sm:$0xff]   ;;  %v6565_v29 = vld [vmem:[%s9352_s1 + $0x1e4] ss:$12 sps:$4 sm:$0xff]  }
  0x15   : > { %903 = vmatpush1.bf16.msra.mxu0 %v6134_v6  ;;  %6097 = vmatprep.subr.bf16.mxu1 %v6528_v21  ;;  %v6556_v27 = vld [vmem:[%s9352_s1 + $0x1f8] ss:$12 sps:$4 sm:$0xff]   ;;  %v6155_v30 = vld [vmem:[%s9352_s1 + $0x150] ss:$12 sps:$4 sm:$0xff]   ;;  %v6574_v31 = vld [vmem:[%s9352_s1 + $0x1e0] ss:$12 sps:$4 sm:$0xff]  }
  0x16   : > { %904 = vmatprep.subr.bf16.mxu0 %v6135_v7  ;;  %v6156_v32 = vld [vmem:[%s9352_s1 + $0x13c] ss:$12 sps:$4 sm:$0xff]   ;;  %v6583_v33 = vld [vmem:[%s9352_s1 + $0x1cc] ss:$12 sps:$4 sm:$0xff]   ;;  %v6159_v35 = vld [vmem:[%s9352_s1 + $0x124] ss:$12 sps:$4 sm:$0xff]  }
  0x17   : > { %v6158_v34 = vld [vmem:[%s9352_s1 + $0x138] ss:$12 sps:$4 sm:$0xff]   ;;  %v6595_v36 = vld [vmem:[%s9352_s1 + $0x1c8] ss:$12 sps:$4 sm:$0xff]   ;;  %v6161_v38 = vld [vmem:[%s9352_s1 + $0x120] ss:$12 sps:$4 sm:$0xff]  }
  0x18   : > { %6105 = vmatpush1.bf16.msra.mxu1 %v6538_v23  ;;  %v6601_v37 = vld [vmem:[%s9352_s1 + $0x1b4] ss:$12 sps:$4 sm:$0xff]   ;;  %v6162_v39 = vld [vmem:[%s9352_s1 + $0x10c] ss:$12 sps:$4 sm:$0xff]   ;;  %v6613_v40 = vld [vmem:[%s9352_s1 + $0x1b0] ss:$12 sps:$4 sm:$0xff]  }
  0x19   : > { %905 = vmatpush1.bf16.msra.mxu0 %v6137_v8  ;;  %6098 = vmatprep.subr.bf16.mxu1 %v6547_v25  ;;  %v6619_v41 = vld [vmem:[%s9352_s1 + $0x19c] ss:$12 sps:$4 sm:$0xff]   ;;  %v6628_v43 = vld [vmem:[%s9352_s1 + $0x198] ss:$12 sps:$4 sm:$0xff]   ;;  %v6165_v44 = vld [vmem:[%s9352_s1 + $0xf4] ss:$12 sps:$4 sm:$0xff]  }
  0x1a   : > { %906 = vmatprep.subr.bf16.mxu0 %v6138_v9  ;;  %v6164_v42 = vld [vmem:[%s9352_s1 + $0x108] ss:$12 sps:$4 sm:$0xff]   ;;  %v6637_v45 = vld [vmem:[%s9352_s1 + $0x184] ss:$12 sps:$4 sm:$0xff]   ;;  %v6645_v47 = vld [vmem:[%s9352_s1 + $0x180] ss:$12 sps:$4 sm:$0xff]  }
  0x1b   : > { %v6167_v46 = vld [vmem:[%s9352_s1 + $0xf0] ss:$12 sps:$4 sm:$0xff]   ;;  %v6170_v51 = vld [vmem:[%s9352_s1 + $0xd8] ss:$12 sps:$4 sm:$0xff]   ;;  %v6173_v55 = vld [vmem:[%s9352_s1 + $0xc0] ss:$12 sps:$4 sm:$0xff]  }
  0x1c   : > { %6106 = vmatpush1.bf16.msra.mxu1 %v6556_v27  ;;  %v6648_v48 = vld [vmem:[%s6490_s22 + $0x70] sm:$0xff]  ;;  %v6651_v49 = vld [vmem:[%s6490_s22 + $0x78] sm:$0xff]  ;;  %v226_v56 = vld [vmem:[%s6490_s22] sm:$0xff] }
  0x1d   : > { %907 = vmatpush1.bf16.msra.mxu0 %v6140_v10  ;;  %6099 = vmatprep.subr.bf16.mxu1 %v6565_v29  ;;  %v6168_v50 = vld [vmem:[%s9352_s1 + $0xdc] ss:$12 sps:$4 sm:$0xff]   ;;  %v6663_v52 = vpack.c.bf16 %v6651_v49, %v6648_v48  ;;  %v6171_v53 = vld [vmem:[%s9352_s1 + $0xc4] ss:$12 sps:$4 sm:$0xff]   ;;  %v6200_v3 = vld [vmem:[%s9352_s1 + $0x80] ss:$12 sps:$4 sm:$0xff]  }
  0x1e   : > { %908 = vmatprep.subr.bf16.mxu0 %v6141_v11  ;;  %v6198_v54 = vld [vmem:[%s9352_s1 + $0xb0] ss:$12 sps:$4 sm:$0xff]   ;;  %v227_v57 = vld [vmem:[%s6490_s22 + $0x8] sm:$0xff]  ;;  %v6679_v58 = vld [vmem:[%s6490_s22 + $0x80] sm:$0xff] }
  0x1f   : > { %v6682_v59 = vld [vmem:[%s6490_s22 + $0x88] sm:$0xff]  ;;  %v6686_v61 = vld [vmem:[%s6490_s22 + $0x30] sm:$0xff]  ;;  %v6199_v62 = vld [vmem:[%s9352_s1 + $0x98] ss:$12 sps:$4 sm:$0xff]   ;;  %v6694_v63 = vpack.c.bf16 %v227_v57, %v226_v56 }
  0x20   : > { %6107 = vmatpush1.bf16.msra.mxu1 %v6574_v31  ;;  %v231_v60 = vld [vmem:[%s6490_s22 + $0x28] sm:$0xff]  ;;  %v6698_v0 = vpack.c.bf16 %v6682_v59, %v6679_v58  ;;  %v228_v4 = vld [vmem:[%s6490_s22 + $0x10] sm:$0xff]  ;;  %v233_v6 = vld [vmem:[%s6490_s22 + $0x38] sm:$0xff] }
  0x21   : > { %909 = vmatpush1.bf16.msra.mxu0 %v6143_v12  ;;  %6100 = vmatprep.subr.bf16.mxu1 %v6583_v33  ;;  %v6701_v1 = vpack.c.bf16 %v6686_v61, %v231_v60  ;;  %v6709_v5 = vld [vmem:[%s6490_s22 + $0x90] sm:$0xff]  ;;  %v6715_v7 = vld [vmem:[%s6490_s22 + $0x40] sm:$0xff]  ;;  %v6719_v8 = vld [vmem:[%s6490_s22 + $0x98] sm:$0xff]  ;;  %v6729_v10 = vpack.c.bf16 %v6499_v14, %v228_v4 }
  0x22   : > { %910 = vmatprep.subr.bf16.mxu0 %v6144_v13  ;;  %v6201_v9 = vld [vmem:[%s9352_s1 + $0x68] ss:$12 sps:$4 sm:$0xff]   ;;  %v6733_v11 = vpack.c.bf16 %v6719_v8, %v6709_v5  ;;  %v6737_v12 = vpack.c.bf16 %v6715_v7, %v233_v6  ;;  %v6202_v13 = vld [vmem:[%s9352_s1 + $0x50] ss:$12 sps:$4 sm:$0xff]   ;;  %v363_v56 = vld [vmem:[%s6490_s22 + $0x100] sm:$0xff] }
  0x23   : > { %v6748_v14 = vld [vmem:[%s6490_s22 + $0xa8] sm:$0xff] }
  0x24   : > { %6108 = vmatpush1.bf16.msra.mxu1 %v6595_v36  ;;  %v6899_v57 = vld [vmem:[%s6490_s22 + $0x108] sm:$0xff] }
  0x25   : > { %911 = vmatpush1.bf16.msra.mxu0 %v6146_v15  ;;  %6101 = vmatprep.subr.bf16.mxu1 %v6601_v37  ;;  %v6745_v15 = vld [vmem:[%s6490_s22 + $0xa0] sm:$0xff] }
  0x26   : > { %912 = vmatprep.subr.bf16.mxu0 %v6147_v17  ;;  %v235_v17 = vld [vmem:[%s6490_s22 + $0x48] sm:$0xff] }
  0x28   : > { %6109 = vmatpush1.bf16.msra.mxu1 %v6613_v40 }
  0x29   : > { %913 = vmatpush1.bf16.msra.mxu0 %v6149_v22  ;;  %6102 = vmatprep.subr.bf16.mxu1 %v6619_v41 }
  0x2a   : > { %914 = vmatprep.subr.bf16.mxu0 %v6150_v24  ;;  %v6775_v24 = vld [vmem:[%s6490_s22 + $0xb0] sm:$0xff] }
  0x2c   : > { %6110 = vmatpush1.bf16.msra.mxu1 %v6628_v43 }
  0x2d   : > { %915 = vmatpush2.bf16.msra.mxu0 %v6152_v26  ;;  %6103 = vmatprep.subr.bf16.mxu1 %v6637_v45  ;;  %v238_v26 = vld [vmem:[%s6490_s22 + $0x60] sm:$0xff] }
  0x2e   : > { %916 = vmatprep.subr.bf16.mxu0 %v6153_v28  ;;  %v6793_v28 = vpack.c.bf16 %v233_v6, %v6686_v61  ;;  %v365_v61 = vld [vmem:[%s6490_s22 + $0x110] sm:$0xff]  ;;  %v6933_v6 = vld [vmem:[%s6490_s22 + $0x128] sm:$0xff] }
  0x30   : > { %6111 = vmatpush1.bf16.msra.mxu1 %v6645_v47 }
  0x31   : > { %917 = vmatpush2.bf16.msra.mxu0 %v6155_v30  ;;  %1504 = vmatprep.subr.bf16.mxu1 %v9368_v2 }
  0x32   : > { %918 = vmatprep.subr.bf16.mxu0 %v6156_v32  ;;  %v6806_v32 = vld [vmem:[%s6490_s22 + $0xc0] sm:$0xff] }
  0x33   : > { %1274 = vmatmul.mubr.bf16.vlgmr.msra.gmra.mxu1 %v6663_v52 }
  0x34   : > { %1283 = vmatprep.mubr.bf16.mxu1 %v9368_v2  ;;  %1505 = vmatpush1.bf16.msra.mxu1 %v6198_v54 }
  0x35   : > { %919 = vmatpush2.bf16.msra.mxu0 %v6158_v34  ;;  %1506 = vmatprep.subr.bf16.mxu1 %v9368_v2  ;;  %v239_v34 = vld [vmem:[%s6490_s22 + $0x68] sm:$0xff] }
  0x36   : > { %920 = vmatprep.subr.bf16.mxu0 %v6159_v35  ;;  %v6206_v35 = vld [vmem:[%s9352_s1 + $0x170] ss:$12 sps:$4 sm:$0xff]  }
  0x38   : > { %1507 = vmatpush1.bf16.msra.mxu1 %v6199_v62  ;;  %v6917_v62 = vld [vmem:[%s6490_s22 + $0x118] sm:$0xff] }
  0x39   : > { %921 = vmatpush2.bf16.msra.mxu0 %v6161_v38  ;;  %1508 = vmatprep.subr.bf16.mxu1 %v9368_v2  ;;  %v6832_v38 = vpack.c.bf16 %v6648_v48, %v239_v34 }
  0x3a   : > { %922 = vmatprep.subr.bf16.mxu0 %v6162_v39  ;;  %v357_v39 = vld [vmem:[%s6490_s22 + $0xd0] sm:$0xff] }
  0x3b   : > { %1284 = vmatmul.mubr.bf16.gmra.mxu1 %v6698_v0 }
  0x3c   : > { %1293 = vmatprep.mubr.bf16.mxu1 %v9368_v2  ;;  %1509 = vmatpush1.bf16.msra.mxu1 %v6200_v3  ;;  %v6921_v3 = vpack.c.bf16 %v6917_v62, %v365_v61 }
  0x3d   : > { %923 = vmatpush2.bf16.msra.mxu0 %v6164_v42  ;;  %1510 = vmatprep.subr.bf16.mxu1 %v9368_v2 }
  0x3e   : > { %924 = vmatprep.subr.bf16.mxu0 %v6165_v44  ;;  %v6207_v44 = vld [vmem:[%s9352_s1 + $0x158] ss:$12 sps:$4 sm:$0xff]   ;;  %9418 = vst [vmem:[#allocation3_spill] sm:$0xff] %v6921_v3 }
  0x40   : > { %1511 = vmatpush1.bf16.msra.mxu1 %v6201_v9 }
  0x41   : > { %925 = vmatpush2.bf16.msra.mxu0 %v6167_v46  ;;  %1512 = vmatprep.subr.bf16.mxu1 %v9368_v2  ;;  %v6862_v46 = vld [vmem:[%s6490_s22 + $0xe8] sm:$0xff] }
  0x42   : > { %926 = vmatprep.subr.bf16.mxu0 %v6168_v50  ;;  %v6208_v50 = vld [vmem:[%s9352_s1 + $0x140] ss:$12 sps:$4 sm:$0xff]  }
  0x43   : > { %1294 = vmatmul.mubr.bf16.gmra.mxu1 %v6733_v11 }
  0x44   : > { %1303 = vmatprep.mubr.bf16.mxu1 %v9368_v2  ;;  %1513 = vmatpush1.bf16.msra.mxu1 %v6202_v13  ;;  %v369_v13 = vld [vmem:[%s6490_s22 + $0x130] sm:$0xff] }
  0x45   : > { %927 = vmatpush2.bf16.msra.mxu0 %v6170_v51  ;;  %1514 = vmatprep.subr.bf16.mxu1 %v9368_v2  ;;  %v361_v51 = vld [vmem:[%s6490_s22 + $0xf0] sm:$0xff] }
  0x46   : > { %928 = vmatprep.subr.bf16.mxu0 %v6171_v53  ;;  %v6883_v53 = vld [vmem:[%s6490_s22 + $0xf8] sm:$0xff] }
  0x47   : > { %v6887_v54 = vpack.c.bf16 %v6883_v53, %v361_v51 }
  0x49   : > { %929 = vmatpush2.bf16.msra.mxu0 %v6173_v55  ;;  %v6891_v55 = vpack.c.bf16 %v6745_v15, %v6719_v8 }
  0x4a   : > { %1201 = vmatprep.subr.bf16.mxu0 %v6522_v20  ;;  %v6760_v20 = vpack.c.bf16 %v231_v60, %v6505_v16  ;;  %v6778_v16 = vld [vmem:[%s6490_s22 + $0xb8] sm:$0xff]  ;;  %v6209_v60 = vld [vmem:[%s9352_s1 + $0x128] ss:$12 sps:$4 sm:$0xff]  }
  0x4b   : > { %v6925_v4 = vpack.c.bf16 %v6806_v32, %v6778_v16 }
  0x4c   : > { %931 = vmatmul.mubr.bf16.vlgmr.msra.gmra.mxu0 %v6694_v63 }
  0x4d   : > { %1202 = vmatpush1.bf16.msra.mxu0 %v6517_v19  ;;  %940 = vmatprep.mubr.bf16.mxu0 %v6701_v1  ;;  %v236_v19 = vld [vmem:[%s6490_s22 + $0x50] sm:$0xff] }
  0x4e   : > { %1203 = vmatprep.subr.bf16.mxu0 %v6528_v21  ;;  %v6764_v21 = vpack.c.bf16 %v6748_v14, %v6745_v15  ;;  %v6766_v22 = vpack.c.bf16 %v236_v19, %v235_v17  ;;  %v370_v15 = vld [vmem:[%s6490_s22 + $0x138] sm:$0xff] }
  0x50   : > { %1304 = vmatmul.mubr.bf16.gmra.mxu1 %v6764_v21 }
  0x51   : > { %1204 = vmatpush1.bf16.msra.mxu0 %v6538_v23  ;;  %v6203_v23 = vld [vmem:[%s9352_s1 + $0x38] ss:$12 sps:$4 sm:$0xff]   ;;  %1313 = vmatprep.mubr.bf16.mxu1 %v9368_v2 }
  0x52   : > { %1205 = vmatprep.subr.bf16.mxu0 %v6547_v25  ;;  %v237_v25 = vld [vmem:[%s6490_s22 + $0x58] sm:$0xff]  ;;  %1515 = vmatpush1.bf16.msra.mxu1 %v6203_v23  ;;  %v371_v23 = vld [vmem:[%s6490_s22 + $0x140] sm:$0xff] }
  0x53   : > { %1516 = vmatprep.subr.bf16.mxu1 %v9368_v2  ;;  %v6799_v30 = vpack.c.bf16 %v238_v26, %v237_v25 }
  0x54   : > { %941 = vmatmul.mubr.bf16.gmra.mxu0 %v6729_v10 }
  0x55   : > { %950 = vmatprep.mubr.bf16.mxu0 %v6737_v12  ;;  %1206 = vmatpush1.bf16.msra.mxu0 %v6556_v27  ;;  %v6204_v27 = vld [vmem:[%s9352_s1 + $0x20] ss:$12 sps:$4 sm:$0xff]  }
  0x56   : > { %1207 = vmatprep.subr.bf16.mxu0 %v6565_v29  ;;  %v6797_v29 = vpack.c.bf16 %v6778_v16, %v6775_v24  ;;  %1517 = vmatpush1.bf16.msra.mxu1 %v6204_v27  ;;  %v9357_v16 = vmov 0.0   ;;  %v373_v27 = vld [vmem:[%s6490_s22 + $0x150] sm:$0xff] }
  0x57   : > { %1518 = vmatprep.subr.bf16.mxu1 %v9368_v2 }
  0x58   : > { %1314 = vmatmul.mubr.bf16.gmra.mxu1 %v6797_v29 }
  0x59   : > { %1208 = vmatpush1.bf16.msra.mxu0 %v6574_v31  ;;  %v6205_v31 = vld [vmem:[%s9352_s1 + $0x8] ss:$12 sps:$4 sm:$0xff]   ;;  %1323 = vmatprep.mubr.bf16.mxu1 %v9368_v2 }
  0x5a   : > { %1209 = vmatprep.subr.bf16.mxu0 %v6583_v33  ;;  %v6809_v33 = vld [vmem:[%s6490_s22 + $0xc8] sm:$0xff]  ;;  %1519 = vmatpush1.bf16.msra.mxu1 %v6205_v31  ;;  %v374_v31 = vld [vmem:[%s6490_s22 + $0x158] sm:$0xff] }
  0x5b   : > { %1520 = vmatprep.subr.bf16.mxu1 %v9368_v2  ;;  %v6942_v9 = vpack.c.bf16 %v357_v39, %v6809_v33 }
  0x5c   : > { %951 = vmatmul.mubr.bf16.gmra.mxu0 %v6760_v20 }
  0x5d   : > { %960 = vmatprep.mubr.bf16.mxu0 %v6766_v22  ;;  %1210 = vmatpush1.bf16.msra.mxu0 %v6595_v36  ;;  %v6825_v36 = vpack.c.bf16 %v235_v17, %v6715_v7  ;;  %v6210_v7 = vld [vmem:[%s9352_s1 + $0x110] ss:$12 sps:$4 sm:$0xff]  }
  0x5e   : > { %1211 = vmatprep.subr.bf16.mxu0 %v6601_v37  ;;  %v6829_v37 = vpack.c.bf16 %v6809_v33, %v6806_v32  ;;  %1521 = vmatpush2.bf16.msra.mxu1 %v6206_v35  ;;  %v6978_v32 = vpack.c.bf16 %v374_v31, %v373_v27  ;;  %v6981_v33 = vpack.c.bf16 %v363_v56, %v6883_v53  ;;  %v375_v35 = vld [vmem:[%s6490_s22 + $0x160] sm:$0xff] }
  0x5f   : > { %1522 = vmatprep.subr.bf16.mxu1 %v9368_v2 }
  0x60   : > { %1324 = vmatmul.mubr.bf16.gmra.mxu1 %v6829_v37  ;;  %9422 = vst [vmem:[#allocation7_spill] sm:$0xff] %v6978_v32 }
  0x61   : > { %1212 = vmatpush1.bf16.msra.mxu0 %v6613_v40  ;;  %1333 = vmatprep.mubr.bf16.mxu1 %v9368_v2  ;;  %v6842_v40 = vld [vmem:[%s6490_s22 + $0xd8] sm:$0xff] }
  0x62   : > { %1213 = vmatprep.subr.bf16.mxu0 %v6619_v41  ;;  %v6844_v41 = vpack.c.bf16 %v237_v25, %v236_v19  ;;  %v6847_v42 = vpack.c.bf16 %v6842_v40, %v357_v39  ;;  %1523 = vmatpush2.bf16.msra.mxu1 %v6207_v44  ;;  %v6211_v19 = vld [vmem:[%s9352_s1 + $0xf8] ss:$12 sps:$4 sm:$0xff]   ;;  %v376_v39 = vld [vmem:[%s6490_s22 + $0x168] sm:$0xff]  ;;  %v6996_v44 = vpack.c.bf16 %v365_v61, %v6899_v57 }
  0x63   : > { %1524 = vmatprep.subr.bf16.mxu1 %v9368_v2  ;;  %v7021_v61 = vpack.c.bf16 %v369_v13, %v6933_v6 }
  0x64   : > { %961 = vmatmul.mubr.bf16.gmra.mxu0 %v6793_v28 }
  0x65   : > { %970 = vmatprep.mubr.bf16.mxu0 %v6799_v30  ;;  %1214 = vmatpush1.bf16.msra.mxu0 %v6628_v43  ;;  %v6851_v43 = vpack.c.bf16 %v6679_v58, %v6651_v49  ;;  %v6872_v49 = vpack.c.bf16 %v6709_v5, %v6682_v59  ;;  %v6902_v58 = vpack.c.bf16 %v6899_v57, %v363_v56  ;;  %v367_v5 = vld [vmem:[%s6490_s22 + $0x120] sm:$0xff]  ;;  %v380_v57 = vld [vmem:[%s6490_s22 + $0x188] sm:$0xff] }
  0x66   : > { %1215 = vmatprep.subr.bf16.mxu0 %v6637_v45  ;;  %v359_v45 = vld [vmem:[%s6490_s22 + $0xe0] sm:$0xff]  ;;  %1525 = vmatpush2.bf16.msra.mxu1 %v6208_v50  ;;  %v6906_v59 = vpack.c.bf16 %v6775_v24, %v6748_v14  ;;  %v6939_v8 = vpack.c.bf16 %v6933_v6, %v367_v5  ;;  %v6951_v14 = vpack.c.bf16 %v370_v15, %v369_v13  ;;  %v372_v24 = vld [vmem:[%s6490_s22 + $0x148] sm:$0xff]  ;;  %v378_v50 = vld [vmem:[%s6490_s22 + $0x178] sm:$0xff] }
  0x67   : > { %v6868_v48 = vpack.c.bf16 %v6862_v46, %v359_v45  ;;  %1526 = vmatprep.subr.bf16.mxu1 %v9368_v2  ;;  %v6954_v17 = vpack.c.bf16 %v359_v45, %v6842_v40  ;;  %v6967_v25 = vpack.c.bf16 %v372_v24, %v371_v23  ;;  %v6993_v40 = vpack.c.bf16 %v376_v39, %v375_v35  ;;  %v6219_v45 = vld [vmem:[%s9352_s1 + $0xc8] ss:$12 sps:$4 sm:$0xff]   ;;  %v379_v56 = vld [vmem:[%s6490_s22 + $0x180] sm:$0xff] }
  0x68   : > { %1334 = vmatmul.mubr.bf16.gmra.mxu1 %v6847_v42  ;;  %9419 = vst [vmem:[#allocation4_spill] sm:$0xff] %v6939_v8  ;;  %9420 = vst [vmem:[#allocation5_spill] sm:$0xff] %v6951_v14  ;;  %v7010_v53 = vpack.c.bf16 %v367_v5, %v6917_v62  ;;  %v381_v62 = vld [vmem:[%s6490_s22 + $0x190] sm:$0xff]  ;;  %v382_v5 = vld [vmem:[%s6490_s22 + $0x198] sm:$0xff] }
  0x69   : > { %1216 = vmatpush1.bf16.msra.mxu0 %v6645_v47  ;;  %1343 = vmatprep.mubr.bf16.mxu1 %v9368_v2  ;;  %v6865_v47 = vpack.c.bf16 %v239_v34, %v238_v26  ;;  %9421 = vst [vmem:[#allocation6_spill] sm:$0xff] %v6967_v25  ;;  %v6970_v26 = vpack.c.bf16 %v361_v51, %v6862_v46  ;;  %v6215_v34 = vld [vmem:[%s9352_s1 + $0xe0] ss:$12 sps:$4 sm:$0xff]   ;;  %9423 = vst [vmem:[#allocation8_spill] sm:$0xff] %v6993_v40  ;;  %v377_v46 = vld [vmem:[%s6490_s22 + $0x170] sm:$0xff] }
  0x6a   : > { %1527 = vmatpush2.bf16.msra.mxu1 %v6209_v60  ;;  %5908 = vmatprep.subr.bf16.mxu0 %v9357_v16  ;;  %v7007_v51 = vpack.c.bf16 %v378_v50, %v377_v46  ;;  %v7018_v60 = vpack.c.bf16 %v380_v57, %v379_v56  ;;  %v383_v6 = vld [vmem:[%s6490_s22 + $0x1a0] sm:$0xff]  ;;  %v384_v13 = vld [vmem:[%s6490_s22 + $0x1a8] sm:$0xff] }
  0x6b   : > { %1528 = vmatprep.subr.bf16.mxu1 %v9368_v2 }
  0x6c   : > { %971 = vmatmul.mubr.bf16.gmra.mxu0 %v6825_v36  ;;  %9424 = vst [vmem:[#allocation9_spill] sm:$0xff] %v7007_v51  ;;  %9425 = vst [vmem:[#allocation10_spill] sm:$0xff] %v7018_v60 }
  0x6d   : > { %980 = vmatprep.mubr.bf16.mxu0 %v6832_v38 }
  0x6e   : > { %1529 = vmatpush2.bf16.msra.mxu1 %v6210_v7  ;;  %v7029_v7 = vpack.c.bf16 %v382_v5, %v381_v62 }
  0x6f   : > { %1530 = vmatprep.subr.bf16.mxu1 %v9368_v2 }
  0x70   : > { %1344 = vmatmul.mubr.bf16.gmra.mxu1 %v6868_v48  ;;  %9426 = vst [vmem:[#allocation11_spill] sm:$0xff] %v7029_v7 }
  0x71   : > { %1353 = vmatprep.mubr.bf16.mxu1 %v9368_v2 }
  0x72   : > { %1531 = vmatpush2.bf16.msra.mxu1 %v6211_v19  ;;  %v7031_v19 = vpack.c.bf16 %v371_v23, %v370_v15  ;;  %v385_v15 = vld [vmem:[%s6490_s22 + $0x1b0] sm:$0xff]  ;;  %v7049_v23 = vld [vmem:[%s6490_s22 + $0x1b8] sm:$0xff] }
  0x73   : > { %1532 = vmatprep.subr.bf16.mxu1 %v9368_v2  ;;  %v7052_v16 = vpack.c.bf16 %v7049_v23, %v385_v15 }
  0x74   : > { %981 = vmatmul.mubr.bf16.gmra.mxu0 %v6844_v41  ;;  %9427 = vst [vmem:[#allocation12_spill] sm:$0xff] %v7031_v19 }
  0x75   : > { %990 = vmatprep.mubr.bf16.mxu0 %v6851_v43  ;;  %9430 = vst [vmem:[#allocation15_spill] sm:$0xff] %v7052_v16 }
  0x76   : > { %1533 = vmatpush2.bf16.msra.mxu1 %v6215_v34  ;;  %v7039_v34 = vpack.c.bf16 %v384_v13, %v383_v6 }
  0x77   : > { %1534 = vmatprep.subr.bf16.mxu1 %v9368_v2 }
  0x78   : > { %1354 = vmatmul.mubr.bf16.gmra.mxu1 %v6887_v54  ;;  %9428 = vst [vmem:[#allocation13_spill] sm:$0xff] %v7039_v34 }
  0x79   : > { %1363 = vmatprep.mubr.bf16.mxu1 %v9368_v2 }
  0x7a   : > { %1535 = vmatpush2.bf16.msra.mxu1 %v6219_v45  ;;  %v7041_v45 = vpack.c.bf16 %v373_v27, %v372_v24  ;;  %v6224_v24 = vld [vmem:[%s9354_s3 + $0xac] ss:$12 sps:$4 sm:$0xff]   ;;  %v7057_v27 = vpack.c.bf16 %v375_v35, %v374_v31  ;;  %v389_v31 = vld [vmem:[%s6490_s22 + $0x1d0] sm:$0xff] }
  0x7b   : > { %3740 = vmatprep.subr.bf16.mxu1 %v6224_v24  ;;  %v390_v35 = vld [vmem:[%s6490_s22 + $0x1d8] sm:$0xff] }
  0x7c   : > { %991 = vmatmul.mubr.bf16.gmra.mxu0 %v6865_v47  ;;  %9429 = vst [vmem:[#allocation14_spill] sm:$0xff] %v7041_v45  ;;  %9431 = vst [vmem:[#allocation16_spill] sm:$0xff] %v7057_v27  ;;  %v7075_v24 = vpack.c.bf16 %v390_v35, %v389_v31  ;;  %v7122_v31 = vpack.c.bf16 %v385_v15, %v384_v13 }
  0x7d   : > { %1000 = vmatprep.mubr.bf16.mxu0 %v6872_v49 }
  0x7e   : > { %9434 = vst [vmem:[#allocation19_spill] sm:$0xff] %v7075_v24  ;;  %9438 = vst [vmem:[#allocation23_spill] sm:$0xff] %v7122_v31 }
  0x80   : > { %1364 = vmatmul.mubr.bf16.gmra.mxu1 %v6902_v58 }
  0x81   : > { %1373 = vmatprep.mubr.bf16.mxu1 %v9368_v2 }
  0x84   : > { %1001 = vmatmul.mubr.bf16.gmra.mxu0 %v6663_v52 }
  0x85   : > { %1010 = vmatprep.mubr.bf16.mxu0 %v6891_v55 }
  0x88   : > { %1374 = vmatmul.mubr.bf16.gmra.mxu1 %v6921_v3 }
  0x89   : > { %1383 = vmatprep.mubr.bf16.mxu1 %v9368_v2 }
  0x8c   : > { %1011 = vmatmul.mubr.bf16.gmra.mxu0 %v6698_v0 }
  0x8d   : > { %1020 = vmatprep.mubr.bf16.mxu0 %v6906_v59 }
  0x90   : > { %1384 = vmatmul.mubr.bf16.gmra.mxu1 %v6939_v8 }
  0x91   : > { %1393 = vmatprep.mubr.bf16.mxu1 %v9368_v2 }
  0x94   : > { %1021 = vmatmul.mubr.bf16.gmra.mxu0 %v6733_v11 }
  0x95   : > { %1030 = vmatprep.mubr.bf16.mxu0 %v6925_v4 }
  0x98   : > { %1394 = vmatmul.mubr.bf16.gmra.mxu1 %v6951_v14 }
  0x99   : > { %1403 = vmatprep.mubr.bf16.mxu1 %v9368_v2 }
  0x9c   : > { %1031 = vmatmul.mubr.bf16.gmra.mxu0 %v6764_v21 }
  0x9d   : > { %1040 = vmatprep.mubr.bf16.mxu0 %v6942_v9 }
  0xa0   : > { %1404 = vmatmul.mubr.bf16.gmra.mxu1 %v6967_v25 }
  0xa1   : > { %1413 = vmatprep.mubr.bf16.mxu1 %v9368_v2 }
  0xa4   : > { %1041 = vmatmul.mubr.bf16.gmra.mxu0 %v6797_v29 }
  0xa5   : > { %1050 = vmatprep.mubr.bf16.mxu0 %v6954_v17 }
  0xa8   : > { %1414 = vmatmul.mubr.bf16.gmra.mxu1 %v6978_v32 }
  0xa9   : > { %1423 = vmatprep.mubr.bf16.mxu1 %v9368_v2 }
  0xac   : > { %1051 = vmatmul.mubr.bf16.gmra.mxu0 %v6829_v37 }
  0xad   : > { %1060 = vmatprep.mubr.bf16.mxu0 %v6970_v26 }
  0xb0   : > { %1424 = vmatmul.mubr.bf16.gmra.mxu1 %v6993_v40 }
  0xb1   : > { %1433 = vmatprep.mubr.bf16.mxu1 %v9368_v2 }
  0xb4   : > { %1061 = vmatmul.mubr.bf16.gmra.mxu0 %v6847_v42 }
  0xb5   : > { %1070 = vmatprep.mubr.bf16.mxu0 %v6981_v33 }
  0xb8   : > { %1434 = vmatmul.mubr.bf16.gmra.mxu1 %v7007_v51 }
  0xb9   : > { %1443 = vmatprep.mubr.bf16.mxu1 %v9368_v2 }
  0xbc   : > { %1071 = vmatmul.mubr.bf16.gmra.mxu0 %v6868_v48 }
  0xbd   : > { %1080 = vmatprep.mubr.bf16.mxu0 %v6996_v44 }
  0xc0   : > { %1444 = vmatmul.mubr.bf16.gmra.mxu1 %v7018_v60 }
  0xc1   : > { %1453 = vmatprep.mubr.bf16.mxu1 %v9368_v2 }
  0xc4   : > { %1081 = vmatmul.mubr.bf16.gmra.mxu0 %v6887_v54 }
  0xc5   : > { %1090 = vmatprep.mubr.bf16.mxu0 %v7010_v53 }
  0xc8   : > { %1454 = vmatmul.mubr.bf16.gmra.mxu1 %v7029_v7 }
  0xc9   : > { %1463 = vmatprep.mubr.bf16.mxu1 %v9368_v2 }
  0xcc   : > { %1091 = vmatmul.mubr.bf16.gmra.mxu0 %v6902_v58 }
  0xcd   : > { %1100 = vmatprep.mubr.bf16.mxu0 %v7021_v61 }
  0xd0   : > { %1464 = vmatmul.mubr.bf16.gmra.mxu1 %v7039_v34 }
  0xd1   : > { %1473 = vmatprep.mubr.bf16.mxu1 %v9368_v2 }
  0xd4   : > { %1101 = vmatmul.mubr.bf16.gmra.mxu0 %v6921_v3  ;;  %v7067_v3 = vpack.c.bf16 %v377_v46, %v376_v39  ;;  %v6222_v39 = vld [vmem:[%s9354_s3 + $0xa8] ss:$12 sps:$4 sm:$0xff]  }
  0xd5   : > { %1110 = vmatprep.mubr.bf16.mxu0 %v7031_v19  ;;  %v6227_v46 = vld [vmem:[%s9354_s3 + $0x94] ss:$12 sps:$4 sm:$0xff]  }
  0xd6   : > { %9433 = vst [vmem:[#allocation18_spill] sm:$0xff] %v7067_v3 }
  0xd8   : > { %1474 = vmatmul.mubr.bf16.gmra.mxu1 %v7052_v16  ;;  %v7077_v16 = vpack.c.bf16 %v379_v56, %v378_v50  ;;  %v6230_v50 = vld [vmem:[%s9354_s3 + $0x7c] ss:$12 sps:$4 sm:$0xff]   ;;  %v7101_v56 = vpack.c.bf16 %v383_v6, %v382_v5  ;;  %v6231_v5 = vld [vmem:[%s9354_s3 + $0x60] ss:$12 sps:$4 sm:$0xff]   ;;  %v6233_v6 = vld [vmem:[%s9354_s3 + $0x64] ss:$12 sps:$4 sm:$0xff]  }
  0xd9   : > { %1483 = vmatprep.mubr.bf16.mxu1 %v9368_v2 }
  0xda   : > { %9435 = vst [vmem:[#allocation20_spill] sm:$0xff] %v7077_v16  ;;  %9437 = vst [vmem:[#allocation22_spill] sm:$0xff] %v7101_v56 }
  0xdc   : > { %1111 = vmatmul.mubr.bf16.gmra.mxu0 %v6939_v8  ;;  %v388_v8 = vld [vmem:[%s6490_s22 + $0x1c8] sm:$0xff] }
  0xdd   : > { %1120 = vmatprep.mubr.bf16.mxu0 %v7041_v45  ;;  %v387_v45 = vld [vmem:[%s6490_s22 + $0x1c0] sm:$0xff] }
  0xde   : > { %v7065_v19 = vpack.c.bf16 %v388_v8, %v387_v45  ;;  %v7083_v8 = vpack.c.bf16 %v381_v62, %v380_v57 }
  0xe0   : > { %9432 = vst [vmem:[#allocation17_spill] sm:$0xff] %v7065_v19  ;;  %1484 = vmatmul.mubr.bf16.gmra.mxu1 %v7065_v19  ;;  %9436 = vst [vmem:[#allocation21_spill] sm:$0xff] %v7083_v8 }
  0xe1   : > { %1493 = vmatprep.mubr.bf16.mxu1 %v9368_v2 }
  0xe4   : > { %1121 = vmatmul.mubr.bf16.gmra.mxu0 %v6951_v14 }
  0xe5   : > { %1130 = vmatprep.mubr.bf16.mxu0 %v7057_v27 }
  0xe8   : > { %1494 = vmatmul.mubr.bf16.gmra.mxu1 %v7075_v24 }
  0xe9   : > { %1536 = vmatprep.mubr.bf16.mxu1 %v6512_v18  ;;  %v6225_v18 = vld [vmem:[%s9354_s3 + $0x90] ss:$12 sps:$4 sm:$0xff]  }
  0xec   : > { %1131 = vmatmul.mubr.bf16.gmra.mxu0 %v6967_v25 }
  0xed   : > { %1140 = vmatprep.mubr.bf16.mxu0 %v7067_v3 }
  0xf0   : > { %1537 = vmatmul.mubr.bf16.vlgmr.msra.gmra.mxu1 %v6694_v63  ;;  %v6228_v63 = vld [vmem:[%s9354_s3 + $0x78] ss:$12 sps:$4 sm:$0xff]  }
  0xf1   : > { %1544 = vmatprep.mubr.bf16.mxu1 %v6701_v1  ;;  %3741 = vmatpush1.bf16.msra.mxu1 %v6222_v39 }
  0xf2   : > { %3742 = vmatprep.subr.bf16.mxu1 %v6227_v46 }
  0xf3   : > { %v7107_v1 = vpop.f32.mrf.mxu1 }
  0xf4   : > { %1141 = vmatmul.mubr.bf16.gmra.mxu0 %v6978_v32 }
  0xf5   : > { %1150 = vmatprep.mubr.bf16.mxu0 %v7077_v16  ;;  %3743 = vmatpush1.bf16.msra.mxu1 %v6225_v18  ;;  %v7112_v57 = vpop.f32.mrf.mxu1  ;;  %v7137_v18 = vpack.c.bf16 %v387_v45, %v7049_v23  ;;  %v6234_v23 = vld [vmem:[%s9354_s3 + $0x48] ss:$12 sps:$4 sm:$0xff]  }
  0xf6   : > { %3744 = vmatprep.subr.bf16.mxu1 %v6230_v50 }
  0xf7   : > { %v7114_v62 = vpop.f32.mrf.mxu1  ;;  %9439 = vst [vmem:[#allocation24_spill] sm:$0xff] %v7137_v18 }
  0xf8   : > { %1545 = vmatmul.mubr.bf16.gmra.mxu1 %v6729_v10 }
  0xf9   : > { %1552 = vmatprep.mubr.bf16.mxu1 %v6737_v12  ;;  %3745 = vmatpush1.bf16.msra.mxu1 %v6228_v63  ;;  %v7124_v10 = vpop.f32.mrf.mxu1 }
  0xfa   : > { %3746 = vmatprep.subr.bf16.mxu1 %v6233_v6 }
  0xfb   : > { %v7127_v35 = vpop.f32.mrf.mxu1 }
  0xfc   : > { %1151 = vmatmul.mubr.bf16.gmra.mxu0 %v6993_v40 }
  0xfd   : > { %1160 = vmatprep.mubr.bf16.mxu0 %v7083_v8  ;;  %3747 = vmatpush1.bf16.msra.mxu1 %v6231_v5  ;;  %v7132_v46 = vpop.f32.mrf.mxu1 }
  0xff   : > { %v7134_v15 = vpop.f32.mrf.mxu1 }
 0x100   : > { %1553 = vmatmul.mubr.bf16.gmra.mxu1 %v6760_v20 }
 0x101   : > { %1560 = vmatprep.mubr.bf16.mxu1 %v6766_v22  ;;  %v7139_v63 = vpop.f32.mrf.mxu1 }
 0x103   : > { %v7142_v20 = vpop.f32.mrf.mxu1 }
 0x104   : > { %1161 = vmatmul.mubr.bf16.gmra.mxu0 %v7007_v51 }
 0x105   : > { %1170 = vmatprep.mubr.bf16.mxu0 %v7101_v56  ;;  %v7147_v6 = vpop.f32.mrf.mxu1 }
 0x107   : > { %v7151_v45 = vpop.f32.mrf.mxu1 }
 0x108   : > { %1561 = vmatmul.mubr.bf16.gmra.mxu1 %v6793_v28 }
 0x109   : > { %1568 = vmatprep.mubr.bf16.mxu1 %v6799_v30 }
 0x10c   : > { %v932_v12 = vpop.f32.mrf.mxu0  ;;  %1171 = vmatmul.mubr.bf16.gmra.mxu0 %v7018_v60 }
 0x10d   : > { %1180 = vmatprep.mubr.bf16.mxu0 %v7122_v31 }
 0x10e   : > { %v934_v39 = vpop.f32.mrf.mxu0 }
 0x10f   : > { %v6236_v39 = vld [vmem:[%s9354_s3 + $0x4c] ss:$12 sps:$4 sm:$0xff]  }
 0x110   : > { %v936_v13 = vpop.f32.mrf.mxu0  ;;  %3748 = vmatprep.subr.bf16.mxu1 %v6236_v39  ;;  %1569 = vmatmul.mubr.bf16.gmra.mxu1 %v6825_v36 }
 0x111   : > { %3749 = vmatpush1.bf16.msra.mxu1 %v6234_v23  ;;  %1576 = vmatprep.mubr.bf16.mxu1 %v6832_v38  ;;  %v6212_v23 = vld [vmem:[%s9352_s1 + $0x230] ss:$12 sps:$4 sm:$0xff]  }
 0x112   : > { %v938_v50 = vpop.f32.mrf.mxu0 }
 0x113   : > { %v7161_v50 = vpop.f32.mrf.mxu1 }
 0x114   : > { %v942_v5 = vpop.f32.mrf.mxu0  ;;  %1181 = vmatmul.mubr.bf16.gmra.mxu0 %v7029_v7 }
 0x115   : > { %1190 = vmatprep.mubr.bf16.mxu0 %v7137_v18  ;;  %v7166_v5 = vpop.f32.mrf.mxu1 }
 0x116   : > { %v944_v22 = vpop.f32.mrf.mxu0 }
 0x117   : > { %v7173_v24 = vpop.f32.mrf.mxu1 }
 0x118   : > { %v7149_v12 = vpop.f32.mrf.mxu0  ;;  %1577 = vmatmul.mubr.bf16.gmra.mxu1 %v6844_v41 }
 0x119   : > { %9440 = vst [vmem:[#allocation25_spill] sm:$0xff] %v7149_v12  ;;  %v7177_v39 = vpop.f32.mrf.mxu1  ;;  %1584 = vmatprep.mubr.bf16.mxu1 %v6851_v43  ;;  %v2117_v43 = vlaneseq }
 0x11a   : > { %v7159_v13 = vpop.f32.mrf.mxu0 }
 0x11b   : > { %9441 = vst [vmem:[#allocation26_spill] sm:$0xff] %v7159_v13  ;;  %v7184_v13 = vpop.f32.mrf.mxu1  ;;  %v7236_v40 = vshrl.u32 %v2117_v43, 7  ;;  %v7256_v43 = vld [vmem:[%s9353_s2] ss:$0 sm:$0xff] }
 0x11c   : > { %v7163_v30 = vpop.f32.mrf.mxu0  ;;  %1191 = vmatmul.mubr.bf16.gmra.mxu0 %v7039_v34  ;;  %v9449_v34 = vmov 0.0  }
 0x11d   : > { %9442 = vst [vmem:[#allocation27_spill] sm:$0xff] %v7163_v30  ;;  %1233 = vmatprep.mubr.bf16.mxu0 %v9368_v2  ;;  %v7189_v38 = vpop.f32.mrf.mxu1  ;;  %v6237_v2 = vld [vmem:[%s9354_s3 + $0x30] ss:$12 sps:$4 sm:$0xff]   ;;  %vm2119_vm0 = vcmp.lt.s32.totalorder %v7236_v40, 7  ;;  %vm2282_vm2 = vcmp.lt.s32.totalorder %v7236_v40, 6  ;;  %vm2393_vm3 = vcmp.ge.s32.totalorder %v7236_v40, 1 }
 0x11e   : > { %v7171_v22 = vpop.f32.mrf.mxu0 }
 0x11f   : > { %9443 = vst [vmem:[#allocation28_spill] sm:$0xff] %v7171_v22  ;;  %v7205_v18 = vpop.f32.mrf.mxu1 }
 0x120   : > { %v7175_v12 = vpop.f32.mrf.mxu0  ;;  %1585 = vmatmul.mubr.bf16.gmra.mxu1 %v6865_v47 }
 0x121   : > { %9444 = vst [vmem:[#allocation29_spill] sm:$0xff] %v7175_v12  ;;  %v6239_v12 = vld [vmem:[%s9354_s3 + $0x34] ss:$12 sps:$4 sm:$0xff]   ;;  %v7210_v31 = vpop.f32.mrf.mxu1  ;;  %1592 = vmatprep.mubr.bf16.mxu1 %v6872_v49  ;;  %v6217_v49 = vld [vmem:[%s9352_s1 + $0x1d0] ss:$12 sps:$4 sm:$0xff]  }
 0x122   : > { %v7182_v30 = vpop.f32.mrf.mxu0  ;;  %3750 = vmatprep.subr.bf16.mxu1 %v6239_v12 }
 0x123   : > { %9445 = vst [vmem:[#allocation30_spill] sm:$0xff] %v7182_v30  ;;  %v6213_v30 = vld [vmem:[%s9352_s1 + $0x218] ss:$12 sps:$4 sm:$0xff]   ;;  %3751 = vmatpush1.bf16.msra.mxu1 %v6237_v2 }
 0x124   : > { %v7186_v19 = vpop.f32.mrf.mxu0  ;;  %1234 = vmatmul.mubr.bf16.vlgmr.msra.gmra.mxu0 %v6793_v28 }
 0x125   : > { %9446 = vst [vmem:[#allocation31_spill] sm:$0xff] %v7186_v19  ;;  %5909 = vmatpush3.bf16.msra.mxu0 %v6212_v23  ;;  %v9447_v19 = vmov 0   ;;  %v6214_v23 = vld [vmem:[%s9352_s1 + $0x200] ss:$12 sps:$4 sm:$0xff]  }
 0x126   : > { %1243 = vmatprep.mubr.bf16.mxu0 %v9447_v19  ;;  %v7202_v22 = vpop.f32.mrf.mxu0  ;;  %5910 = vmatprep.subr.bf16.mxu0 %v9449_v34 }
 0x127   : > { %9448 = vst [vmem:[#allocation32_spill] sm:$0xff] %v7202_v22  ;;  %v7218_v22 = vpop.f32.mrf.mxu1 }
 0x128   : > { %v7208_v7 = vpop.f32.mrf.mxu0  ;;  %1593 = vmatmul.mubr.bf16.gmra.mxu1 %v6663_v52 }
 0x129   : > { %9450 = vst [vmem:[#allocation33_spill] sm:$0xff] %v7208_v7  ;;  %5911 = vmatpush3.bf16.msra.mxu0 %v6213_v30  ;;  %v7221_v12 = vpop.f32.mrf.mxu1  ;;  %v6216_v30 = vld [vmem:[%s9352_s1 + $0x1e8] ss:$12 sps:$4 sm:$0xff]   ;;  %1600 = vmatprep.mubr.bf16.mxu1 %v6891_v55  ;;  %v6220_v55 = vld [vmem:[%s9352_s1 + $0x1a0] ss:$12 sps:$4 sm:$0xff]  }
 0x12a   : > { %v7215_v60 = vpop.f32.mrf.mxu0  ;;  %5912 = vmatprep.subr.bf16.mxu0 %v9449_v34 }
 0x12b   : > { %9451 = vst [vmem:[#allocation34_spill] sm:$0xff] %v7215_v60  ;;  %v7230_v60 = vpop.f32.mrf.mxu1 }
 0x12c   : > { %v972_v56 = vpop.f32.mrf.mxu0  ;;  %1244 = vmatmul.mubr.bf16.gmra.mxu0 %v6825_v36 }
 0x12d   : > { %v1276_v2 = vadd.f32 %v7107_v1, %v972_v56  ;;  %5913 = vmatpush3.bf16.msra.mxu0 %v6214_v23  ;;  %1253 = vmatprep.mubr.bf16.mxu0 %v9447_v19  ;;  %v7238_v56 = vpop.f32.mrf.mxu1  ;;  %v6240_v1 = vld [vmem:[%s9354_s3 + $0x18] ss:$12 sps:$4 sm:$0xff]   ;;  %v6242_v23 = vld [vmem:[%s9354_s3 + $0x1c] ss:$12 sps:$4 sm:$0xff]  }
 0x12e   : > { %v974_v7 = vpop.f32.mrf.mxu0  ;;  %5914 = vmatprep.subr.bf16.mxu0 %v9449_v34  ;;  %3752 = vmatprep.subr.bf16.mxu1 %v6242_v23 }
 0x12f   : > { %v7234_v51 = vadd.f32 %v7112_v57, %v974_v7  ;;  %v7251_v57 = vpop.f32.mrf.mxu1  ;;  %3753 = vmatpush1.bf16.msra.mxu1 %v6240_v1  ;;  %v2017_v1 = vadd.f32 %v7256_v43, %v1276_v2 }
 0x130   : > { %v976_v8 = vpop.f32.mrf.mxu0  ;;  %1601 = vmatmul.mubr.bf16.gmra.mxu1 %v6698_v0 }
 0x131   : > { %9452 = vst [vmem:[#allocation35_spill] sm:$0xff] %v7234_v51  ;;  %v1280_v16 = vadd.f32 %v7114_v62, %v976_v8  ;;  %5915 = vmatpush3.bf16.msra.mxu0 %v6216_v30  ;;  %v7261_v62 = vpop.f32.mrf.mxu1  ;;  %v9395_v30 = vrot.slane %v7234_v51, 1  ;;  %1608 = vmatprep.mubr.bf16.mxu1 %v6906_v59  ;;  %v6248_v59 = vld [vmem:[%s9354_s3 + $0x4] ss:$12 sps:$4 sm:$0xff]  }
 0x132   : > { %v978_v7 = vpop.f32.mrf.mxu0  ;;  %5916 = vmatprep.subr.bf16.mxu0 %v9449_v34  ;;  %3754 = vmatprep.subr.bf16.mxu1 %v6248_v59 }
 0x133   : > { %v1282_v32 = vadd.f32 %v7124_v10, %v978_v7  ;;  %v6218_v10 = vld [vmem:[%s9352_s1 + $0x1b8] ss:$12 sps:$4 sm:$0xff]   ;;  %v7272_v25 = vpop.f32.mrf.mxu1  ;;  %v2018_v51 = vadd.f32 %v7256_v43, %v1280_v16 }
 0x134   : > { %v982_v8 = vpop.f32.mrf.mxu0  ;;  %1254 = vmatmul.mubr.bf16.gmra.mxu0 %v6844_v41 }
 0x135   : > { %v2072_v23 = vrot.slane %v1282_v32, 1  ;;  %v1286_v3 = vadd.f32 %v7127_v35, %v982_v8  ;;  %5917 = vmatpush3.bf16.msra.mxu0 %v6217_v49  ;;  %1263 = vmatprep.mubr.bf16.mxu0 %v9447_v19  ;;  %v7282_v19 = vpop.f32.mrf.mxu1 }
 0x136   : > { %v984_v7 = vpop.f32.mrf.mxu0  ;;  %5918 = vmatprep.subr.bf16.mxu0 %v9449_v34 }
 0x137   : > { %v2164_v32 = vsel %vm2119_vm0, %v9395_v30, %v2072_v23  ;;  %v1288_v35 = vadd.f32 %v7132_v46, %v984_v7  ;;  %v7290_v30 = vpop.f32.mrf.mxu1 }
 0x138   : > { %v7280_v49 = vadd.f32 %v2164_v32, %v2017_v1  ;;  %v986_v8 = vpop.f32.mrf.mxu0  ;;  %1609 = vmatmul.mubr.bf16.gmra.mxu1 %v6733_v11 }
 0x139   : > { %v2073_v2 = vrot.slane %v1288_v35, 1  ;;  %v1290_v27 = vadd.f32 %v7134_v15, %v986_v8  ;;  %5919 = vmatpush3.bf16.msra.mxu0 %v6218_v10  ;;  %v7298_v10 = vpop.f32.mrf.mxu1  ;;  %v6221_v35 = vld [vmem:[%s9352_s1 + $0x188] ss:$12 sps:$4 sm:$0xff]   ;;  %1616 = vmatprep.mubr.bf16.mxu1 %v6925_v4 }
 0x13a   : > { %v988_v14 = vpop.f32.mrf.mxu0  ;;  %5920 = vmatprep.subr.bf16.mxu0 %v9449_v34 }
 0x13b   : > { %v2163_v46 = vsel %vm2119_vm0, %v2072_v23, %v2073_v2  ;;  %v1292_v1 = vadd.f32 %v7139_v63, %v988_v14  ;;  %v2019_v14 = vadd.f32 %v7256_v43, %v1286_v3  ;;  %v7309_v63 = vpop.f32.mrf.mxu1  ;;  %v6245_v3 = vld [vmem:[%s9354_s3 + $0x22c] ss:$12 sps:$4 sm:$0xff]  }
 0x13c   : > { %v7295_v7 = vadd.f32 %v2163_v46, %v2018_v51  ;;  %v992_v15 = vpop.f32.mrf.mxu0  ;;  %1264 = vmatmul.mubr.bf16.gmra.mxu0 %v6865_v47 }
 0x13d   : > { %v2074_v16 = vrot.slane %v1292_v1, 1  ;;  %v1296_v32 = vadd.f32 %v7142_v20, %v992_v15  ;;  %5921 = vmatpush3.bf16.msra.mxu0 %v6220_v55  ;;  %5924 = vmatprep.mubr.msk.bf16.mxu0 %vm6410_vm1, %v9449_v34  ;;  %v7317_v46 = vpop.f32.mrf.mxu1 }
 0x13e   : > { %v994_v51 = vpop.f32.mrf.mxu0  ;;  %5922 = vmatprep.subr.bf16.mxu0 %v9449_v34 }
 0x13f   : > { %v2162_v20 = vsel %vm2119_vm0, %v2073_v2, %v2074_v16  ;;  %v1298_v23 = vadd.f32 %v7147_v6, %v994_v51  ;;  %v2020_v2 = vadd.f32 %v7256_v43, %v1290_v27  ;;  %v6243_v51 = vld [vmem:[%s9354_s3 + $0x228] ss:$12 sps:$4 sm:$0xff]  }
 0x140   : > { %v7315_v8 = vadd.f32 %v2162_v20, %v2019_v14  ;;  %v996_v55 = vpop.f32.mrf.mxu0  ;;  %v7327_v14 = vpop.f32.mrf.mxu1  ;;  %v6246_v20 = vld [vmem:[%s9354_s3] ss:$12 sps:$4 sm:$0xff]   ;;  %1617 = vmatmul.mubr.bf16.gmra.mxu1 %v6764_v21 }
 0x141   : > { %v2075_v1 = vrot.slane %v1298_v23, 1  ;;  %v1300_v15 = vadd.f32 %v7151_v45, %v996_v55  ;;  %5923 = vmatpush3.bf16.msra.mxu0 %v6221_v35  ;;  %3755 = vmatpush1.bf16.msra.mxu1 %v6246_v20 }
 0x142   : > { %9453 = vst [vmem:[#allocation36_spill] sm:$0xff] %v7315_v8  ;;  %v998_v6 = vpop.f32.mrf.mxu0  ;;  %4013 = vmatprep.subr.bf16.mxu0 %v6245_v3  ;;  %v7341_v55 = vpop.f32.mrf.mxu1  ;;  %1624 = vmatprep.mubr.bf16.mxu1 %v6942_v9 }
 0x143   : > { %v2161_v45 = vsel %vm2119_vm0, %v2074_v16, %v2075_v1  ;;  %v1302_v35 = vadd.f32 %v7161_v50, %v998_v6  ;;  %v2021_v50 = vadd.f32 %v7256_v43, %v1296_v32  ;;  %v2022_v32 = vadd.f32 %v7256_v43, %v1300_v15  ;;  %v6251_v15 = vld [vmem:[%s9354_s3 + $0x16c] ss:$12 sps:$4 sm:$0xff]  }
 0x144   : > { %v7338_v23 = vadd.f32 %v2161_v45, %v2020_v2  ;;  %v1002_v27 = vpop.f32.mrf.mxu0  ;;  %5925 = vmatmul.mubr.bf16.vlgmr.msra.gmra.mxu0 %v6793_v28  ;;  %v7349_v59 = vpop.f32.mrf.mxu1  ;;  %3756 = vmatprep.subr.bf16.mxu1 %v6251_v15 }
 0x145   : > { %v2076_v3 = vrot.slane %v1302_v35, 1  ;;  %v1306_v8 = vadd.f32 %v7166_v5, %v1002_v27  ;;  %5928 = vmatprep.mubr.msk.bf16.mxu0 %vm6410_vm1, %v9449_v34  ;;  %4014 = vmatpush1.bf16.msra.mxu0 %v6243_v51 }
 0x146   : > { %9454 = vst [vmem:[#allocation37_spill] sm:$0xff] %v7338_v23  ;;  %v1004_v16 = vpop.f32.mrf.mxu0  ;;  %v7356_v45 = vpop.f32.mrf.mxu1 }
 0x147   : > { %v2160_v28 = vsel %vm2119_vm0, %v2075_v1, %v2076_v3  ;;  %v1308_v2 = vadd.f32 %v7173_v24, %v1004_v16 }
 0x148   : > { %v7354_v6 = vadd.f32 %v2160_v28, %v2021_v50  ;;  %v1006_v5 = vpop.f32.mrf.mxu0  ;;  %v7360_v23 = vpop.f32.mrf.mxu1  ;;  %1625 = vmatmul.mubr.bf16.gmra.mxu1 %v6797_v29 }
 0x149   : > { %v2077_v35 = vrot.slane %v1308_v2, 1  ;;  %v1310_v4 = vadd.f32 %v7177_v39, %v1006_v5  ;;  %v6249_v39 = vld [vmem:[%s9354_s3 + $0x168] ss:$12 sps:$4 sm:$0xff]   ;;  %1632 = vmatprep.mubr.bf16.mxu1 %v6954_v17 }
 0x14a   : > { %v1008_v27 = vpop.f32.mrf.mxu0  ;;  %v7368_v50 = vpop.f32.mrf.mxu1  ;;  %3757 = vmatpush2.bf16.msra.mxu1 %v6249_v39  ;;  %v6254_v17 = vld [vmem:[%s9354_s3 + $0x214] ss:$12 sps:$4 sm:$0xff]  }
 0x14b   : > { %v2159_v51 = vsel %vm2119_vm0, %v2076_v3, %v2077_v35  ;;  %v1312_v1 = vadd.f32 %v7184_v13, %v1008_v27  ;;  %4015 = vmatprep.subr.bf16.mxu0 %v6254_v17 }
 0x14c   : > { %v7365_v20 = vadd.f32 %v2159_v51, %v2022_v32  ;;  %v1012_v24 = vpop.f32.mrf.mxu0  ;;  %5929 = vmatmul.mubr.bf16.gmra.mxu0 %v6825_v36  ;;  %v2023_v36 = vadd.f32 %v7256_v43, %v1306_v8  ;;  %v7382_v28 = vpop.f32.mrf.mxu1  ;;  %v2024_v8 = vadd.f32 %v7256_v43, %v1310_v4 }
 0x14d   : > { %v2078_v3 = vrot.slane %v1312_v1, 1  ;;  %v1316_v13 = vadd.f32 %v7189_v38, %v1012_v24  ;;  %5932 = vmatprep.mubr.msk.bf16.mxu0 %vm6410_vm1, %v9449_v34 }
 0x14e   : > { %v1014_v16 = vpop.f32.mrf.mxu0  ;;  %v7389_v27 = vpop.f32.mrf.mxu1 }
 0x14f   : > { %v2158_v2 = vsel %vm2119_vm0, %v2077_v35, %v2078_v3  ;;  %v1318_v5 = vadd.f32 %v7205_v18, %v1014_v16 }
 0x150   : > { %v7387_v32 = vadd.f32 %v2158_v2, %v2023_v36  ;;  %v1016_v38 = vpop.f32.mrf.mxu0  ;;  %v7393_v24 = vpop.f32.mrf.mxu1  ;;  %1633 = vmatmul.mubr.bf16.gmra.mxu1 %v6829_v37 }
 0x151   : > { %v2079_v51 = vrot.slane %v1318_v5, 1  ;;  %v1320_v9 = vadd.f32 %v7210_v31, %v1016_v38  ;;  %1640 = vmatprep.mubr.bf16.mxu1 %v6970_v26 }
 0x152   : > { %v1018_v1 = vpop.f32.mrf.mxu0  ;;  %v7401_v36 = vpop.f32.mrf.mxu1 }
 0x153   : > { %v2157_v15 = vsel %vm2119_vm0, %v2078_v3, %v2079_v51  ;;  %v1322_v35 = vadd.f32 %v7218_v22, %v1018_v1  ;;  %v2025_v3 = vadd.f32 %v7256_v43, %v1316_v13 }
 0x154   : > { %v7398_v18 = vadd.f32 %v2157_v15, %v2024_v8  ;;  %v1022_v39 = vpop.f32.mrf.mxu0  ;;  %5933 = vmatmul.mubr.bf16.gmra.mxu0 %v6844_v41  ;;  %v7409_v16 = vpop.f32.mrf.mxu1 }
 0x155   : > { %v2080_v31 = vrot.slane %v1322_v35, 1  ;;  %v1326_v4 = vadd.f32 %v7221_v12, %v1022_v39  ;;  %5936 = vmatprep.mubr.msk.bf16.mxu0 %vm6410_vm1, %v9449_v34  ;;  %v6252_v12 = vld [vmem:[%s9354_s3 + $0x210] ss:$12 sps:$4 sm:$0xff]  }
 0x156   : > { %v1024_v22 = vpop.f32.mrf.mxu0  ;;  %v7416_v8 = vpop.f32.mrf.mxu1  ;;  %4016 = vmatpush1.bf16.msra.mxu0 %v6252_v12 }
 0x157   : > { %v2156_v41 = vsel %vm2119_vm0, %v2079_v51, %v2080_v31  ;;  %v1328_v2 = vadd.f32 %v7230_v60, %v1024_v22  ;;  %v2026_v51 = vadd.f32 %v7256_v43, %v1320_v9  ;;  %v6257_v9 = vld [vmem:[%s9354_s3 + $0x154] ss:$12 sps:$4 sm:$0xff]  }
 0x158   : > { %v7414_v5 = vadd.f32 %v2156_v41, %v2025_v3  ;;  %v1026_v38 = vpop.f32.mrf.mxu0  ;;  %v7426_v60 = vpop.f32.mrf.mxu1  ;;  %3758 = vmatprep.subr.bf16.mxu1 %v6257_v9  ;;  %v6258_v9 = vld [vmem:[%s9354_s3 + $0x138] ss:$12 sps:$4 sm:$0xff]   ;;  %1641 = vmatmul.mubr.bf16.gmra.mxu1 %v6847_v42 }
 0x159   : > { %v2081_v13 = vrot.slane %v1328_v2, 1  ;;  %v1330_v1 = vadd.f32 %v7238_v56, %v1026_v38  ;;  %v6255_v56 = vld [vmem:[%s9354_s3 + $0x150] ss:$12 sps:$4 sm:$0xff]   ;;  %1648 = vmatprep.mubr.bf16.mxu1 %v6981_v33 }
 0x15a   : > { %v1028_v15 = vpop.f32.mrf.mxu0  ;;  %v7434_v41 = vpop.f32.mrf.mxu1  ;;  %3759 = vmatpush2.bf16.msra.mxu1 %v6255_v56 }
 0x15b   : > { %v2155_v35 = vsel %vm2119_vm0, %v2080_v31, %v2081_v13  ;;  %v1332_v39 = vadd.f32 %v7251_v57, %v1028_v15 }
 0x15c   : > { %v7431_v3 = vadd.f32 %v2155_v35, %v2026_v51  ;;  %v1032_v22 = vpop.f32.mrf.mxu0  ;;  %5937 = vmatmul.mubr.bf16.gmra.mxu0 %v6865_v47  ;;  %v2027_v47 = vadd.f32 %v7256_v43, %v1326_v4  ;;  %v7448_v38 = vpop.f32.mrf.mxu1  ;;  %v2028_v4 = vadd.f32 %v7256_v43, %v1330_v1 }
 0x15d   : > { %v2082_v31 = vrot.slane %v1332_v39, 1  ;;  %v1336_v57 = vadd.f32 %v7261_v62, %v1032_v22  ;;  %5940 = vmatprep.mubr.msk.bf16.mxu0 %vm6410_vm1, %v9449_v34 }
 0x15e   : > { %v1034_v2 = vpop.f32.mrf.mxu0  ;;  %v7455_v15 = vpop.f32.mrf.mxu1 }
 0x15f   : > { %v2154_v12 = vsel %vm2119_vm0, %v2081_v13, %v2082_v31  ;;  %v1338_v17 = vadd.f32 %v7272_v25, %v1034_v2  ;;  %v6260_v13 = vld [vmem:[%s9354_s3 + $0x13c] ss:$12 sps:$4 sm:$0xff]  }
 0x160   : > { %v7453_v51 = vadd.f32 %v2154_v12, %v2027_v47  ;;  %v1036_v62 = vpop.f32.mrf.mxu0  ;;  %v7459_v22 = vpop.f32.mrf.mxu1  ;;  %3760 = vmatprep.subr.bf16.mxu1 %v6260_v13  ;;  %1649 = vmatmul.mubr.bf16.gmra.mxu1 %v6868_v48 }
 0x161   : > { %v2083_v35 = vrot.slane %v1338_v17, 1  ;;  %v1340_v26 = vadd.f32 %v7282_v19, %v1036_v62  ;;  %3761 = vmatpush2.bf16.msra.mxu1 %v6258_v9  ;;  %1656 = vmatprep.mubr.bf16.mxu1 %v6996_v44 }
 0x162   : > { %v1038_v39 = vpop.f32.mrf.mxu0  ;;  %v7473_v1 = vpop.f32.mrf.mxu1 }
 0x163   : > { %v2153_v25 = vsel %vm2119_vm0, %v2082_v31, %v2083_v35  ;;  %v1342_v56 = vadd.f32 %v7290_v30, %v1038_v39  ;;  %v2029_v30 = vadd.f32 %v7256_v43, %v1336_v57  ;;  %v2030_v57 = vadd.f32 %v7256_v43, %v1340_v26 }
 0x164   : > { %v7470_v47 = vadd.f32 %v2153_v25, %v2028_v4  ;;  %v1042_v19 = vpop.f32.mrf.mxu0  ;;  %5941 = vmatmul.mubr.bf16.gmra.mxu0 %v6663_v52  ;;  %v7481_v17 = vpop.f32.mrf.mxu1 }
 0x165   : > { %v2084_v2 = vrot.slane %v1342_v56, 1  ;;  %v1346_v12 = vadd.f32 %v7298_v10, %v1042_v19  ;;  %5944 = vmatprep.mubr.msk.bf16.mxu0 %vm6410_vm1, %v9449_v34 }
 0x166   : > { %v1044_v31 = vpop.f32.mrf.mxu0  ;;  %v7488_v39 = vpop.f32.mrf.mxu1 }
 0x167   : > { %v2152_v52 = vsel %vm2119_vm0, %v2083_v35, %v2084_v2  ;;  %v1348_v62 = vadd.f32 %v7309_v63, %v1044_v31 }
 0x168   : > { %v7486_v4 = vadd.f32 %v2152_v52, %v2029_v30  ;;  %v1046_v10 = vpop.f32.mrf.mxu0  ;;  %v7492_v19 = vpop.f32.mrf.mxu1  ;;  %1657 = vmatmul.mubr.bf16.gmra.mxu1 %v6887_v54 }
 0x169   : > { %v2085_v25 = vrot.slane %v1348_v62, 1  ;;  %v1350_v33 = vadd.f32 %v7317_v46, %v1046_v10  ;;  %1664 = vmatprep.mubr.bf16.mxu1 %v7010_v53 }
 0x16a   : > { %v1048_v56 = vpop.f32.mrf.mxu0  ;;  %v7500_v30 = vpop.f32.mrf.mxu1 }
 0x16b   : > { %v2151_v13 = vsel %vm2119_vm0, %v2084_v2, %v2085_v25  ;;  %v1352_v35 = vadd.f32 %v7327_v14, %v1048_v56  ;;  %v2031_v2 = vadd.f32 %v7256_v43, %v1346_v12  ;;  %v2032_v44 = vadd.f32 %v7256_v43, %v1350_v33 }
 0x16c   : > { %v7497_v63 = vadd.f32 %v2151_v13, %v2030_v57  ;;  %v1052_v9 = vpop.f32.mrf.mxu0  ;;  %5945 = vmatmul.mubr.bf16.gmra.mxu0 %v6698_v0  ;;  %v7508_v31 = vpop.f32.mrf.mxu1 }
 0x16d   : > { %v2086_v46 = vrot.slane %v1352_v35, 1  ;;  %v1356_v26 = vadd.f32 %v7341_v55, %v1052_v9  ;;  %5948 = vmatprep.mubr.msk.bf16.mxu0 %vm6410_vm1, %v9449_v34  ;;  %v6263_v9 = vld [vmem:[%s9354_s3 + $0x1fc] ss:$12 sps:$4 sm:$0xff]  }
 0x16e   : > { %v1054_v14 = vpop.f32.mrf.mxu0  ;;  %v7515_v57 = vpop.f32.mrf.mxu1  ;;  %4017 = vmatprep.subr.bf16.mxu0 %v6263_v9 }
 0x16f   : > { %v2150_v0 = vsel %vm2119_vm0, %v2085_v25, %v2086_v46  ;;  %v1358_v52 = vadd.f32 %v7349_v59, %v1054_v14  ;;  %v6261_v59 = vld [vmem:[%s9354_s3 + $0x1f8] ss:$12 sps:$4 sm:$0xff]  }
 0x170   : > { %v7513_v62 = vadd.f32 %v2150_v0, %v2031_v2  ;;  %v1056_v10 = vpop.f32.mrf.mxu0  ;;  %v7519_v12 = vpop.f32.mrf.mxu1  ;;  %4018 = vmatpush1.bf16.msra.mxu0 %v6261_v59  ;;  %1665 = vmatmul.mubr.bf16.gmra.mxu1 %v6902_v58 }
 0x171   : > { %v2087_v55 = vrot.slane %v1358_v52, 1  ;;  %v1360_v56 = vadd.f32 %v7356_v45, %v1056_v10  ;;  %v6264_v45 = vld [vmem:[%s9354_s3 + $0x120] ss:$12 sps:$4 sm:$0xff]   ;;  %v2033_v52 = vadd.f32 %v7256_v43, %v1356_v26  ;;  %1672 = vmatprep.mubr.bf16.mxu1 %v7021_v61 }
 0x172   : > { %v1058_v13 = vpop.f32.mrf.mxu0 }
 0x173   : > { %v2149_v35 = vsel %vm2119_vm0, %v2086_v46, %v2087_v55  ;;  %v1362_v25 = vadd.f32 %v7360_v23, %v1058_v13  ;;  %v7536_v46 = vpop.f32.mrf.mxu1  ;;  %v6266_v23 = vld [vmem:[%s9354_s3 + $0x124] ss:$12 sps:$4 sm:$0xff]  }
 0x174   : > { %v7533_v33 = vadd.f32 %v2149_v35, %v2032_v44  ;;  %v1062_v2 = vpop.f32.mrf.mxu0  ;;  %5949 = vmatmul.mubr.bf16.gmra.mxu0 %v6733_v11  ;;  %3762 = vmatprep.subr.bf16.mxu1 %v6266_v23 }
 0x175   : > { %v2088_v14 = vrot.slane %v1362_v25, 1  ;;  %v1366_v0 = vadd.f32 %v7368_v50, %v1062_v2  ;;  %5952 = vmatprep.mubr.msk.bf16.mxu0 %vm6410_vm1, %v9449_v34  ;;  %v7547_v11 = vpop.f32.mrf.mxu1  ;;  %3763 = vmatpush2.bf16.msra.mxu1 %v6264_v45  ;;  %v2034_v2 = vadd.f32 %v7256_v43, %v1360_v56 }
 0x176   : > { %9455 = vst [vmem:[#allocation38_spill] sm:$0xff] %v7533_v33  ;;  %v1064_v10 = vpop.f32.mrf.mxu0 }
 0x177   : > { %v2148_v44 = vsel %vm2119_vm0, %v2087_v55, %v2088_v14  ;;  %v1368_v13 = vadd.f32 %v7382_v28, %v1064_v10  ;;  %v7554_v25 = vpop.f32.mrf.mxu1 }
 0x178   : > { %v7552_v50 = vadd.f32 %v2148_v44, %v2033_v52  ;;  %v1066_v35 = vpop.f32.mrf.mxu0 }
 0x179   : > { %v2089_v53 = vrot.slane %v1368_v13, 1  ;;  %v1370_v26 = vadd.f32 %v7389_v27, %v1066_v35  ;;  %v7558_v9 = vpop.f32.mrf.mxu1 }
 0x17a   : > { %v1068_v33 = vpop.f32.mrf.mxu0 }
 0x17b   : > { %v2147_v55 = vsel %vm2119_vm0, %v2088_v14, %v2089_v53  ;;  %v1372_v28 = vadd.f32 %v7393_v24, %v1068_v33  ;;  %v7566_v23 = vpop.f32.mrf.mxu1  ;;  %v2035_v14 = vadd.f32 %v7256_v43, %v1366_v0  ;;  %v2036_v61 = vadd.f32 %v7256_v43, %v1370_v26  ;;  %v6269_v26 = vld [vmem:[%s9354_s3 + $0x10c] ss:$12 sps:$4 sm:$0xff]  }
 0x17c   : > { %v7563_v59 = vadd.f32 %v2147_v55, %v2034_v2  ;;  %v1072_v45 = vpop.f32.mrf.mxu0  ;;  %5953 = vmatmul.mubr.bf16.gmra.mxu0 %v6764_v21  ;;  %3764 = vmatprep.subr.bf16.mxu1 %v6269_v26  ;;  %v6270_v26 = vld [vmem:[%s9354_s3 + $0x1e0] ss:$12 sps:$4 sm:$0xff]  }
 0x17d   : > { %v2090_v27 = vrot.slane %v1372_v28, 1  ;;  %v1376_v56 = vadd.f32 %v7401_v36, %v1072_v45  ;;  %5956 = vmatprep.mubr.msk.bf16.mxu0 %vm6410_vm1, %v9449_v34  ;;  %v7574_v33 = vpop.f32.mrf.mxu1 }
 0x17e   : > { %v1074_v24 = vpop.f32.mrf.mxu0 }
 0x17f   : > { %v2146_v21 = vsel %vm2119_vm0, %v2089_v53, %v2090_v27  ;;  %v1378_v52 = vadd.f32 %v7409_v16, %v1074_v24  ;;  %v7581_v13 = vpop.f32.mrf.mxu1  ;;  %v9459_v24 = vld [vmem:[#allocation12_spill] sm:$0xff] }
 0x180   : > { %v7579_v10 = vadd.f32 %v2146_v21, %v2035_v14  ;;  %v1076_v44 = vpop.f32.mrf.mxu0  ;;  %v9458_v14 = vld [vmem:[#allocation3_spill] sm:$0xff] }
 0x181   : > { %v2091_v36 = vrot.slane %v1378_v52, 1  ;;  %v1380_v35 = vadd.f32 %v7416_v8, %v1076_v44  ;;  %v7585_v0 = vpop.f32.mrf.mxu1  ;;  %1673 = vmatmul.mubr.bf16.gmra.mxu1 %v9458_v14  ;;  %v6267_v8 = vld [vmem:[%s9354_s3 + $0x108] ss:$12 sps:$4 sm:$0xff]  }
 0x182   : > { %9456 = vst [vmem:[#allocation39_spill] sm:$0xff] %v7579_v10  ;;  %v1078_v2 = vpop.f32.mrf.mxu0  ;;  %1680 = vmatprep.mubr.bf16.mxu1 %v9459_v24  ;;  %3765 = vmatpush2.bf16.msra.mxu1 %v6267_v8 }
 0x183   : > { %v2145_v55 = vsel %vm2119_vm0, %v2090_v27, %v2091_v36  ;;  %v1382_v53 = vadd.f32 %v7426_v60, %v1078_v2  ;;  %v7593_v45 = vpop.f32.mrf.mxu1 }
 0x184   : > { %v7590_v28 = vadd.f32 %v2145_v55, %v2036_v61  ;;  %v1082_v16 = vpop.f32.mrf.mxu0  ;;  %5957 = vmatmul.mubr.bf16.gmra.mxu0 %v6797_v29  ;;  %v2037_v29 = vadd.f32 %v7256_v43, %v1376_v56  ;;  %v2038_v56 = vadd.f32 %v7256_v43, %v1380_v35 }
 0x185   : > { %v2092_v27 = vrot.slane %v1382_v53, 1  ;;  %v1386_v60 = vadd.f32 %v7434_v41, %v1082_v16  ;;  %5960 = vmatprep.mubr.msk.bf16.mxu0 %vm6410_vm1, %v9449_v34  ;;  %v7607_v52 = vpop.f32.mrf.mxu1 }
 0x186   : > { %9457 = vst [vmem:[#allocation40_spill] sm:$0xff] %v7590_v28  ;;  %v1084_v21 = vpop.f32.mrf.mxu0 }
 0x187   : > { %v2144_v44 = vsel %vm2119_vm0, %v2091_v36, %v2092_v27  ;;  %v1388_v61 = vadd.f32 %v7448_v38, %v1084_v21  ;;  %v7614_v55 = vpop.f32.mrf.mxu1  ;;  %v6272_v36 = vld [vmem:[%s9354_s3 + $0x1e4] ss:$12 sps:$4 sm:$0xff]  }
 0x188   : > { %v7612_v2 = vadd.f32 %v2144_v44, %v2037_v29  ;;  %v1086_v41 = vpop.f32.mrf.mxu0  ;;  %v9462_v21 = vld [vmem:[#allocation4_spill] sm:$0xff]  ;;  %v6273_v44 = vld [vmem:[%s9354_s3 + $0xf0] ss:$12 sps:$4 sm:$0xff]   ;;  %4019 = vmatprep.subr.bf16.mxu0 %v6272_v36 }
 0x189   : > { %v2093_v53 = vrot.slane %v1388_v61, 1  ;;  %v1390_v16 = vadd.f32 %v7455_v15, %v1086_v41  ;;  %v7618_v28 = vpop.f32.mrf.mxu1  ;;  %1681 = vmatmul.mubr.bf16.gmra.mxu1 %v9462_v21  ;;  %v9463_v41 = vld [vmem:[#allocation14_spill] sm:$0xff]  ;;  %4020 = vmatpush1.bf16.msra.mxu0 %v6270_v26 }
 0x18a   : > { %9460 = vst [vmem:[#allocation3_spill] sm:$0xff] %v7612_v2  ;;  %v1088_v24 = vpop.f32.mrf.mxu0  ;;  %1688 = vmatprep.mubr.bf16.mxu1 %v9463_v41 }
 0x18b   : > { %v2143_v38 = vsel %vm2119_vm0, %v2092_v27, %v2093_v53  ;;  %v1392_v8 = vadd.f32 %v7459_v22, %v1088_v24  ;;  %v7632_v35 = vpop.f32.mrf.mxu1  ;;  %v6275_v22 = vld [vmem:[%s9354_s3 + $0xf4] ss:$12 sps:$4 sm:$0xff]   ;;  %v2040_v2 = vadd.f32 %v7256_v43, %v1390_v16 }
 0x18c   : > { %v7629_v29 = vadd.f32 %v2143_v38, %v2038_v56  ;;  %v1092_v15 = vpop.f32.mrf.mxu0  ;;  %5961 = vmatmul.mubr.bf16.gmra.mxu0 %v6829_v37  ;;  %v2039_v37 = vadd.f32 %v7256_v43, %v1386_v60  ;;  %3766 = vmatprep.subr.bf16.mxu1 %v6275_v22 }
 0x18d   : > { %v2094_v27 = vrot.slane %v1392_v8, 1  ;;  %v1396_v61 = vadd.f32 %v7473_v1, %v1092_v15  ;;  %5964 = vmatprep.mubr.msk.bf16.mxu0 %vm6410_vm1, %v9449_v34  ;;  %v7646_v24 = vpop.f32.mrf.mxu1  ;;  %3767 = vmatpush2.bf16.msra.mxu1 %v6273_v44 }
 0x18e   : > { %9461 = vst [vmem:[#allocation12_spill] sm:$0xff] %v7629_v29  ;;  %v1094_v56 = vpop.f32.mrf.mxu0 }
 0x18f   : > { %v2142_v38 = vsel %vm2119_vm0, %v2093_v53, %v2094_v27  ;;  %v1398_v29 = vadd.f32 %v7481_v17, %v1094_v56  ;;  %v7653_v15 = vpop.f32.mrf.mxu1 }
 0x190   : > { %v7651_v1 = vadd.f32 %v2142_v38, %v2039_v37  ;;  %v1096_v8 = vpop.f32.mrf.mxu0  ;;  %v9467_v37 = vld [vmem:[#allocation16_spill] sm:$0xff] }
 0x191   : > { %v2095_v41 = vrot.slane %v1398_v29, 1  ;;  %v1400_v60 = vadd.f32 %v7488_v39, %v1096_v8  ;;  %v7657_v36 = vpop.f32.mrf.mxu1  ;;  %v9466_v29 = vld [vmem:[#allocation5_spill] sm:$0xff] }
 0x192   : > { %9464 = vst [vmem:[#allocation4_spill] sm:$0xff] %v7651_v1  ;;  %v1098_v10 = vpop.f32.mrf.mxu0  ;;  %1689 = vmatmul.mubr.bf16.gmra.mxu1 %v9466_v29  ;;  %v9507_v1 = vld [vmem:[#allocation19_spill] sm:$0xff] }
 0x193   : > { %v2141_v53 = vsel %vm2119_vm0, %v2094_v27, %v2095_v41  ;;  %v1402_v17 = vadd.f32 %v7492_v19, %v1098_v10  ;;  %v7665_v22 = vpop.f32.mrf.mxu1  ;;  %1696 = vmatprep.mubr.bf16.mxu1 %v9467_v37  ;;  %v2041_v27 = vadd.f32 %v7256_v43, %v1396_v61 }
 0x194   : > { %v7662_v26 = vadd.f32 %v2141_v53, %v2040_v2  ;;  %v1102_v44 = vpop.f32.mrf.mxu0  ;;  %5965 = vmatmul.mubr.bf16.gmra.mxu0 %v6847_v42 }
 0x195   : > { %v2096_v39 = vrot.slane %v1402_v17, 1  ;;  %v1406_v16 = vadd.f32 %v7500_v30, %v1102_v44  ;;  %5968 = vmatprep.mubr.msk.bf16.mxu0 %vm6410_vm1, %v9449_v34  ;;  %v7673_v10 = vpop.f32.mrf.mxu1  ;;  %v2042_v17 = vadd.f32 %v7256_v43, %v1400_v60 }
 0x196   : > { %9465 = vst [vmem:[#allocation14_spill] sm:$0xff] %v7662_v26  ;;  %v1104_v19 = vpop.f32.mrf.mxu0 }
 0x197   : > { %v2140_v42 = vsel %vm2119_vm0, %v2095_v41, %v2096_v39  ;;  %v1408_v2 = vadd.f32 %v7508_v31, %v1104_v19  ;;  %v7680_v8 = vpop.f32.mrf.mxu1  ;;  %v9470_v19 = vld [vmem:[#allocation6_spill] sm:$0xff] }
 0x198   : > { %v7678_v56 = vadd.f32 %v2140_v42, %v2041_v27  ;;  %v1106_v38 = vpop.f32.mrf.mxu0  ;;  %v9471_v42 = vld [vmem:[#allocation18_spill] sm:$0xff] }
 0x199   : > { %v2097_v30 = vrot.slane %v1408_v2, 1  ;;  %v1410_v53 = vadd.f32 %v7515_v57, %v1106_v38  ;;  %v7684_v61 = vpop.f32.mrf.mxu1 }
 0x19a   : > { %9468 = vst [vmem:[#allocation5_spill] sm:$0xff] %v7678_v56  ;;  %v1108_v44 = vpop.f32.mrf.mxu0  ;;  %1697 = vmatmul.mubr.bf16.gmra.mxu1 %v9470_v19  ;;  %v9475_v56 = vld [vmem:[#allocation20_spill] sm:$0xff] }
 0x19b   : > { %v2139_v37 = vsel %vm2119_vm0, %v2096_v39, %v2097_v30  ;;  %v1412_v41 = vadd.f32 %v7519_v12, %v1108_v44  ;;  %v7692_v27 = vpop.f32.mrf.mxu1  ;;  %1704 = vmatprep.mubr.bf16.mxu1 %v9471_v42  ;;  %v2043_v39 = vadd.f32 %v7256_v43, %v1406_v16  ;;  %v6278_v16 = vld [vmem:[%s9354_s3 + $0xdc] ss:$12 sps:$4 sm:$0xff]  }
 0x19c   : > { %v7689_v26 = vadd.f32 %v2139_v37, %v2042_v17  ;;  %v1112_v31 = vpop.f32.mrf.mxu0  ;;  %5969 = vmatmul.mubr.bf16.gmra.mxu0 %v6868_v48  ;;  %v6411_v17 = vmov 0.0|0.0   ;;  %3768 = vmatprep.subr.bf16.mxu1 %v6278_v16 }
 0x19d   : > { %v2098_v57 = vrot.slane %v1412_v41, 1  ;;  %v1416_v60 = vadd.f32 %v7536_v46, %v1112_v31  ;;  %5972 = vmatprep.mubr.msk.bf16.mxu0 %vm6410_vm1, %v9449_v34  ;;  %v7700_v2 = vpop.f32.mrf.mxu1  ;;  %v5454_v44 = vcombine.low %v6411_v17, %v6411_v17 }
 0x19e   : > { %9469 = vst [vmem:[#allocation16_spill] sm:$0xff] %v7689_v26  ;;  %v1114_v12 = vpop.f32.mrf.mxu0 }
 0x19f   : > { %v2138_v48 = vsel %vm2119_vm0, %v2097_v30, %v2098_v57  ;;  %v1418_v38 = vadd.f32 %v7547_v11, %v1114_v12  ;;  %v7707_v41 = vpop.f32.mrf.mxu1  ;;  %2767 = vst [vmem:[#allocation2 + $0x8] sm:$0xf] %v5454_v44  ;;  %2765 = vst [vmem:[#allocation2] sm:$0xf] %v5454_v44  ;;  %v2044_v11 = vadd.f32 %v7256_v43, %v1410_v53  ;;  %v9474_v53 = vld [vmem:[#allocation7_spill] sm:$0xff] }
 0x1a0   : > { %v7705_v37 = vadd.f32 %v2138_v48, %v2043_v39  ;;  %v1116_v46 = vpop.f32.mrf.mxu0  ;;  %2816 = vst [vmem:[#allocation2 + $0xcc] sm:$0xf] %v5454_v44  ;;  %2818 = vst [vmem:[#allocation2 + $0xd4] sm:$0xf] %v5454_v44  ;;  %v6276_v39 = vld [vmem:[%s9354_s3 + $0xd8] ss:$12 sps:$4 sm:$0xff]  }
 0x1a1   : > { %v2099_v31 = vrot.slane %v1418_v38, 1  ;;  %v1420_v42 = vadd.f32 %v7554_v25, %v1116_v46  ;;  %v7714_v12 = vpop.f32.mrf.mxu1  ;;  %3769 = vmatpush2.bf16.msra.mxu1 %v6276_v39 }
 0x1a2   : > { %9472 = vst [vmem:[#allocation6_spill] sm:$0xff] %v7705_v37  ;;  %v1118_v30 = vpop.f32.mrf.mxu0  ;;  %1705 = vmatmul.mubr.bf16.gmra.mxu1 %v9474_v53 }
 0x1a3   : > { %v2137_v25 = vsel %vm2119_vm0, %v2098_v57, %v2099_v31  ;;  %v1422_v48 = vadd.f32 %v7558_v9, %v1118_v30  ;;  %v7725_v44 = vpop.f32.mrf.mxu1  ;;  %1712 = vmatprep.mubr.bf16.mxu1 %v9475_v56  ;;  %v2045_v9 = vadd.f32 %v7256_v43, %v1416_v60  ;;  %v6279_v56 = vld [vmem:[%s9354_s3 + $0x1c8] ss:$12 sps:$4 sm:$0xff]  }
 0x1a4   : > { %v7722_v38 = vadd.f32 %v2137_v25, %v2044_v11  ;;  %v1122_v46 = vpop.f32.mrf.mxu0  ;;  %5973 = vmatmul.mubr.bf16.gmra.mxu0 %v6887_v54 }
 0x1a5   : > { %v2100_v37 = vrot.slane %v1422_v48, 1  ;;  %v1426_v26 = vadd.f32 %v7566_v23, %v1122_v46  ;;  %5976 = vmatprep.mubr.msk.bf16.mxu0 %vm6410_vm1, %v9449_v34  ;;  %v7733_v16 = vpop.f32.mrf.mxu1  ;;  %v6281_v23 = vld [vmem:[%s9354_s3 + $0x1cc] ss:$12 sps:$4 sm:$0xff]  }
 0x1a6   : > { %9473 = vst [vmem:[#allocation18_spill] sm:$0xff] %v7722_v38  ;;  %v1124_v57 = vpop.f32.mrf.mxu0  ;;  %4021 = vmatprep.subr.bf16.mxu0 %v6281_v23  ;;  %v9481_v38 = vmov 0  }
 0x1a7   : > { %v2136_v54 = vsel %vm2119_vm0, %v2099_v31, %v2100_v37  ;;  %v1428_v11 = vadd.f32 %v7574_v33, %v1124_v57  ;;  %v7743_v48 = vpop.f32.mrf.mxu1  ;;  %v5455_v31 = vcombine.high %v6411_v17, %v6411_v17  ;;  %v2046_v33 = vadd.f32 %v7256_v43, %v1420_v42  ;;  %4022 = vmatpush1.bf16.msra.mxu0 %v6279_v56 }
 0x1a8   : > { %v7741_v30 = vadd.f32 %v2136_v54, %v2045_v9  ;;  %v1126_v25 = vpop.f32.mrf.mxu0  ;;  %v2047_v56 = vadd.f32 %v7256_v43, %v1426_v26  ;;  %v6290_v26 = vld [vmem:[%s9354_s3 + $0x19c] ss:$12 sps:$4 sm:$0xff]  }
 0x1a9   : > { %v2101_v60 = vrot.slane %v1428_v11, 1  ;;  %v1430_v39 = vadd.f32 %v7581_v13, %v1126_v25  ;;  %v7750_v57 = vpop.f32.mrf.mxu1  ;;  %2766 = vst [vmem:[#allocation2 + $0x4] sm:$0xf] %v5455_v31  ;;  %2817 = vst [vmem:[#allocation2 + $0xd0] sm:$0xf] %v5455_v31  ;;  %v9478_v11 = vld [vmem:[#allocation8_spill] sm:$0xff] }
 0x1aa   : > { %9476 = vst [vmem:[#allocation7_spill] sm:$0xff] %v7741_v30  ;;  %v1128_v46 = vpop.f32.mrf.mxu0  ;;  %v6287_v30 = vld [vmem:[%s9354_s3 + $0x1b4] ss:$12 sps:$4 sm:$0xff]   ;;  %1713 = vmatmul.mubr.bf16.gmra.mxu1 %v9478_v11  ;;  %v9479_v25 = vld [vmem:[#allocation21_spill] sm:$0xff] }
 0x1ab   : > { %v2135_v9 = vsel %vm2119_vm0, %v2100_v37, %v2101_v60  ;;  %v1432_v54 = vadd.f32 %v7585_v0, %v1128_v46  ;;  %v7761_v42 = vpop.f32.mrf.mxu1  ;;  %v6285_v37 = vld [vmem:[%s9354_s3 + $0x1b0] ss:$12 sps:$4 sm:$0xff]   ;;  %1720 = vmatprep.mubr.bf16.mxu1 %v9479_v25  ;;  %4023 = vmatprep.subr.bf16.mxu0 %v6287_v30  ;;  %v6288_v30 = vld [vmem:[%s9354_s3 + $0x198] ss:$12 sps:$4 sm:$0xff]  }
 0x1ac   : > { %v7758_v13 = vadd.f32 %v2135_v9, %v2046_v33  ;;  %v1132_v17 = vpop.f32.mrf.mxu0  ;;  %5977 = vmatmul.mubr.bf16.gmra.mxu0 %v6902_v58  ;;  %v6284_v33 = vld [vmem:[%s9354_s3 + $0xc4] ss:$12 sps:$4 sm:$0xff]   ;;  %v6282_v9 = vld [vmem:[%s9354_s3 + $0xc0] ss:$12 sps:$4 sm:$0xff]  }
 0x1ad   : > { %v2102_v0 = vrot.slane %v1432_v54, 1  ;;  %v1436_v23 = vadd.f32 %v7593_v45, %v1132_v17  ;;  %5980 = vmatprep.mubr.msk.bf16.mxu0 %vm6410_vm1, %v9449_v34  ;;  %v7772_v58 = vpop.f32.mrf.mxu1  ;;  %4024 = vmatpush1.bf16.msra.mxu0 %v6285_v37  ;;  %v2048_v37 = vadd.f32 %v7256_v43, %v1430_v39 }
 0x1ae   : > { %9477 = vst [vmem:[#allocation20_spill] sm:$0xff] %v7758_v13  ;;  %v1134_v31 = vpop.f32.mrf.mxu0  ;;  %3770 = vmatprep.subr.bf16.mxu1 %v6284_v33  ;;  %4025 = vmatprep.subr.bf16.mxu0 %v6290_v26  ;;  %v6295_v26 = vld [vmem:[%s9354_s3 + $0x180] ss:$12 sps:$4 sm:$0xff]  }
 0x1af   : > { %v2134_v46 = vsel %vm2119_vm0, %v2101_v60, %v2102_v0  ;;  %v1438_v45 = vadd.f32 %v7607_v52, %v1134_v31  ;;  %v1489_v25 = vpop.f32.mrf.mxu1  ;;  %3771 = vmatpush2.bf16.msra.mxu1 %v6282_v9  ;;  %v9483_v9 = vld [vmem:[#allocation9_spill] sm:$0xff] }
 0x1b0   : > { %v7786_v54 = vadd.f32 %v2134_v46, %v2047_v56  ;;  %v1136_v17 = vpop.f32.mrf.mxu0  ;;  %4286 = vmatprep.subr.bf16.mxu1 %v9481_v38  ;;  %v6297_v46 = vld [vmem:[%s9354_s3 + $0x184] ss:$12 sps:$4 sm:$0xff]   ;;  %v2049_v25 = vadd.f32 %v7256_v43, %v1436_v23 }
 0x1b1   : > { %v2103_v60 = vrot.slane %v1438_v45, 1  ;;  %v1440_v52 = vadd.f32 %v7614_v55, %v1136_v17  ;;  %v7793_v13 = vpop.f32.mrf.mxu1  ;;  %4026 = vmatpush1.bf16.msra.mxu0 %v6288_v30  ;;  %v9484_v17 = vld [vmem:[#allocation22_spill] sm:$0xff] }
 0x1b2   : > { %9480 = vst [vmem:[#allocation8_spill] sm:$0xff] %v7786_v54  ;;  %v1138_v31 = vpop.f32.mrf.mxu0  ;;  %1721 = vmatmul.mubr.bf16.gmra.mxu1 %v9483_v9  ;;  %4027 = vmatprep.subr.bf16.mxu0 %v6297_v46  ;;  %v9506_v54 = vld [vmem:[#allocation30_spill] sm:$0xff] }
 0x1b3   : > { %v2133_v56 = vsel %vm2119_vm0, %v2102_v0, %v2103_v60  ;;  %v1442_v33 = vadd.f32 %v7618_v28, %v1138_v31  ;;  %v1495_v39 = vpop.f32.mrf.mxu1  ;;  %1728 = vmatprep.mubr.bf16.mxu1 %v9484_v17  ;;  %v2050_v17 = vadd.f32 %v7256_v43, %v1440_v52  ;;  %v9488_v43 = vld [vmem:[#allocation23_spill] sm:$0xff] }
 0x1b4   : > { %v7802_v55 = vadd.f32 %v2133_v56, %v2048_v37  ;;  %v1142_v45 = vpop.f32.mrf.mxu0  ;;  %5981 = vmatmul.mubr.bf16.gmra.mxu0 %v9458_v14 }
 0x1b5   : > { %v2104_v0 = vrot.slane %v1442_v33, 1  ;;  %v1446_v28 = vadd.f32 %v7632_v35, %v1142_v45  ;;  %5984 = vmatprep.mubr.msk.bf16.mxu0 %vm6410_vm1, %v9449_v34  ;;  %v1497_v37 = vpop.f32.mrf.mxu1  ;;  %4028 = vmatpush1.bf16.msra.mxu0 %v6295_v26 }
 0x1b6   : > { %9482 = vst [vmem:[#allocation21_spill] sm:$0xff] %v7802_v55  ;;  %v1144_v30 = vpop.f32.mrf.mxu0 }
 0x1b7   : > { %v2132_v14 = vsel %vm2119_vm0, %v2103_v60, %v2104_v0  ;;  %v1448_v31 = vadd.f32 %v7646_v24, %v1144_v30  ;;  %v1499_v35 = vpop.f32.mrf.mxu1 }
 0x1b8   : > { %v7817_v56 = vadd.f32 %v2132_v14, %v2049_v25  ;;  %v1146_v33 = vpop.f32.mrf.mxu0  ;;  %v9487_v25 = vld [vmem:[#allocation10_spill] sm:$0xff] }
 0x1b9   : > { %v2105_v45 = vrot.slane %v1448_v31, 1  ;;  %v1450_v39 = vadd.f32 %v7653_v15, %v1146_v33  ;;  %v1501_v23 = vpop.f32.mrf.mxu1 }
 0x1ba   : > { %9485 = vst [vmem:[#allocation9_spill] sm:$0xff] %v7817_v56  ;;  %v1148_v55 = vpop.f32.mrf.mxu0  ;;  %1729 = vmatmul.mubr.bf16.gmra.mxu1 %v9487_v25 }
 0x1bb   : > { %v2131_v46 = vsel %vm2119_vm0, %v2104_v0, %v2105_v45  ;;  %v1452_v37 = vadd.f32 %v7657_v36, %v1148_v55  ;;  %v1538_v26 = vpop.f32.mrf.mxu1  ;;  %1736 = vmatprep.mubr.bf16.mxu1 %v9488_v43  ;;  %v7835_v36 = vld [vmem:[%s9353_s2] ss:$0 sm:$0xff]  ;;  %v9491_v43 = vld [vmem:[#allocation11_spill] sm:$0xff] }
 0x1bc   : > { %v7824_v60 = vadd.f32 %v2131_v46, %v2050_v17  ;;  %v1152_v24 = vpop.f32.mrf.mxu0  ;;  %5985 = vmatmul.mubr.bf16.gmra.mxu0 %v9462_v21  ;;  %v2051_v52 = vadd.f32 %v7835_v36, %v1446_v28  ;;  %v2052_v23 = vadd.f32 %v7835_v36, %v1450_v39  ;;  %v9492_v39 = vld [vmem:[#allocation24_spill] sm:$0xff] }
 0x1bd   : > { %v2106_v30 = vrot.slane %v1452_v37, 1  ;;  %v1456_v15 = vadd.f32 %v7665_v22, %v1152_v24  ;;  %5988 = vmatprep.mubr.msk.bf16.mxu0 %vm6410_vm1, %v9449_v34  ;;  %v1540_v21 = vpop.f32.mrf.mxu1 }
 0x1be   : > { %9486 = vst [vmem:[#allocation22_spill] sm:$0xff] %v7824_v60  ;;  %v1154_v55 = vpop.f32.mrf.mxu0 }
 0x1bf   : > { %v2130_v0 = vsel %vm2119_vm0, %v2105_v45, %v2106_v30  ;;  %v1458_v14 = vadd.f32 %v7673_v10, %v1154_v55  ;;  %v1541_v33 = vpop.f32.mrf.mxu1 }
 0x1c0   : > { %v7841_v22 = vadd.f32 %v2130_v0, %v2051_v52  ;;  %v1156_v31 = vpop.f32.mrf.mxu0 }
 0x1c1   : > { %v2107_v35 = vrot.slane %v1458_v14, 1  ;;  %v1460_v17 = vadd.f32 %v7680_v8, %v1156_v31  ;;  %v1543_v37 = vpop.f32.mrf.mxu1 }
 0x1c2   : > { %9489 = vst [vmem:[#allocation10_spill] sm:$0xff] %v7841_v22  ;;  %v1158_v46 = vpop.f32.mrf.mxu0  ;;  %1737 = vmatmul.mubr.bf16.gmra.mxu1 %v9491_v43 }
 0x1c3   : > { %v2129_v28 = vsel %vm2119_vm0, %v2106_v30, %v2107_v35  ;;  %v1462_v24 = vadd.f32 %v7684_v61, %v1158_v46  ;;  %v1546_v10 = vpop.f32.mrf.mxu1  ;;  %1744 = vmatprep.mubr.bf16.mxu1 %v9492_v39  ;;  %v2053_v30 = vadd.f32 %v7835_v36, %v1456_v15 }
 0x1c4   : > { %v7848_v26 = vadd.f32 %v2129_v28, %v2052_v23  ;;  %v1162_v45 = vpop.f32.mrf.mxu0  ;;  %5989 = vmatmul.mubr.bf16.gmra.mxu0 %v9466_v29  ;;  %v2054_v23 = vadd.f32 %v7835_v36, %v1460_v17 }
 0x1c5   : > { %v2108_v52 = vrot.slane %v1462_v24, 1  ;;  %v1466_v8 = vadd.f32 %v7692_v27, %v1162_v45  ;;  %5992 = vmatprep.mubr.msk.bf16.mxu0 %vm6410_vm1, %v9449_v34  ;;  %v1548_v61 = vpop.f32.mrf.mxu1  ;;  %v9495_v45 = vld [vmem:[#allocation13_spill] sm:$0xff] }
 0x1c6   : > { %9490 = vst [vmem:[#allocation23_spill] sm:$0xff] %v7848_v26  ;;  %v1164_v55 = vpop.f32.mrf.mxu0  ;;  %v9504_v26 = vld [vmem:[#allocation26_spill] sm:$0xff] }
 0x1c7   : > { %v2128_v21 = vsel %vm2119_vm0, %v2107_v35, %v2108_v52  ;;  %v1468_v29 = vadd.f32 %v7700_v2, %v1164_v55  ;;  %v7862_v31 = vpop.f32.mrf.mxu1  ;;  %v2055_v17 = vadd.f32 %v7835_v36, %v1466_v8 }
 0x1c8   : > { %v7860_v0 = vadd.f32 %v2128_v21, %v2053_v30  ;;  %v1166_v14 = vpop.f32.mrf.mxu0 }
 0x1c9   : > { %v2109_v27 = vrot.slane %v1468_v29, 1  ;;  %v1470_v33 = vadd.f32 %v7707_v41, %v1166_v14  ;;  %v1551_v37 = vpop.f32.mrf.mxu1 }
 0x1ca   : > { %9493 = vst [vmem:[#allocation11_spill] sm:$0xff] %v7860_v0  ;;  %v1168_v46 = vpop.f32.mrf.mxu0  ;;  %1745 = vmatmul.mubr.bf16.gmra.mxu1 %v9495_v45 }
 0x1cb   : > { %v2127_v15 = vsel %vm2119_vm0, %v2108_v52, %v2109_v27  ;;  %v1472_v28 = vadd.f32 %v7714_v12, %v1168_v46  ;;  %v7872_v24 = vpop.f32.mrf.mxu1  ;;  %v2056_v29 = vadd.f32 %v7835_v36, %v1470_v33 }
 0x1cc   : > { %v7869_v35 = vadd.f32 %v2127_v15, %v2054_v23  ;;  %v1172_v2 = vpop.f32.mrf.mxu0  ;;  %5993 = vmatmul.mubr.bf16.gmra.mxu0 %v9470_v19 }
 0x1cd   : > { %v2110_v10 = vrot.slane %v1472_v28, 1  ;;  %v1476_v41 = vadd.f32 %v7725_v44, %v1172_v2  ;;  %5996 = vmatprep.mubr.msk.bf16.mxu0 %vm6410_vm1, %v9449_v34  ;;  %v1556_v39 = vpop.f32.mrf.mxu1 }
 0x1ce   : > { %9494 = vst [vmem:[#allocation24_spill] sm:$0xff] %v7869_v35  ;;  %v1174_v52 = vpop.f32.mrf.mxu0 }
 0x1cf   : > { %v2126_v12 = vsel %vm2119_vm0, %v2109_v27, %v2110_v10  ;;  %v1478_v30 = vadd.f32 %v7733_v16, %v1174_v52  ;;  %v7884_v61 = vpop.f32.mrf.mxu1 }
 0x1d0   : > { %v7882_v19 = vadd.f32 %v2126_v12, %v2055_v17  ;;  %v1176_v55 = vpop.f32.mrf.mxu0 }
 0x1d1   : > { %v2111_v21 = vrot.slane %v1478_v30, 1  ;;  %v1480_v44 = vadd.f32 %v7743_v48, %v1176_v55  ;;  %v1559_v23 = vpop.f32.mrf.mxu1  ;;  %v2057_v48 = vadd.f32 %v7835_v36, %v1476_v41 }
 0x1d2   : > { %9496 = vst [vmem:[#allocation13_spill] sm:$0xff] %v7882_v19  ;;  %v1178_v14 = vpop.f32.mrf.mxu0  ;;  %v9502_v19 = vld [vmem:[#allocation17_spill] sm:$0xff] }
 0x1d3   : > { %v2125_v8 = vsel %vm2119_vm0, %v2110_v10, %v2111_v21  ;;  %v1482_v46 = vadd.f32 %v7750_v57, %v1178_v14  ;;  %v7894_v37 = vpop.f32.mrf.mxu1 }
 0x1d4   : > { %v7891_v27 = vadd.f32 %v2125_v8, %v2056_v29  ;;  %v1182_v16 = vpop.f32.mrf.mxu0  ;;  %5997 = vmatmul.mubr.bf16.gmra.mxu0 %v9474_v53 }
 0x1d5   : > { %v2112_v15 = vrot.slane %v1482_v46, 1  ;;  %v1486_v28 = vadd.f32 %v7761_v42, %v1182_v16  ;;  %6000 = vmatprep.mubr.msk.bf16.mxu0 %vm6410_vm1, %v9449_v34  ;;  %v1564_v2 = vpop.f32.mrf.mxu1  ;;  %v2058_v42 = vadd.f32 %v7835_v36, %v1480_v44 }
 0x1d6   : > { %9497 = vst [vmem:[#allocation41_spill] sm:$0xff] %v7891_v27  ;;  %v1184_v33 = vpop.f32.mrf.mxu0 }
 0x1d7   : > { %v2124_v57 = vsel %vm2119_vm0, %v2111_v21, %v2112_v15  ;;  %v1488_v10 = vadd.f32 %v7772_v58, %v1184_v33  ;;  %v7905_v52 = vpop.f32.mrf.mxu1  ;;  %v2059_v44 = vadd.f32 %v7835_v36, %v1486_v28 }
 0x1d8   : > { %v7903_v17 = vadd.f32 %v2124_v57, %v2057_v48  ;;  %v1186_v53 = vpop.f32.mrf.mxu0 }
 0x1d9   : > { %v2113_v39 = vrot.slane %v1488_v10, 1  ;;  %v1567_v30 = vpop.f32.mrf.mxu1 }
 0x1da   : > { %9498 = vst [vmem:[#allocation42_spill] sm:$0xff] %v7903_v17  ;;  %v1188_v12 = vpop.f32.mrf.mxu0 }
 0x1db   : > { %v2123_v41 = vsel %vm2119_vm0, %v2112_v15, %v2113_v39  ;;  %v1492_v55 = vadd.f32 %v7793_v13, %v1188_v12  ;;  %v7914_v58 = vpop.f32.mrf.mxu1 }
 0x1dc   : > { %v7911_v29 = vadd.f32 %v2123_v41, %v2058_v42  ;;  %v1192_v21 = vpop.f32.mrf.mxu0  ;;  %6001 = vmatmul.mubr.bf16.gmra.mxu0 %v9478_v11 }
 0x1dd   : > { %v2114_v14 = vrot.slane %v1492_v55, 1  ;;  %6004 = vmatprep.mubr.msk.bf16.mxu0 %vm6410_vm1, %v9449_v34  ;;  %v1572_v8 = vpop.f32.mrf.mxu1 }
 0x1de   : > { %9499 = vst [vmem:[#allocation43_spill] sm:$0xff] %v7911_v29  ;;  %v1194_v23 = vpop.f32.mrf.mxu0 }
 0x1df   : > { %v2122_v46 = vsel %vm2119_vm0, %v2113_v39, %v2114_v14  ;;  %v7923_v15 = vpop.f32.mrf.mxu1 }
 0x1e0   : > { %v7921_v16 = vadd.f32 %v2122_v46, %v2059_v44  ;;  %v1196_v13 = vpop.f32.mrf.mxu0 }
 0x1e1   : > { %v1575_v11 = vpop.f32.mrf.mxu1 }
 0x1e2   : > { %9500 = vst [vmem:[#allocation44_spill] sm:$0xff] %v7921_v16  ;;  %v1198_v48 = vpop.f32.mrf.mxu0 }
 0x1e3   : > { %v7926_v2 = vpop.f32.mrf.mxu1 }
 0x1e4   : > { %v1235_v33 = vpop.f32.mrf.mxu0  ;;  %6005 = vmatmul.mubr.bf16.gmra.mxu0 %v9483_v9 }
 0x1e5   : > { %6008 = vmatprep.mubr.msk.bf16.mxu0 %vm6410_vm1, %v9449_v34  ;;  %v1580_v57 = vpop.f32.mrf.mxu1 }
 0x1e6   : > { %v1237_v28 = vpop.f32.mrf.mxu0 }
 0x1e7   : > { %v7930_v53 = vpop.f32.mrf.mxu1 }
 0x1e8   : > { %v1239_v10 = vpop.f32.mrf.mxu0 }
 0x1e9   : > { %v1583_v42 = vpop.f32.mrf.mxu1 }
 0x1ea   : > { %v1241_v39 = vpop.f32.mrf.mxu0 }
 0x1eb   : > { %v7933_v30 = vpop.f32.mrf.mxu1 }
 0x1ec   : > { %v1245_v12 = vpop.f32.mrf.mxu0  ;;  %6009 = vmatmul.mubr.bf16.gmra.mxu0 %v9487_v25 }
 0x1ed   : > { %6012 = vmatprep.mubr.msk.bf16.mxu0 %vm6410_vm1, %v9449_v34  ;;  %v1588_v41 = vpop.f32.mrf.mxu1 }
 0x1ee   : > { %v1247_v9 = vpop.f32.mrf.mxu0 }
 0x1ef   : > { %v7937_v21 = vpop.f32.mrf.mxu1 }
 0x1f0   : > { %v1249_v55 = vpop.f32.mrf.mxu0 }
 0x1f1   : > { %v1591_v44 = vpop.f32.mrf.mxu1 }
 0x1f2   : > { %v1251_v14 = vpop.f32.mrf.mxu0  ;;  %v9501_v44 = vld [vmem:[#allocation15_spill] sm:$0xff] }
 0x1f3   : > { %v7940_v8 = vpop.f32.mrf.mxu1 }
 0x1f4   : > { %v1255_v23 = vpop.f32.mrf.mxu0  ;;  %6013 = vmatmul.mubr.bf16.gmra.mxu0 %v9491_v43 }
 0x1f5   : > { %6016 = vmatprep.mubr.msk.bf16.mxu0 %vm6410_vm1, %v9449_v34  ;;  %v1596_v46 = vpop.f32.mrf.mxu1 }
 0x1f6   : > { %v1257_v25 = vpop.f32.mrf.mxu0 }
 0x1f7   : > { %v7946_v48 = vpop.f32.mrf.mxu1 }
 0x1f8   : > { %v7944_v13 = vpop.f32.mrf.mxu0 }
 0x1f9   : > { %v1599_v33 = vpop.f32.mrf.mxu1 }
 0x1fa   : > { %v1261_v11 = vpop.f32.mrf.mxu0 }
 0x1fb   : > { %v7951_v57 = vpop.f32.mrf.mxu1 }
 0x1fc   : > { %v7948_v28 = vpop.f32.mrf.mxu0  ;;  %6017 = vmatmul.mubr.bf16.gmra.mxu0 %v9495_v45 }
 0x1fd   : > { %6020 = vmatprep.mubr.msk.bf16.mxu0 %vm6410_vm1, %v9449_v34  ;;  %v1604_v10 = vpop.f32.mrf.mxu1 }
 0x1fe   : > { %v1267_v43 = vpop.f32.mrf.mxu0 }
 0x1ff   : > { %v7957_v42 = vpop.f32.mrf.mxu1 }
 0x200   : > { %v7955_v39 = vpop.f32.mrf.mxu0 }
 0x201   : > { %v1607_v9 = vpop.f32.mrf.mxu1 }
 0x202   : > { %v1271_v12 = vpop.f32.mrf.mxu0  ;;  %v9503_v9 = vld [vmem:[#allocation28_spill] sm:$0xff] }
 0x203   : > { %v7960_v46 = vpop.f32.mrf.mxu1 }
 0x204   : > { %v1787_v41 = vpop.f32.mrf.mxu0  ;;  %6021 = vmatmul.mubr.bf16.gmra.mxu0 %v9501_v44 }
 0x205   : > { %6024 = vmatprep.mubr.msk.bf16.mxu0 %vm6410_vm1, %v9449_v34  ;;  %v1612_v33 = vpop.f32.mrf.mxu1  ;;  %v1258_v41 = vadd.f32 %v1257_v25, %v9503_v9  ;;  %v1262_v25 = vadd.f32 %v1261_v11, %v9506_v54 }
 0x206   : > { %v5926_v45 = vpop.f32.mrf.mxu0 }
 0x207   : > { %v7964_v29 = vpop.f32.mrf.mxu1  ;;  %v1252_v45 = vadd.f32 %v1251_v14, %v9504_v26  ;;  %v2067_v22 = vrot.slane %v1258_v41, 1 }
 0x208   : > { %v1790_v16 = vpop.f32.mrf.mxu0 }
 0x209   : > { %v1615_v17 = vpop.f32.mrf.mxu1 }
 0x20a   : > { %v5927_v10 = vpop.f32.mrf.mxu0 }
 0x20b   : > { %v7967_v35 = vpop.f32.mrf.mxu1  ;;  %v9505_v10 = vld [vmem:[#allocation25_spill] sm:$0xff] }
 0x20c   : > { %v1795_v27 = vpop.f32.mrf.mxu0  ;;  %6025 = vmatmul.mubr.bf16.gmra.mxu0 %v9502_v19  ;;  %v1250_v17 = vadd.f32 %v1249_v55, %v9505_v10  ;;  %v2066_v19 = vrot.slane %v1252_v45, 1 }
 0x20d   : > { %6028 = vmatprep.mubr.msk.bf16.mxu0 %vm6410_vm1, %v9449_v34  ;;  %v1620_v0 = vpop.f32.mrf.mxu1 }
 0x20e   : > { %v5930_v44 = vpop.f32.mrf.mxu0  ;;  %v2169_v26 = vsel %vm2119_vm0, %v2066_v19, %v2067_v22  ;;  %v9508_v0 = vld [vmem:[#allocation32_spill] sm:$0xff]  ;;  %v9510_v19 = vld [vmem:[#allocation34_spill] sm:$0xff] }
 0x20f   : > { %v7973_v16 = vpop.f32.mrf.mxu1  ;;  %v1268_v14 = vadd.f32 %v1267_v43, %v9508_v0  ;;  %v9511_v0 = vld [vmem:[#allocation29_spill] sm:$0xff] }
 0x210   : > { %v1798_v33 = vpop.f32.mrf.mxu0 }
 0x211   : > { %v1623_v60 = vpop.f32.mrf.mxu1  ;;  %v1799_v56 = vadd.f32 %v1798_v33, %v7862_v31  ;;  %v2068_v33 = vrot.slane %v1262_v25, 1  ;;  %v2069_v43 = vrot.slane %v1268_v14, 1 }
 0x212   : > { %v5931_v27 = vpop.f32.mrf.mxu0  ;;  %v2012_v60 = vadd.f32 %v7835_v36, %v1250_v17 }
 0x213   : > { %v7979_v34 = vpop.f32.mrf.mxu1  ;;  %v2231_v55 = vrot.slane %v1799_v56, 2  ;;  %v7998_v56 = vld [vmem:[%s9354_s3 + $0x230] ss:$12 sps:$4 sm:$0xff]  }
 0x214   : > { %v1803_v9 = vpop.f32.mrf.mxu0  ;;  %6029 = vmatmul.mubr.bf16.gmra.mxu0 %v9507_v1  ;;  %v9509_v1 = vld [vmem:[#allocation27_spill] sm:$0xff]  ;;  %v2177_v45 = vadd.f32 %v2169_v26, %v2012_v60  ;;  %6032 = vmatprep.subr.bf16.mxu0 %v7998_v56 }
 0x215   : > { %v1804_v41 = vadd.f32 %v1803_v9, %v7872_v24  ;;  %4045 = vmatprep.mubr.bf16.mxu0 %v9481_v38  ;;  %v1628_v54 = vpop.f32.mrf.mxu1  ;;  %v1256_v44 = vadd.f32 %v1255_v23, %v9509_v1  ;;  %v1272_v24 = vadd.f32 %v1271_v12, %v9510_v19  ;;  %v1260_v23 = vadd.f32 %v7944_v13, %v9511_v0 }
 0x216   : > { %v5934_v31 = vpop.f32.mrf.mxu0  ;;  %v2168_v12 = vsel %vm2119_vm0, %v2067_v22, %v2068_v33  ;;  %v2167_v13 = vsel %vm2119_vm0, %v2068_v33, %v2069_v43  ;;  %v8020_v33 = vadd.s32 16, %v7236_v40 }
 0x217   : > { %v2232_v11 = vrot.slane %v1804_v41, 2  ;;  %v7989_v27 = vpop.f32.mrf.mxu1  ;;  %v2013_v54 = vadd.f32 %v7835_v36, %v1256_v44 }
 0x218   : > { %v1806_v10 = vpop.f32.mrf.mxu0  ;;  %vm2404_vm4 = vcmp.le.s32.totalorder %v8020_v33, 16 }
 0x219   : > { %v2332_v9 = vsel %vm2282_vm2, %v2231_v55, %v2232_v11  ;;  %v1807_v17 = vadd.f32 %v1806_v10, %v7884_v61  ;;  %v1631_v41 = vpop.f32.mrf.mxu1  ;;  %v2070_v55 = vrot.slane %v1272_v24, 1  ;;  %v9512_v10 = vld [vmem:[#allocation31_spill] sm:$0xff]  ;;  %v2178_v44 = vadd.f32 %v2168_v12, %v2013_v54 }
 0x21a   : > { %v2340_v25 = vadd.f32 %v2332_v9, %v2177_v45  ;;  %v5935_v26 = vpop.f32.mrf.mxu0  ;;  %v2014_v45 = vadd.f32 %v7835_v36, %v1260_v23  ;;  %v1266_v19 = vadd.f32 %v7948_v28, %v9512_v10 }
 0x21b   : > { %v2233_v14 = vrot.slane %v1807_v17, 2  ;;  %v8006_v31 = vpop.f32.mrf.mxu1  ;;  %v2166_v28 = vsel %vm2119_vm0, %v2069_v43, %v2070_v55 }
 0x21c   : > { %v2414_v61 = vmax.f32 %v2340_v25, 0.0  ;;  %v1811_v60 = vpop.f32.mrf.mxu0  ;;  %v2015_v12 = vadd.f32 %v7835_v36, %v1266_v19 }
 0x21d   : > { %v1812_v1 = vadd.f32 %v1811_v60, %v7894_v37  ;;  %v2331_v9 = vsel %vm2282_vm2, %v2232_v11, %v2233_v14  ;;  %v1636_v0 = vpop.f32.mrf.mxu1  ;;  %v2179_v37 = vadd.f32 %v2167_v13, %v2014_v45  ;;  %v9513_v60 = vld [vmem:[#allocation33_spill] sm:$0xff] }
 0x21e   : > { %v2480_v22 = vsel %vm2393_vm3, %v2414_v61, 0.0  ;;  %v5938_v17 = vpop.f32.mrf.mxu0  ;;  %v2341_v41 = vadd.f32 %v2331_v9, %v2178_v44  ;;  %v1270_v54 = vadd.f32 %v7955_v39, %v9513_v60  ;;  %v9514_v0 = vld [vmem:[#allocation35_spill] sm:$0xff] }
 0x21f   : > { %v5655_v25 = vpack.c.bf16 %v2480_v22, %v2480_v22  ;;  %v2234_v26 = vrot.slane %v1812_v1, 2  ;;  %v8022_v23 = vpop.f32.mrf.mxu1  ;;  %v2180_v22 = vadd.f32 %v2166_v28, %v2015_v12 }
 0x220   : > { %v1814_v24 = vpop.f32.mrf.mxu0  ;;  %v2415_v19 = vmax.f32 %v2341_v41, 0.0 }
 0x221   : > { %2768 = vst [vmem:[#allocation2 + $0xc] sm:$0xf] %v5655_v25  ;;  %v2330_v11 = vsel %vm2282_vm2, %v2233_v14, %v2234_v26  ;;  %v1815_v61 = vadd.f32 %v1814_v24, %v7905_v52  ;;  %v1639_v45 = vpop.f32.mrf.mxu1  ;;  %v9515_v14 = vrot.slane %v9514_v0, 1  ;;  %v2016_v25 = vadd.f32 %v7835_v36, %v1270_v54 }
 0x222   : > { %v2342_v1 = vadd.f32 %v2330_v11, %v2179_v37  ;;  %v5939_v13 = vpop.f32.mrf.mxu0 }
 0x223   : > { %v2235_v10 = vrot.slane %v1815_v61, 2  ;;  %v8033_v9 = vpop.f32.mrf.mxu1  ;;  %v2165_v52 = vsel %vm2119_vm0, %v2070_v55, %v9515_v14 }
 0x224   : > { %v2416_v43 = vmax.f32 %v2342_v1, 0.0  ;;  %v1819_v17 = vpop.f32.mrf.mxu0  ;;  %v2181_v60 = vadd.f32 %v2165_v52, %v2016_v25 }
 0x225   : > { %v2329_v39 = vsel %vm2282_vm2, %v2234_v26, %v2235_v10  ;;  %v1820_v44 = vadd.f32 %v1819_v17, %v7914_v58  ;;  %v1644_v11 = vpop.f32.mrf.mxu1 }
 0x226   : > { %v2482_v37 = vsel %vm2404_vm4, %v2416_v43, 0.0  ;;  %v2343_v24 = vadd.f32 %v2329_v39, %v2180_v22  ;;  %v5942_v28 = vpop.f32.mrf.mxu0 }
 0x227   : > { %v5706_v61 = vpack.c.bf16 %v2482_v37, %v2415_v19  ;;  %v2236_v12 = vrot.slane %v1820_v44, 2  ;;  %v8045_v13 = vpop.f32.mrf.mxu1  ;;  %v6293_v28 = vld [vmem:[#allocation2] sm:$0xff]  }
 0x228   : > { %v1822_v1 = vpop.f32.mrf.mxu0  ;;  %v2417_v55 = vmax.f32 %v2343_v24, 0.0  ;;  %v2822_v37 = vld [vmem:[#allocation2 + $0xc] sm:$0xf] }
 0x229   : > { %5818 = vst [vmem:[#allocation2 + $0x10] sm:$0xff] %v5706_v61   ;;  %v2328_v26 = vsel %vm2282_vm2, %v2235_v10, %v2236_v12  ;;  %v1823_v58 = vadd.f32 %v1822_v1, %v7923_v15  ;;  %v1647_v54 = vpop.f32.mrf.mxu1 }
 0x22a   : > { %v2344_v36 = vadd.f32 %v2328_v26, %v2181_v60  ;;  %v5943_v41 = vpop.f32.mrf.mxu0  ;;  %v2483_v0 = vsel %vm2393_vm3, %v2417_v55, 0.0 }
 0x22b   : > { %v2237_v45 = vrot.slane %v1823_v58, 2  ;;  %v8050_v17 = vpop.f32.mrf.mxu1 }
 0x22c   : > { %v2418_v22 = vmax.f32 %v2344_v36, 0.0  ;;  %v1827_v43 = vpop.f32.mrf.mxu0 }
 0x22d   : > { %v2327_v14 = vsel %vm2282_vm2, %v2236_v12, %v2237_v45  ;;  %v1828_v52 = vadd.f32 %v1827_v43, %v7926_v2  ;;  %v1652_v39 = vpop.f32.mrf.mxu1 }
 0x22e   : > { %v5711_v19 = vpack.c.bf16 %v2418_v22, %v2483_v0  ;;  %v2345_v10 = vadd.f32 %v2327_v14, %v7280_v49  ;;  %v5946_v15 = vpop.f32.mrf.mxu0  ;;  %v6294_v49 = vld [vmem:[%s9354_s3 + $0xb0] ss:$12 sps:$4 sm:$0xff]   ;;  %v2821_v0 = vld [vmem:[#allocation2 + $0x8] sm:$0xf] }
 0x22f   : > { %v2238_v44 = vrot.slane %v1828_v52, 2  ;;  %v8060_v11 = vpop.f32.mrf.mxu1 }
 0x230   : > { %5819 = vst [vmem:[#allocation2 + $0x18] sm:$0xff] %v5711_v19   ;;  %v1830_v25 = vpop.f32.mrf.mxu0  ;;  %v8058_v24 = vld [vmem:[#allocation2 + $0x10] sm:$0xf]  ;;  %v2419_v60 = vmax.f32 %v2345_v10, 0.0  ;;  %v2824_v52 = vld [vmem:[#allocation2 + $0x14] sm:$0xf] }
 0x231   : > { %v2326_v61 = vsel %vm2282_vm2, %v2237_v45, %v2238_v44  ;;  %v1831_v12 = vadd.f32 %v1830_v25, %v7930_v53  ;;  %v8066_v2 = vcombine.low %v2822_v37, %v8058_v24  ;;  %v1655_v26 = vpop.f32.mrf.mxu1  ;;  %v6301_v45 = vld [vmem:[%s9354_s3 + $0x98] ss:$12 sps:$4 sm:$0xff]  }
 0x232   : > { %v2346_v1 = vadd.f32 %v2326_v61, %v7295_v7  ;;  %v5947_v55 = vpop.f32.mrf.mxu0  ;;  %v2485_v7 = vsel %vm2404_vm4, %v2419_v60, 0.0  ;;  %v8103_v26 = vcombine.low %v2821_v0, %v2822_v37 }
 0x233   : > { %v2239_v58 = vrot.slane %v1831_v12, 2  ;;  %3772 = vmatprep.mubr.bf16.mxu1 %v8066_v2  ;;  %v8073_v54 = vpop.f32.mrf.mxu1  ;;  %v9516_v12 = vld [vmem:[#allocation36_spill] sm:$0xff] }
 0x234   : > { %v2420_v36 = vmax.f32 %v2346_v1, 0.0  ;;  %v1835_v41 = vpop.f32.mrf.mxu0  ;;  %3773 = vmatmul.mubr.bf16.vlgmr.msra.gmra.mxu1 %v6293_v28  ;;  %v6308_v55 = vld [vmem:[%s9354_s3 + $0x80] ss:$12 sps:$4 sm:$0xff]  }
 0x235   : > { %v1836_v53 = vadd.f32 %v1835_v41, %v7933_v30  ;;  %4287 = vmatpush1.bf16.msra.mxu1 %v6294_v49  ;;  %v2325_v43 = vsel %vm2282_vm2, %v2238_v44, %v2239_v58  ;;  %v1660_v30 = vpop.f32.mrf.mxu1  ;;  %v6350_v44 = vld [vmem:[%s9354_s3 + $0x218] ss:$12 sps:$4 sm:$0xff]  }
 0x236   : > { %v2486_v22 = vsel %vm2393_vm3, %v2420_v36, 0.0  ;;  %v5950_v14 = vpop.f32.mrf.mxu0  ;;  %4288 = vmatprep.subr.bf16.mxu1 %v9481_v38  ;;  %v2347_v49 = vadd.f32 %v2325_v43, %v9516_v12  ;;  %v9517_v36 = vld [vmem:[#allocation37_spill] sm:$0xff] }
 0x237   : > { %v5716_v19 = vpack.c.bf16 %v2486_v22, %v2485_v7  ;;  %v2240_v10 = vrot.slane %v1836_v53, 2  ;;  %v8086_v15 = vld [vmem:[#allocation2 + $0x18] sm:$0xf]  ;;  %v8091_v61 = vpop.f32.mrf.mxu1  ;;  %v6312_v14 = vld [vmem:[%s9354_s3 + $0x68] ss:$12 sps:$4 sm:$0xff]  }
 0x238   : > { %v6300_v39 = vld [vmem:[#allocation2 + $0x18] sm:$0xff]   ;;  %v1838_v25 = vpop.f32.mrf.mxu0  ;;  %v8089_v28 = vcombine.low %v2824_v52, %v8086_v15  ;;  %v2421_v37 = vmax.f32 %v2347_v49, 0.0 }
 0x239   : > { %5820 = vst [vmem:[#allocation2 + $0x20] sm:$0xff] %v5716_v19   ;;  %v2324_v60 = vsel %vm2282_vm2, %v2239_v58, %v2240_v10  ;;  %v1839_v1 = vadd.f32 %v1838_v25, %v7937_v21  ;;  %4046 = vmatmul.mubr.bf16.vlgmr.msra.gmra.mxu0 %v6300_v39  ;;  %4289 = vmatpush1.bf16.msra.mxu1 %v6301_v45  ;;  %v1663_v7 = vpop.f32.mrf.mxu1  ;;  %v2826_v49 = vld [vmem:[#allocation2 + $0x1c] sm:$0xf] }
 0x23a   : > { %v2348_v41 = vadd.f32 %v2324_v60, %v9517_v36  ;;  %v5951_v53 = vpop.f32.mrf.mxu0  ;;  %3782 = vmatprep.mubr.bf16.mxu1 %v8089_v28  ;;  %4055 = vmatprep.mubr.bf16.mxu0 %v9481_v38 }
 0x23b   : > { %v2241_v22 = vrot.slane %v1839_v1, 2  ;;  %4290 = vmatprep.subr.bf16.mxu1 %v9481_v38  ;;  %6033 = vmatpush3.bf16.msra.mxu0 %v7998_v56  ;;  %v8111_v45 = vpop.f32.mrf.mxu1  ;;  %v8137_v53 = vcombine.low %v8058_v24, %v2824_v52 }
 0x23c   : > { %v2422_v21 = vmax.f32 %v2348_v41, 0.0  ;;  %v1843_v58 = vpop.f32.mrf.mxu0  ;;  %3783 = vmatmul.mubr.bf16.gmra.mxu1 %v8103_v26  ;;  %6034 = vmatprep.subr.bf16.mxu0 %v6350_v44 }
 0x23d   : > { %v2323_v43 = vsel %vm2282_vm2, %v2240_v10, %v2241_v22  ;;  %v1844_v0 = vadd.f32 %v1843_v58, %v7940_v8  ;;  %4291 = vmatpush1.bf16.msra.mxu1 %v6308_v55  ;;  %v1668_v39 = vpop.f32.mrf.mxu1 }
 0x23e   : > { %v2488_v56 = vsel %vm2404_vm4, %v2422_v21, 0.0  ;;  %v2349_v30 = vadd.f32 %v2323_v43, %v7354_v6  ;;  %v5954_v19 = vpop.f32.mrf.mxu0  ;;  %4292 = vmatprep.subr.bf16.mxu1 %v9481_v38 }
 0x23f   : > { %v5721_v25 = vpack.c.bf16 %v2488_v56, %v2421_v37  ;;  %v2242_v12 = vrot.slane %v1844_v0, 2  ;;  %6035 = vmatpush3.bf16.msra.mxu0 %v6350_v44  ;;  %v8125_v1 = vpop.f32.mrf.mxu1  ;;  %v6319_v44 = vld [vmem:[%s9354_s3 + $0x50] ss:$12 sps:$4 sm:$0xff]   ;;  %v6323_v0 = vld [vmem:[%s9354_s3 + $0x38] ss:$12 sps:$4 sm:$0xff]  }
 0x240   : > { %v1846_v10 = vpop.f32.mrf.mxu0  ;;  %v8123_v8 = vld [vmem:[#allocation2 + $0x20] sm:$0xf]  ;;  %v2423_v55 = vmax.f32 %v2349_v30, 0.0 }
 0x241   : > { %v6304_v60 = vld [vmem:[#allocation2 + $0x20] sm:$0xff]   ;;  %5821 = vst [vmem:[#allocation2 + $0x28] sm:$0xff] %v5721_v25   ;;  %v2322_v36 = vsel %vm2282_vm2, %v2241_v22, %v2242_v12  ;;  %v1847_v6 = vadd.f32 %v1846_v10, %v7946_v48  ;;  %v8131_v41 = vcombine.low %v2826_v49, %v8123_v8  ;;  %4293 = vmatpush1.bf16.msra.mxu1 %v6312_v14  ;;  %v1671_v22 = vpop.f32.mrf.mxu1 }
 0x242   : > { %v2350_v7 = vadd.f32 %v2322_v36, %v7365_v20  ;;  %v5955_v21 = vpop.f32.mrf.mxu0  ;;  %4056 = vmatmul.mubr.bf16.gmra.mxu0 %v6304_v60  ;;  %4294 = vmatprep.subr.bf16.mxu1 %v9481_v38  ;;  %v2489_v24 = vsel %vm2393_vm3, %v2423_v55, 0.0  ;;  %v2828_v25 = vld [vmem:[#allocation2 + $0x24] sm:$0xf] }
 0x243   : > { %v2243_v58 = vrot.slane %v1847_v6, 2  ;;  %3792 = vmatprep.mubr.bf16.mxu1 %v8131_v41  ;;  %4065 = vmatprep.mubr.bf16.mxu0 %v9481_v38  ;;  %v8144_v43 = vpop.f32.mrf.mxu1  ;;  %v6330_v6 = vld [vmem:[%s9354_s3 + $0x20] ss:$12 sps:$4 sm:$0xff]   ;;  %v8173_v21 = vcombine.low %v8086_v15, %v2826_v49 }
 0x244   : > { %v2424_v48 = vmax.f32 %v2350_v7, 0.0  ;;  %v1851_v37 = vpop.f32.mrf.mxu0  ;;  %3793 = vmatmul.mubr.bf16.gmra.mxu1 %v8137_v53 }
 0x245   : > { %v2321_v20 = vsel %vm2282_vm2, %v2242_v12, %v2243_v58  ;;  %v1852_v52 = vadd.f32 %v1851_v37, %v7951_v57  ;;  %4295 = vmatpush1.bf16.msra.mxu1 %v6319_v44  ;;  %v1676_v19 = vpop.f32.mrf.mxu1  ;;  %v6362_v44 = vld [vmem:[%s9354_s3 + $0x200] ss:$12 sps:$4 sm:$0xff]  }
 0x246   : > { %v5726_v14 = vpack.c.bf16 %v2424_v48, %v2489_v24  ;;  %v2351_v56 = vadd.f32 %v2321_v20, %v7387_v32  ;;  %v5958_v30 = vpop.f32.mrf.mxu0  ;;  %4296 = vmatprep.subr.bf16.mxu1 %v9481_v38  ;;  %6036 = vmatprep.subr.bf16.mxu0 %v6362_v44 }
 0x247   : > { %v2244_v39 = vrot.slane %v1852_v52, 2  ;;  %v8158_v57 = vpop.f32.mrf.mxu1  ;;  %6037 = vmatpush3.bf16.msra.mxu0 %v6362_v44 }
 0x248   : > { %5822 = vst [vmem:[#allocation2 + $0x30] sm:$0xff] %v5726_v14   ;;  %v1854_v10 = vpop.f32.mrf.mxu0  ;;  %v8156_v60 = vld [vmem:[#allocation2 + $0x28] sm:$0xf]  ;;  %v2425_v7 = vmax.f32 %v2351_v56, 0.0  ;;  %v2830_v56 = vld [vmem:[#allocation2 + $0x2c] sm:$0xf] }
 0x249   : > { %v6307_v12 = vld [vmem:[#allocation2 + $0x28] sm:$0xff]   ;;  %v2320_v55 = vsel %vm2282_vm2, %v2243_v58, %v2244_v39  ;;  %v1855_v36 = vadd.f32 %v1854_v10, %v7957_v42  ;;  %v8164_v32 = vcombine.low %v2828_v25, %v8156_v60  ;;  %4297 = vmatpush1.bf16.msra.mxu1 %v6323_v0  ;;  %v1679_v42 = vpop.f32.mrf.mxu1 }
 0x24a   : > { %v2352_v22 = vadd.f32 %v2320_v55, %v7398_v18  ;;  %v5959_v58 = vpop.f32.mrf.mxu0  ;;  %4066 = vmatmul.mubr.bf16.gmra.mxu0 %v6307_v12  ;;  %4298 = vmatprep.subr.bf16.mxu1 %v9481_v38  ;;  %v6334_v18 = vld [vmem:[%s9354_s3 + $0x8] ss:$12 sps:$4 sm:$0xff]   ;;  %v2491_v49 = vsel %vm2404_vm4, %v2425_v7, 0.0 }
 0x24b   : > { %v2245_v48 = vrot.slane %v1855_v36, 2  ;;  %3802 = vmatprep.mubr.bf16.mxu1 %v8164_v32  ;;  %4075 = vmatprep.mubr.bf16.mxu0 %v9481_v38  ;;  %v8180_v20 = vpop.f32.mrf.mxu1  ;;  %v8208_v58 = vcombine.low %v8123_v8, %v2828_v25 }
 0x24c   : > { %v2426_v37 = vmax.f32 %v2352_v22, 0.0  ;;  %v1859_v24 = vpop.f32.mrf.mxu0  ;;  %3803 = vmatmul.mubr.bf16.gmra.mxu1 %v8173_v21  ;;  %v6342_v22 = vld [vmem:[%s9354_s3 + $0x170] ss:$12 sps:$4 sm:$0xff]  }
 0x24d   : > { %v1860_v15 = vadd.f32 %v1859_v24, %v7960_v46  ;;  %4299 = vmatpush1.bf16.msra.mxu1 %v6330_v6  ;;  %v2319_v0 = vsel %vm2282_vm2, %v2244_v39, %v2245_v48  ;;  %v1684_v46 = vpop.f32.mrf.mxu1 }
 0x24e   : > { %v2492_v52 = vsel %vm2393_vm3, %v2426_v37, 0.0  ;;  %v5962_v14 = vpop.f32.mrf.mxu0  ;;  %4300 = vmatprep.subr.bf16.mxu1 %v9481_v38  ;;  %v2353_v44 = vadd.f32 %v2319_v0, %v7414_v5 }
 0x24f   : > { %v5731_v30 = vpack.c.bf16 %v2492_v52, %v2491_v49  ;;  %v2246_v19 = vrot.slane %v1860_v15, 2  ;;  %v8193_v10 = vld [vmem:[#allocation2 + $0x30] sm:$0xf]  ;;  %v8198_v6 = vpop.f32.mrf.mxu1 }
 0x250   : > { %v6311_v12 = vld [vmem:[#allocation2 + $0x30] sm:$0xff]   ;;  %v1862_v55 = vpop.f32.mrf.mxu0  ;;  %v8196_v36 = vcombine.low %v2830_v56, %v8193_v10  ;;  %v2427_v8 = vmax.f32 %v2353_v44, 0.0 }
 0x251   : > { %5823 = vst [vmem:[#allocation2 + $0x38] sm:$0xff] %v5731_v30   ;;  %v2318_v39 = vsel %vm2282_vm2, %v2245_v48, %v2246_v19  ;;  %v1863_v7 = vadd.f32 %v1862_v55, %v7964_v29  ;;  %4301 = vmatpush1.bf16.msra.mxu1 %v6334_v18  ;;  %v1687_v5 = vpop.f32.mrf.mxu1  ;;  %v6346_v18 = vld [vmem:[%s9354_s3 + $0x158] ss:$12 sps:$4 sm:$0xff]  }
 0x252   : > { %v2354_v42 = vadd.f32 %v2318_v39, %v7431_v3  ;;  %v5963_v37 = vpop.f32.mrf.mxu0  ;;  %3812 = vmatprep.mubr.bf16.mxu1 %v8196_v36  ;;  %4076 = vmatmul.mubr.bf16.gmra.mxu0 %v6311_v12  ;;  %v2832_v12 = vld [vmem:[#allocation2 + $0x34] sm:$0xf] }
 0x253   : > { %v2247_v24 = vrot.slane %v1863_v7, 2  ;;  %4085 = vmatprep.mubr.bf16.mxu0 %v9481_v38  ;;  %4302 = vmatprep.subr.bf16.mxu1 %v9481_v38  ;;  %v8215_v15 = vpop.f32.mrf.mxu1  ;;  %v8241_v37 = vcombine.low %v8156_v60, %v2830_v56 }
 0x254   : > { %v2428_v29 = vmax.f32 %v2354_v42, 0.0  ;;  %v1867_v48 = vpop.f32.mrf.mxu0  ;;  %3813 = vmatmul.mubr.bf16.gmra.mxu1 %v8208_v58  ;;  %v6354_v42 = vld [vmem:[%s9354_s3 + $0x140] ss:$12 sps:$4 sm:$0xff]  }
 0x255   : > { %v2317_v3 = vsel %vm2282_vm2, %v2246_v19, %v2247_v24  ;;  %v1868_v25 = vadd.f32 %v1867_v48, %v7967_v35  ;;  %4303 = vmatpush2.bf16.msra.mxu1 %v6342_v22  ;;  %v1692_v14 = vpop.f32.mrf.mxu1 }
 0x256   : > { %v2494_v49 = vsel %vm2404_vm4, %v2428_v29, 0.0  ;;  %v2355_v52 = vadd.f32 %v2317_v3, %v7453_v51  ;;  %v5966_v0 = vpop.f32.mrf.mxu0  ;;  %4304 = vmatprep.subr.bf16.mxu1 %v9481_v38 }
 0x257   : > { %v5736_v46 = vpack.c.bf16 %v2494_v49, %v2427_v8  ;;  %v2248_v30 = vrot.slane %v1868_v25, 2  ;;  %v8229_v44 = vpop.f32.mrf.mxu1  ;;  %v6358_v25 = vld [vmem:[%s9354_s3 + $0x128] ss:$12 sps:$4 sm:$0xff]  }
 0x258   : > { %v1870_v19 = vpop.f32.mrf.mxu0  ;;  %v8227_v55 = vld [vmem:[#allocation2 + $0x38] sm:$0xf]  ;;  %v2429_v39 = vmax.f32 %v2355_v52, 0.0 }
 0x259   : > { %v6315_v35 = vld [vmem:[#allocation2 + $0x38] sm:$0xff]   ;;  %5824 = vst [vmem:[#allocation2 + $0x40] sm:$0xff] %v5736_v46   ;;  %v2316_v7 = vsel %vm2282_vm2, %v2247_v24, %v2248_v30  ;;  %v1871_v51 = vadd.f32 %v1870_v19, %v7973_v16  ;;  %v8235_v22 = vcombine.low %v2832_v12, %v8227_v55  ;;  %4305 = vmatpush2.bf16.msra.mxu1 %v6346_v18  ;;  %v1695_v48 = vpop.f32.mrf.mxu1  ;;  %v6374_v18 = vld [vmem:[%s9354_s3 + $0x1e8] ss:$12 sps:$4 sm:$0xff]  }
 0x25a   : > { %v2356_v5 = vadd.f32 %v2316_v7, %v7470_v47  ;;  %v5967_v29 = vpop.f32.mrf.mxu0  ;;  %4086 = vmatmul.mubr.bf16.gmra.mxu0 %v6315_v35  ;;  %4306 = vmatprep.subr.bf16.mxu1 %v9481_v38  ;;  %v2495_v60 = vsel %vm2393_vm3, %v2429_v39, 0.0 }
 0x25b   : > { %v2249_v24 = vrot.slane %v1871_v51, 2  ;;  %3822 = vmatprep.mubr.bf16.mxu1 %v8235_v22  ;;  %4095 = vmatprep.mubr.bf16.mxu0 %v9481_v38  ;;  %v8248_v3 = vpop.f32.mrf.mxu1  ;;  %v8277_v29 = vcombine.low %v8193_v10, %v2832_v12 }
 0x25c   : > { %v2430_v16 = vmax.f32 %v2356_v5, 0.0  ;;  %v1875_v8 = vpop.f32.mrf.mxu0  ;;  %3823 = vmatmul.mubr.bf16.gmra.mxu1 %v8241_v37  ;;  %6038 = vmatprep.subr.bf16.mxu0 %v6374_v18 }
 0x25d   : > { %v2315_v47 = vsel %vm2282_vm2, %v2248_v30, %v2249_v24  ;;  %v1876_v56 = vadd.f32 %v1875_v8, %v7979_v34  ;;  %4307 = vmatpush2.bf16.msra.mxu1 %v6354_v42  ;;  %v1700_v14 = vpop.f32.mrf.mxu1  ;;  %v2834_v30 = vld [vmem:[#allocation2 + $0x3c] sm:$0xf]  ;;  %6039 = vmatpush3.bf16.msra.mxu0 %v6374_v18 }
 0x25e   : > { %v5741_v49 = vpack.c.bf16 %v2430_v16, %v2495_v60  ;;  %v2357_v52 = vadd.f32 %v2315_v47, %v7486_v4  ;;  %v5970_v0 = vpop.f32.mrf.mxu0  ;;  %4308 = vmatprep.subr.bf16.mxu1 %v9481_v38  ;;  %v6366_v42 = vld [vmem:[%s9354_s3 + $0x110] ss:$12 sps:$4 sm:$0xff]  }
 0x25f   : > { %v2250_v46 = vrot.slane %v1876_v56, 2  ;;  %v8265_v39 = vpop.f32.mrf.mxu1 }
 0x260   : > { %5825 = vst [vmem:[#allocation2 + $0x48] sm:$0xff] %v5741_v49   ;;  %v1878_v34 = vpop.f32.mrf.mxu0  ;;  %v8263_v19 = vld [vmem:[#allocation2 + $0x40] sm:$0xf]  ;;  %v2431_v5 = vmax.f32 %v2357_v52, 0.0  ;;  %v2836_v49 = vld [vmem:[#allocation2 + $0x44] sm:$0xf] }
 0x261   : > { %v6318_v35 = vld [vmem:[#allocation2 + $0x40] sm:$0xff]   ;;  %v2314_v7 = vsel %vm2282_vm2, %v2249_v24, %v2250_v46  ;;  %v1879_v4 = vadd.f32 %v1878_v34, %v7989_v27  ;;  %v8271_v51 = vcombine.low %v2834_v30, %v8263_v19  ;;  %4309 = vmatpush2.bf16.msra.mxu1 %v6358_v25  ;;  %v1703_v8 = vpop.f32.mrf.mxu1 }
 0x262   : > { %v2358_v48 = vadd.f32 %v2314_v7, %v7497_v63  ;;  %v5971_v16 = vpop.f32.mrf.mxu0  ;;  %4096 = vmatmul.mubr.bf16.gmra.mxu0 %v6318_v35  ;;  %4310 = vmatprep.subr.bf16.mxu1 %v9481_v38  ;;  %v6370_v63 = vld [vmem:[%s9354_s3 + $0xf8] ss:$12 sps:$4 sm:$0xff]   ;;  %v2497_v12 = vsel %vm2404_vm4, %v2431_v5, 0.0  ;;  %v8315_v8 = vcombine.low %v8227_v55, %v2834_v30 }
 0x263   : > { %v2251_v27 = vrot.slane %v1879_v4, 2  ;;  %3832 = vmatprep.mubr.bf16.mxu1 %v8271_v51  ;;  %4105 = vmatprep.mubr.bf16.mxu0 %v9481_v38  ;;  %v8284_v47 = vpop.f32.mrf.mxu1  ;;  %v6385_v16 = vld [vmem:[%s9354_s3 + $0x1d0] ss:$12 sps:$4 sm:$0xff]  }
 0x264   : > { %v2432_v24 = vmax.f32 %v2358_v48, 0.0  ;;  %v1883_v60 = vpop.f32.mrf.mxu0  ;;  %3833 = vmatmul.mubr.bf16.gmra.mxu1 %v8277_v29  ;;  %v6378_v48 = vld [vmem:[%s9354_s3 + $0xe0] ss:$12 sps:$4 sm:$0xff]   ;;  %6040 = vmatprep.subr.bf16.mxu0 %v6385_v16 }
 0x265   : > { %v1884_v10 = vadd.f32 %v1883_v60, %v8006_v31  ;;  %4311 = vmatpush2.bf16.msra.mxu1 %v6366_v42  ;;  %v2313_v25 = vsel %vm2282_vm2, %v2250_v46, %v2251_v27  ;;  %v1708_v52 = vpop.f32.mrf.mxu1  ;;  %6041 = vmatpush3.bf16.msra.mxu0 %v6385_v16 }
 0x266   : > { %v2498_v56 = vsel %vm2393_vm3, %v2432_v24, 0.0  ;;  %v5974_v18 = vpop.f32.mrf.mxu0  ;;  %4312 = vmatprep.subr.bf16.mxu1 %v9481_v38  ;;  %v2359_v42 = vadd.f32 %v2313_v25, %v7513_v62  ;;  %v9518_v24 = vld [vmem:[#allocation38_spill] sm:$0xff] }
 0x267   : > { %v5746_v31 = vpack.c.bf16 %v2498_v56, %v2497_v12  ;;  %v2252_v0 = vrot.slane %v1884_v10, 2  ;;  %v8297_v14 = vld [vmem:[#allocation2 + $0x48] sm:$0xf]  ;;  %v8302_v4 = vpop.f32.mrf.mxu1  ;;  %v6386_v18 = vld [vmem:[%s9354_s3 + $0x1b8] ss:$12 sps:$4 sm:$0xff]  }
 0x268   : > { %v6322_v34 = vld [vmem:[#allocation2 + $0x48] sm:$0xff]   ;;  %v1886_v35 = vpop.f32.mrf.mxu0  ;;  %v8300_v7 = vcombine.low %v2836_v49, %v8297_v14  ;;  %v2433_v55 = vmax.f32 %v2359_v42, 0.0  ;;  %6042 = vmatprep.subr.bf16.mxu0 %v6386_v18 }
 0x269   : > { %5826 = vst [vmem:[#allocation2 + $0x50] sm:$0xff] %v5746_v31   ;;  %v2312_v46 = vsel %vm2282_vm2, %v2251_v27, %v2252_v0  ;;  %v1887_v5 = vadd.f32 %v1886_v35, %v8022_v23  ;;  %4313 = vmatpush2.bf16.msra.mxu1 %v6370_v63  ;;  %v1711_v27 = vpop.f32.mrf.mxu1  ;;  %v6383_v25 = vld [vmem:[%s9354_s3 + $0xc8] ss:$12 sps:$4 sm:$0xff]   ;;  %v2838_v42 = vld [vmem:[#allocation2 + $0x4c] sm:$0xf]  ;;  %6043 = vmatpush3.bf16.msra.mxu0 %v6386_v18 }
 0x26a   : > { %v2360_v60 = vadd.f32 %v2312_v46, %v9518_v24  ;;  %v5975_v62 = vpop.f32.mrf.mxu0  ;;  %3842 = vmatprep.mubr.bf16.mxu1 %v8300_v7  ;;  %4106 = vmatmul.mubr.bf16.gmra.mxu0 %v6322_v34  ;;  %v6388_v27 = vld [vmem:[%s9354_s3 + $0x1a0] ss:$12 sps:$4 sm:$0xff]   ;;  %v6389_v18 = vld [vmem:[%s9354_s3 + $0x188] ss:$12 sps:$4 sm:$0xff]  }
 0x26b   : > { %v2253_v23 = vrot.slane %v1887_v5, 2  ;;  %4115 = vmatprep.mubr.bf16.mxu0 %v9481_v38  ;;  %4314 = vmatprep.subr.bf16.mxu1 %v9481_v38  ;;  %v8322_v12 = vpop.f32.mrf.mxu1 }
 0x26c   : > { %v2434_v10 = vmax.f32 %v2360_v60, 0.0  ;;  %v1891_v63 = vpop.f32.mrf.mxu0  ;;  %3843 = vmatmul.mubr.bf16.gmra.mxu1 %v8315_v8  ;;  %6044 = vmatprep.subr.bf16.mxu0 %v6388_v27 }
 0x26d   : > { %v2311_v30 = vsel %vm2282_vm2, %v2252_v0, %v2253_v23  ;;  %v1892_v56 = vadd.f32 %v1891_v63, %v8033_v9  ;;  %4315 = vmatpush2.bf16.msra.mxu1 %v6378_v48  ;;  %v1716_v35 = vpop.f32.mrf.mxu1  ;;  %6045 = vmatpush3.bf16.msra.mxu0 %v6388_v27 }
 0x26e   : > { %v2500_v52 = vsel %vm2404_vm4, %v2434_v10, 0.0  ;;  %v2361_v31 = vadd.f32 %v2311_v30, %v7552_v50  ;;  %v5978_v34 = vpop.f32.mrf.mxu0  ;;  %4316 = vmatprep.subr.bf16.mxu1 %v9481_v38  ;;  %v8353_v10 = vcombine.low %v8263_v19, %v2836_v49  ;;  %6046 = vmatprep.subr.bf16.mxu0 %v6389_v18 }
 0x26f   : > { %v5751_v9 = vpack.c.bf16 %v2500_v52, %v2433_v55  ;;  %v2254_v0 = vrot.slane %v1892_v56, 2  ;;  %v8341_v16 = vpop.f32.mrf.mxu1 }
 0x270   : > { %v1894_v46 = vpop.f32.mrf.mxu0  ;;  %v8337_v5 = vld [vmem:[#allocation2 + $0x50] sm:$0xf]  ;;  %v2435_v24 = vmax.f32 %v2361_v31, 0.0  ;;  %9519 = vst [vmem:[#allocation15_spill] sm:$0xff] %v8353_v10  ;;  %v9520_v31 = vld [vmem:[#allocation39_spill] sm:$0xff] }
 0x271   : > { %v8339_v48 = vld [vmem:[#allocation2 + $0x50] sm:$0xff]   ;;  %5827 = vst [vmem:[#allocation2 + $0x58] sm:$0xff] %v5751_v9   ;;  %v2310_v50 = vsel %vm2282_vm2, %v2253_v23, %v2254_v0  ;;  %v1895_v60 = vadd.f32 %v1894_v46, %v8045_v13  ;;  %v8347_v62 = vcombine.low %v2838_v42, %v8337_v5  ;;  %4317 = vmatpush2.bf16.msra.mxu1 %v6383_v25  ;;  %v1719_v23 = vpop.f32.mrf.mxu1 }
 0x272   : > { %v2362_v63 = vadd.f32 %v2310_v50, %v7563_v59  ;;  %v5979_v55 = vpop.f32.mrf.mxu0  ;;  %4116 = vmatmul.mubr.bf16.gmra.mxu0 %v8339_v48  ;;  %v2501_v19 = vsel %vm2393_vm3, %v2435_v24, 0.0  ;;  %v2840_v50 = vld [vmem:[#allocation2 + $0x54] sm:$0xf] }
 0x273   : > { %v2255_v30 = vrot.slane %v1895_v60, 2  ;;  %3852 = vmatprep.mubr.bf16.mxu1 %v8347_v62  ;;  %4125 = vmatprep.mubr.bf16.mxu0 %v9481_v38  ;;  %v8360_v25 = vpop.f32.mrf.mxu1 }
 0x274   : > { %v2436_v13 = vmax.f32 %v2362_v63, 0.0  ;;  %v1899_v56 = vpop.f32.mrf.mxu0  ;;  %3853 = vmatmul.mubr.bf16.gmra.mxu1 %v8353_v10  ;;  %6047 = vmatpush3.bf16.msra.mxu0 %v6389_v18 }
 0x275   : > { %v2309_v59 = vsel %vm2282_vm2, %v2254_v0, %v2255_v30  ;;  %v1900_v49 = vadd.f32 %v1899_v56, %v8050_v17  ;;  %v1724_v9 = vpop.f32.mrf.mxu1  ;;  %v9523_v56 = vld [vmem:[#allocation40_spill] sm:$0xff] }
 0x276   : > { %v5756_v52 = vpack.c.bf16 %v2436_v13, %v2501_v19  ;;  %v2363_v34 = vadd.f32 %v2309_v59, %v9520_v31  ;;  %v5982_v35 = vpop.f32.mrf.mxu0  ;;  %v8384_v13 = vcombine.low %v8297_v14, %v2838_v42 }
 0x277   : > { %v2256_v46 = vrot.slane %v1900_v49, 2  ;;  %v8375_v17 = vpop.f32.mrf.mxu1 }
 0x278   : > { %5828 = vst [vmem:[#allocation2 + $0x60] sm:$0xff] %v5756_v52   ;;  %v1902_v24 = vpop.f32.mrf.mxu0  ;;  %v8371_v60 = vld [vmem:[#allocation2 + $0x58] sm:$0xf]  ;;  %v2437_v23 = vmax.f32 %v2363_v34, 0.0  ;;  %9522 = vst [vmem:[#allocation28_spill] sm:$0xff] %v8384_v13 }
 0x279   : > { %v8373_v0 = vld [vmem:[#allocation2 + $0x58] sm:$0xff]   ;;  %v2308_v27 = vsel %vm2282_vm2, %v2255_v30, %v2256_v46  ;;  %v1903_v63 = vadd.f32 %v1902_v24, %v8060_v11  ;;  %v8381_v55 = vcombine.low %v2840_v50, %v8371_v60  ;;  %v1727_v49 = vpop.f32.mrf.mxu1 }
 0x27a   : > { %v2364_v19 = vadd.f32 %v2308_v27, %v9523_v56  ;;  %v5983_v59 = vpop.f32.mrf.mxu0  ;;  %4126 = vmatmul.mubr.bf16.gmra.mxu0 %v8373_v0  ;;  %v2503_v42 = vsel %vm2404_vm4, %v2437_v23, 0.0  ;;  %v2842_v9 = vld [vmem:[#allocation2 + $0x5c] sm:$0xf] }
 0x27b   : > { %9521 = vst [vmem:[#allocation17_spill] sm:$0xff] %v8381_v55  ;;  %v2257_v52 = vrot.slane %v1903_v63, 2  ;;  %3862 = vmatprep.mubr.bf16.mxu1 %v8381_v55  ;;  %4135 = vmatprep.mubr.bf16.mxu0 %v9481_v38  ;;  %v8391_v18 = vpop.f32.mrf.mxu1  ;;  %v9525_v49 = vld [vmem:[#allocation3_spill] sm:$0xff] }
 0x27c   : > { %v2438_v11 = vmax.f32 %v2364_v19, 0.0  ;;  %v1907_v30 = vpop.f32.mrf.mxu0  ;;  %3863 = vmatmul.mubr.bf16.gmra.mxu1 %v8384_v13 }
 0x27d   : > { %v1908_v14 = vadd.f32 %v1907_v30, %v8073_v54  ;;  %v2307_v34 = vsel %vm2282_vm2, %v2256_v46, %v2257_v52  ;;  %v1732_v24 = vpop.f32.mrf.mxu1 }
 0x27e   : > { %v2504_v31 = vsel %vm2393_vm3, %v2438_v11, 0.0  ;;  %v5986_v35 = vpop.f32.mrf.mxu0  ;;  %v2365_v11 = vadd.f32 %v2307_v34, %v9525_v49  ;;  %v9528_v49 = vld [vmem:[#allocation4_spill] sm:$0xff] }
 0x27f   : > { %v5761_v27 = vpack.c.bf16 %v2504_v31, %v2503_v42  ;;  %v2258_v63 = vrot.slane %v1908_v14, 2  ;;  %v8400_v56 = vld [vmem:[#allocation2 + $0x60] sm:$0xf]  ;;  %v8407_v23 = vpop.f32.mrf.mxu1  ;;  %v8414_v14 = vcombine.low %v8337_v5, %v2840_v50 }
 0x280   : > { %v8402_v19 = vld [vmem:[#allocation2 + $0x60] sm:$0xff]   ;;  %v1910_v59 = vpop.f32.mrf.mxu0  ;;  %v8405_v54 = vcombine.low %v2842_v9, %v8400_v56 }
 0x281   : > { %5829 = vst [vmem:[#allocation2 + $0x68] sm:$0xff] %v5761_v27   ;;  %v2306_v46 = vsel %vm2282_vm2, %v2257_v52, %v2258_v63  ;;  %v1911_v30 = vadd.f32 %v1910_v59, %v8091_v61  ;;  %9526 = vst [vmem:[#allocation25_spill] sm:$0xff] %v8414_v14  ;;  %v9527_v42 = vld [vmem:[#allocation12_spill] sm:$0xff]  ;;  %v1735_v24 = vpop.f32.mrf.mxu1  ;;  %v2439_v61 = vmax.f32 %v2365_v11, 0.0 }
 0x282   : > { %9524 = vst [vmem:[#allocation26_spill] sm:$0xff] %v8405_v54  ;;  %v2366_v31 = vadd.f32 %v2306_v46, %v9527_v42  ;;  %v5987_v35 = vpop.f32.mrf.mxu0  ;;  %3872 = vmatprep.mubr.bf16.mxu1 %v8405_v54  ;;  %4136 = vmatmul.mubr.bf16.gmra.mxu0 %v8402_v19  ;;  %v2844_v24 = vld [vmem:[#allocation2 + $0x64] sm:$0xf] }
 0x283   : > { %v2259_v13 = vrot.slane %v1911_v30, 2  ;;  %4145 = vmatprep.mubr.bf16.mxu0 %v9481_v38  ;;  %v8421_v52 = vpop.f32.mrf.mxu1 }
 0x284   : > { %v2440_v34 = vmax.f32 %v2366_v31, 0.0  ;;  %v1915_v27 = vpop.f32.mrf.mxu0  ;;  %3873 = vmatmul.mubr.bf16.gmra.mxu1 %v8414_v14 }
 0x285   : > { %v2305_v5 = vsel %vm2282_vm2, %v2258_v63, %v2259_v13  ;;  %v1916_v50 = vadd.f32 %v1915_v27, %v8111_v45  ;;  %v1740_v42 = vpop.f32.mrf.mxu1 }
 0x286   : > { %v2506_v59 = vsel %vm2404_vm4, %v2440_v34, 0.0  ;;  %v2367_v46 = vadd.f32 %v2305_v5, %v9528_v49  ;;  %v5990_v30 = vpop.f32.mrf.mxu0  ;;  %v9531_v5 = vld [vmem:[#allocation14_spill] sm:$0xff] }
 0x287   : > { %v5766_v35 = vpack.c.bf16 %v2506_v59, %v2439_v61  ;;  %v2260_v31 = vrot.slane %v1916_v50, 2  ;;  %v8433_v11 = vpop.f32.mrf.mxu1  ;;  %v8442_v61 = vcombine.low %v8371_v60, %v2842_v9 }
 0x288   : > { %v1918_v54 = vpop.f32.mrf.mxu0  ;;  %v8429_v14 = vld [vmem:[#allocation2 + $0x68] sm:$0xf]  ;;  %v2441_v63 = vmax.f32 %v2367_v46, 0.0 }
 0x289   : > { %v8431_v55 = vld [vmem:[#allocation2 + $0x68] sm:$0xff]   ;;  %5830 = vst [vmem:[#allocation2 + $0x70] sm:$0xff] %v5766_v35   ;;  %v2304_v45 = vsel %vm2282_vm2, %v2259_v13, %v2260_v31  ;;  %v1919_v34 = vadd.f32 %v1918_v54, %v8125_v1  ;;  %v8439_v27 = vcombine.low %v2844_v24, %v8429_v14  ;;  %9530 = vst [vmem:[#allocation19_spill] sm:$0xff] %v8442_v61  ;;  %v1743_v49 = vpop.f32.mrf.mxu1 }
 0x28a   : > { %v2368_v50 = vadd.f32 %v2304_v45, %v9531_v5  ;;  %v5991_v59 = vpop.f32.mrf.mxu0  ;;  %4146 = vmatmul.mubr.bf16.gmra.mxu0 %v8431_v55  ;;  %v2507_v60 = vsel %vm2393_vm3, %v2441_v63, 0.0  ;;  %v9532_v35 = vld [vmem:[#allocation5_spill] sm:$0xff] }
 0x28b   : > { %9529 = vst [vmem:[#allocation30_spill] sm:$0xff] %v8439_v27  ;;  %v2261_v30 = vrot.slane %v1919_v34, 2  ;;  %3882 = vmatprep.mubr.bf16.mxu1 %v8439_v27  ;;  %4155 = vmatprep.mubr.bf16.mxu0 %v9481_v38  ;;  %v1746_v1 = vpop.f32.mrf.mxu1  ;;  %v2846_v49 = vld [vmem:[#allocation2 + $0x6c] sm:$0xf] }
 0x28c   : > { %v2442_v13 = vmax.f32 %v2368_v50, 0.0  ;;  %v1923_v46 = vpop.f32.mrf.mxu0  ;;  %3883 = vmatmul.mubr.bf16.gmra.mxu1 %v8442_v61 }
 0x28d   : > { %v2303_v9 = vsel %vm2282_vm2, %v2260_v31, %v2261_v30  ;;  %v1924_v54 = vadd.f32 %v1923_v46, %v8144_v43  ;;  %v1748_v5 = vpop.f32.mrf.mxu1  ;;  %v9533_v46 = vld [vmem:[#allocation16_spill] sm:$0xff] }
 0x28e   : > { %v5771_v42 = vpack.c.bf16 %v2442_v13, %v2507_v60  ;;  %v2369_v45 = vadd.f32 %v2303_v9, %v9532_v35  ;;  %v5994_v34 = vpop.f32.mrf.mxu0  ;;  %v8463_v13 = vcombine.low %v8400_v56, %v2844_v24 }
 0x28f   : > { %v2262_v59 = vrot.slane %v1924_v54, 2  ;;  %v1749_v1 = vpop.f32.mrf.mxu1 }
 0x290   : > { %5831 = vst [vmem:[#allocation2 + $0x78] sm:$0xff] %v5771_v42   ;;  %v1926_v50 = vpop.f32.mrf.mxu0  ;;  %v2847_v27 = vld [vmem:[#allocation2 + $0x70] sm:$0xf]  ;;  %v2443_v43 = vmax.f32 %v2369_v45, 0.0  ;;  %v2848_v5 = vld [vmem:[#allocation2 + $0x74] sm:$0xf] }
 0x291   : > { %v8455_v61 = vld [vmem:[#allocation2 + $0x70] sm:$0xff]   ;;  %v2302_v63 = vsel %vm2282_vm2, %v2261_v30, %v2262_v59  ;;  %v1927_v31 = vadd.f32 %v1926_v50, %v8158_v57  ;;  %v8460_v10 = vcombine.low %v2846_v49, %v2847_v27  ;;  %v1751_v54 = vpop.f32.mrf.mxu1 }
 0x292   : > { %v2370_v60 = vadd.f32 %v2302_v63, %v9533_v46  ;;  %v5995_v9 = vpop.f32.mrf.mxu0  ;;  %4156 = vmatmul.mubr.bf16.gmra.mxu0 %v8455_v61  ;;  %v2509_v56 = vsel %vm2404_vm4, %v2443_v43, 0.0 }
 0x293   : > { %v2263_v42 = vrot.slane %v1927_v31, 2  ;;  %3892 = vmatprep.mubr.bf16.mxu1 %v8460_v10  ;;  %4165 = vmatprep.mubr.bf16.mxu0 %v9481_v38 }
 0x294   : > { %v2444_v30 = vmax.f32 %v2370_v60, 0.0  ;;  %v1931_v35 = vpop.f32.mrf.mxu0  ;;  %3893 = vmatmul.mubr.bf16.gmra.mxu1 %v8463_v13 }
 0x295   : > { %v1932_v57 = vadd.f32 %v1931_v35, %v8180_v20  ;;  %v2301_v45 = vsel %vm2282_vm2, %v2262_v59, %v2263_v42  ;;  %v9534_v20 = vld [vmem:[#allocation6_spill] sm:$0xff]  ;;  %v8486_v59 = vcombine.low %v8429_v14, %v2846_v49 }
 0x296   : > { %v2510_v24 = vsel %vm2393_vm3, %v2444_v30, 0.0  ;;  %v5998_v34 = vpop.f32.mrf.mxu0  ;;  %v2371_v9 = vadd.f32 %v2301_v45, %v9534_v20  ;;  %v9535_v30 = vld [vmem:[#allocation18_spill] sm:$0xff] }
 0x297   : > { %v5776_v50 = vpack.c.bf16 %v2510_v24, %v2509_v56  ;;  %v2264_v1 = vrot.slane %v1932_v57, 2  ;;  %v2849_v63 = vld [vmem:[#allocation2 + $0x78] sm:$0xf] }
 0x298   : > { %v8477_v31 = vld [vmem:[#allocation2 + $0x78] sm:$0xff]   ;;  %v1934_v46 = vpop.f32.mrf.mxu0  ;;  %v8479_v60 = vcombine.low %v2848_v5, %v2849_v63 }
 0x299   : > { %5832 = vst [vmem:[#allocation2 + $0x80] sm:$0xff] %v5776_v50   ;;  %v2300_v43 = vsel %vm2282_vm2, %v2263_v42, %v2264_v1  ;;  %v1935_v54 = vadd.f32 %v1934_v46, %v8198_v6  ;;  %v2445_v42 = vmax.f32 %v2371_v9, 0.0  ;;  %v9536_v34 = vld [vmem:[#allocation7_spill] sm:$0xff] }
 0x29a   : > { %v2372_v35 = vadd.f32 %v2300_v43, %v9535_v30  ;;  %v5999_v57 = vpop.f32.mrf.mxu0  ;;  %3902 = vmatprep.mubr.bf16.mxu1 %v8479_v60  ;;  %4166 = vmatmul.mubr.bf16.gmra.mxu0 %v8477_v31 }
 0x29b   : > { %v2265_v56 = vrot.slane %v1935_v54, 2  ;;  %4175 = vmatprep.mubr.bf16.mxu0 %v9481_v38  ;;  %v2850_v54 = vld [vmem:[#allocation2 + $0x7c] sm:$0xf] }
 0x29c   : > { %v2446_v24 = vmax.f32 %v2372_v35, 0.0  ;;  %v1939_v45 = vpop.f32.mrf.mxu0  ;;  %3903 = vmatmul.mubr.bf16.gmra.mxu1 %v8486_v59 }
 0x29d   : > { %v2299_v6 = vsel %vm2282_vm2, %v2264_v1, %v2265_v56  ;;  %v1940_v14 = vadd.f32 %v1939_v45, %v8215_v15 }
 0x29e   : > { %v2512_v49 = vsel %vm2404_vm4, %v2446_v24, 0.0  ;;  %v2373_v50 = vadd.f32 %v2299_v6, %v9536_v34  ;;  %v6002_v46 = vpop.f32.mrf.mxu0  ;;  %v8506_v24 = vcombine.low %v2847_v27, %v2848_v5  ;;  %v9539_v6 = vld [vmem:[#allocation20_spill] sm:$0xff] }
 0x29f   : > { %v5781_v20 = vpack.c.bf16 %v2512_v49, %v2445_v42  ;;  %v2266_v43 = vrot.slane %v1940_v14, 2  ;;  %v9540_v46 = vld [vmem:[#allocation8_spill] sm:$0xff] }
 0x2a0   : > { %v1942_v30 = vpop.f32.mrf.mxu0  ;;  %v2851_v35 = vld [vmem:[#allocation2 + $0x80] sm:$0xf]  ;;  %v2447_v9 = vmax.f32 %v2373_v50, 0.0  ;;  %9538 = vst [vmem:[#allocation27_spill] sm:$0xff] %v8506_v24 }
 0x2a1   : > { %v8499_v57 = vld [vmem:[#allocation2 + $0x80] sm:$0xff]   ;;  %5833 = vst [vmem:[#allocation2 + $0x88] sm:$0xff] %v5781_v20   ;;  %v2298_v1 = vsel %vm2282_vm2, %v2265_v56, %v2266_v43  ;;  %v1943_v15 = vadd.f32 %v1942_v30, %v8229_v44  ;;  %v8504_v45 = vcombine.low %v2850_v54, %v2851_v35 }
 0x2a2   : > { %v2374_v34 = vadd.f32 %v2298_v1, %v9539_v6  ;;  %v6003_v42 = vpop.f32.mrf.mxu0  ;;  %4176 = vmatmul.mubr.bf16.gmra.mxu0 %v8499_v57  ;;  %v2513_v44 = vsel %vm2393_vm3, %v2447_v9, 0.0 }
 0x2a3   : > { %9537 = vst [vmem:[#allocation32_spill] sm:$0xff] %v8504_v45  ;;  %v2267_v14 = vrot.slane %v1943_v15, 2  ;;  %3912 = vmatprep.mubr.bf16.mxu1 %v8504_v45  ;;  %4185 = vmatprep.mubr.bf16.mxu0 %v9481_v38  ;;  %v2852_v15 = vld [vmem:[#allocation2 + $0x84] sm:$0xf] }
 0x2a4   : > { %v2448_v49 = vmax.f32 %v2374_v34, 0.0  ;;  %v1947_v50 = vpop.f32.mrf.mxu0  ;;  %3913 = vmatmul.mubr.bf16.gmra.mxu1 %v8506_v24 }
 0x2a5   : > { %v2297_v27 = vsel %vm2282_vm2, %v2266_v43, %v2267_v14  ;;  %v1948_v5 = vadd.f32 %v1947_v50, %v8248_v3  ;;  %v8526_v3 = vcombine.low %v2849_v63, %v2850_v54 }
 0x2a6   : > { %v5786_v56 = vpack.c.bf16 %v2448_v49, %v2513_v44  ;;  %v2375_v20 = vadd.f32 %v2297_v27, %v9540_v46  ;;  %v6006_v30 = vpop.f32.mrf.mxu0  ;;  %v9541_v49 = vld [vmem:[#allocation21_spill] sm:$0xff] }
 0x2a7   : > { %v2268_v1 = vrot.slane %v1948_v5, 2 }
 0x2a8   : > { %5834 = vst [vmem:[#allocation2 + $0x90] sm:$0xff] %v5786_v56   ;;  %v1950_v6 = vpop.f32.mrf.mxu0  ;;  %v2853_v34 = vld [vmem:[#allocation2 + $0x88] sm:$0xf]  ;;  %v2449_v43 = vmax.f32 %v2375_v20, 0.0  ;;  %v2854_v46 = vld [vmem:[#allocation2 + $0x8c] sm:$0xf] }
 0x2a9   : > { %v8519_v42 = vld [vmem:[#allocation2 + $0x88] sm:$0xff]   ;;  %v2296_v24 = vsel %vm2282_vm2, %v2267_v14, %v2268_v1  ;;  %v1951_v9 = vadd.f32 %v1950_v6, %v8265_v39  ;;  %v8524_v45 = vcombine.low %v2852_v15, %v2853_v34 }
 0x2aa   : > { %v2376_v50 = vadd.f32 %v2296_v24, %v9541_v49  ;;  %v6007_v44 = vpop.f32.mrf.mxu0  ;;  %4186 = vmatmul.mubr.bf16.gmra.mxu0 %v8519_v42  ;;  %v2515_v63 = vsel %vm2404_vm4, %v2449_v43, 0.0 }
 0x2ab   : > { %v2269_v27 = vrot.slane %v1951_v9, 2  ;;  %3922 = vmatprep.mubr.bf16.mxu1 %v8524_v45  ;;  %4195 = vmatprep.mubr.bf16.mxu0 %v9481_v38 }
 0x2ac   : > { %v2450_v5 = vmax.f32 %v2376_v50, 0.0  ;;  %v1955_v56 = vpop.f32.mrf.mxu0  ;;  %3923 = vmatmul.mubr.bf16.gmra.mxu1 %v8526_v3 }
 0x2ad   : > { %v1956_v39 = vadd.f32 %v1955_v56, %v8284_v47  ;;  %v2295_v24 = vsel %vm2282_vm2, %v2268_v1, %v2269_v27  ;;  %v9543_v47 = vld [vmem:[#allocation9_spill] sm:$0xff]  ;;  %v8548_v56 = vcombine.low %v2851_v35, %v2852_v15  ;;  %v9544_v1 = vld [vmem:[#allocation22_spill] sm:$0xff] }
 0x2ae   : > { %v2516_v54 = vsel %vm2393_vm3, %v2450_v5, 0.0  ;;  %v6010_v14 = vpop.f32.mrf.mxu0  ;;  %v2377_v44 = vadd.f32 %v2295_v24, %v9543_v47 }
 0x2af   : > { %v5791_v20 = vpack.c.bf16 %v2516_v54, %v2515_v63  ;;  %v2270_v30 = vrot.slane %v1956_v39, 2  ;;  %v2855_v6 = vld [vmem:[#allocation2 + $0x90] sm:$0xf] }
 0x2b0   : > { %v8540_v9 = vld [vmem:[#allocation2 + $0x90] sm:$0xff]   ;;  %v1958_v49 = vpop.f32.mrf.mxu0  ;;  %v8542_v50 = vcombine.low %v2854_v46, %v2855_v6  ;;  %v2451_v24 = vmax.f32 %v2377_v44, 0.0 }
 0x2b1   : > { %5835 = vst [vmem:[#allocation2 + $0x98] sm:$0xff] %v5791_v20   ;;  %v2294_v43 = vsel %vm2282_vm2, %v2269_v27, %v2270_v30  ;;  %v1959_v5 = vadd.f32 %v1958_v49, %v8302_v4  ;;  %v9545_v27 = vld [vmem:[#allocation10_spill] sm:$0xff] }
 0x2b2   : > { %9542 = vst [vmem:[#allocation34_spill] sm:$0xff] %v8542_v50  ;;  %v2378_v14 = vadd.f32 %v2294_v43, %v9544_v1  ;;  %v6011_v63 = vpop.f32.mrf.mxu0  ;;  %3932 = vmatprep.mubr.bf16.mxu1 %v8542_v50  ;;  %4196 = vmatmul.mubr.bf16.gmra.mxu0 %v8540_v9  ;;  %v2856_v1 = vld [vmem:[#allocation2 + $0x94] sm:$0xf] }
 0x2b3   : > { %v2271_v39 = vrot.slane %v1959_v5, 2  ;;  %4205 = vmatprep.mubr.bf16.mxu0 %v9481_v38 }
 0x2b4   : > { %v2452_v54 = vmax.f32 %v2378_v14, 0.0  ;;  %v1963_v20 = vpop.f32.mrf.mxu0  ;;  %3933 = vmatmul.mubr.bf16.gmra.mxu1 %v8548_v56 }
 0x2b5   : > { %v2293_v4 = vsel %vm2282_vm2, %v2270_v30, %v2271_v39  ;;  %v1964_v35 = vadd.f32 %v1963_v20, %v8322_v12 }
 0x2b6   : > { %v2518_v15 = vsel %vm2404_vm4, %v2452_v54, 0.0  ;;  %v2379_v49 = vadd.f32 %v2293_v4, %v9545_v27  ;;  %v6014_v47 = vpop.f32.mrf.mxu0  ;;  %v8568_v54 = vcombine.low %v2853_v34, %v2854_v46  ;;  %v9548_v4 = vld [vmem:[#allocation23_spill] sm:$0xff] }
 0x2b7   : > { %v5796_v43 = vpack.c.bf16 %v2518_v15, %v2451_v24  ;;  %v2272_v5 = vrot.slane %v1964_v35, 2  ;;  %v9549_v47 = vld [vmem:[#allocation11_spill] sm:$0xff] }
 0x2b8   : > { %v1966_v63 = vpop.f32.mrf.mxu0  ;;  %v2857_v14 = vld [vmem:[#allocation2 + $0x98] sm:$0xf]  ;;  %v2453_v44 = vmax.f32 %v2379_v49, 0.0  ;;  %9547 = vst [vmem:[#allocation31_spill] sm:$0xff] %v8568_v54 }
 0x2b9   : > { %v8561_v50 = vld [vmem:[#allocation2 + $0x98] sm:$0xff]   ;;  %5836 = vst [vmem:[#allocation2 + $0xa0] sm:$0xff] %v5796_v43   ;;  %v2292_v30 = vsel %vm2282_vm2, %v2271_v39, %v2272_v5  ;;  %v1967_v12 = vadd.f32 %v1966_v63, %v8341_v16  ;;  %v8566_v20 = vcombine.low %v2856_v1, %v2857_v14 }
 0x2ba   : > { %v2380_v27 = vadd.f32 %v2292_v30, %v9548_v4  ;;  %v6015_v24 = vpop.f32.mrf.mxu0  ;;  %4206 = vmatmul.mubr.bf16.gmra.mxu0 %v8561_v50  ;;  %v2519_v16 = vsel %vm2393_vm3, %v2453_v44, 0.0 }
 0x2bb   : > { %9546 = vst [vmem:[#allocation29_spill] sm:$0xff] %v8566_v20  ;;  %v2273_v35 = vrot.slane %v1967_v12, 2  ;;  %3942 = vmatprep.mubr.bf16.mxu1 %v8566_v20  ;;  %4215 = vmatprep.mubr.bf16.mxu0 %v9481_v38  ;;  %v2858_v12 = vld [vmem:[#allocation2 + $0x9c] sm:$0xf] }
 0x2bc   : > { %v2454_v15 = vmax.f32 %v2380_v27, 0.0  ;;  %v1971_v49 = vpop.f32.mrf.mxu0  ;;  %3943 = vmatmul.mubr.bf16.gmra.mxu1 %v8568_v54 }
 0x2bd   : > { %v2291_v34 = vsel %vm2282_vm2, %v2272_v5, %v2273_v35  ;;  %v1972_v46 = vadd.f32 %v1971_v49, %v8360_v25  ;;  %v8588_v25 = vcombine.low %v2855_v6, %v2856_v1 }
 0x2be   : > { %v5801_v39 = vpack.c.bf16 %v2454_v15, %v2519_v16  ;;  %v2381_v43 = vadd.f32 %v2291_v34, %v9549_v47  ;;  %v6018_v63 = vpop.f32.mrf.mxu0  ;;  %v9550_v15 = vld [vmem:[#allocation24_spill] sm:$0xff] }
 0x2bf   : > { %v2274_v30 = vrot.slane %v1972_v46, 2 }
 0x2c0   : > { %5837 = vst [vmem:[#allocation2 + $0xa8] sm:$0xff] %v5801_v39   ;;  %v1974_v4 = vpop.f32.mrf.mxu0  ;;  %v2859_v27 = vld [vmem:[#allocation2 + $0xa0] sm:$0xf]  ;;  %v2455_v5 = vmax.f32 %v2381_v43, 0.0  ;;  %v2860_v47 = vld [vmem:[#allocation2 + $0xa4] sm:$0xf] }
 0x2c1   : > { %v8581_v24 = vld [vmem:[#allocation2 + $0xa0] sm:$0xff]   ;;  %v2290_v54 = vsel %vm2282_vm2, %v2273_v35, %v2274_v30  ;;  %v1975_v44 = vadd.f32 %v1974_v4, %v8375_v17  ;;  %v8586_v20 = vcombine.low %v2858_v12, %v2859_v27 }
 0x2c2   : > { %v2382_v49 = vadd.f32 %v2290_v54, %v9550_v15  ;;  %v6019_v16 = vpop.f32.mrf.mxu0  ;;  %4216 = vmatmul.mubr.bf16.gmra.mxu0 %v8581_v24  ;;  %v2521_v6 = vsel %vm2404_vm4, %v2455_v5, 0.0 }
 0x2c3   : > { %v2275_v34 = vrot.slane %v1975_v44, 2  ;;  %3952 = vmatprep.mubr.bf16.mxu1 %v8586_v20  ;;  %4225 = vmatprep.mubr.bf16.mxu0 %v9481_v38 }
 0x2c4   : > { %v2456_v46 = vmax.f32 %v2382_v49, 0.0  ;;  %v1979_v39 = vpop.f32.mrf.mxu0  ;;  %3953 = vmatmul.mubr.bf16.gmra.mxu1 %v8588_v25 }
 0x2c5   : > { %v1980_v17 = vadd.f32 %v1979_v39, %v8391_v18  ;;  %v2289_v54 = vsel %vm2282_vm2, %v2274_v30, %v2275_v34  ;;  %v9552_v18 = vld [vmem:[#allocation13_spill] sm:$0xff]  ;;  %v8610_v39 = vcombine.low %v2857_v14, %v2858_v12 }
 0x2c6   : > { %v2522_v1 = vsel %vm2393_vm3, %v2456_v46, 0.0  ;;  %v6022_v35 = vpop.f32.mrf.mxu0  ;;  %v2383_v16 = vadd.f32 %v2289_v54, %v9552_v18  ;;  %v9553_v30 = vld [vmem:[#allocation41_spill] sm:$0xff] }
 0x2c7   : > { %v5806_v43 = vpack.c.bf16 %v2522_v1, %v2521_v6  ;;  %v2276_v63 = vrot.slane %v1980_v17, 2  ;;  %v2861_v4 = vld [vmem:[#allocation2 + $0xa8] sm:$0xf] }
 0x2c8   : > { %v8602_v44 = vld [vmem:[#allocation2 + $0xa8] sm:$0xff]   ;;  %v1982_v15 = vpop.f32.mrf.mxu0  ;;  %v8604_v49 = vcombine.low %v2860_v47, %v2861_v4  ;;  %v2457_v54 = vmax.f32 %v2383_v16, 0.0 }
 0x2c9   : > { %5838 = vst [vmem:[#allocation2 + $0xb0] sm:$0xff] %v5806_v43   ;;  %v2288_v5 = vsel %vm2282_vm2, %v2275_v34, %v2276_v63  ;;  %v1983_v46 = vadd.f32 %v1982_v15, %v8407_v23  ;;  %v9554_v34 = vld [vmem:[#allocation42_spill] sm:$0xff] }
 0x2ca   : > { %9551 = vst [vmem:[#allocation33_spill] sm:$0xff] %v8604_v49  ;;  %v2384_v35 = vadd.f32 %v2288_v5, %v9553_v30  ;;  %v6023_v6 = vpop.f32.mrf.mxu0  ;;  %3962 = vmatprep.mubr.bf16.mxu1 %v8604_v49  ;;  %4226 = vmatmul.mubr.bf16.gmra.mxu0 %v8602_v44  ;;  %v2862_v30 = vld [vmem:[#allocation2 + $0xac] sm:$0xf] }
 0x2cb   : > { %v2277_v17 = vrot.slane %v1983_v46, 2  ;;  %4235 = vmatprep.mubr.bf16.mxu0 %v9481_v38 }
 0x2cc   : > { %v2458_v1 = vmax.f32 %v2384_v35, 0.0  ;;  %v1987_v43 = vpop.f32.mrf.mxu0  ;;  %3963 = vmatmul.mubr.bf16.gmra.mxu1 %v8610_v39 }
 0x2cd   : > { %v2287_v23 = vsel %vm2282_vm2, %v2276_v63, %v2277_v17  ;;  %v1988_v14 = vadd.f32 %v1987_v43, %v8421_v52 }
 0x2ce   : > { %v2524_v12 = vsel %vm2404_vm4, %v2458_v1, 0.0  ;;  %v2385_v15 = vadd.f32 %v2287_v23, %v9554_v34  ;;  %v6026_v18 = vpop.f32.mrf.mxu0  ;;  %v8630_v1 = vcombine.low %v2859_v27, %v2860_v47  ;;  %v9556_v23 = vld [vmem:[#allocation43_spill] sm:$0xff] }
 0x2cf   : > { %v5811_v5 = vpack.c.bf16 %v2524_v12, %v2457_v54  ;;  %v2278_v46 = vrot.slane %v1988_v14, 2 }
 0x2d0   : > { %v1990_v6 = vpop.f32.mrf.mxu0  ;;  %v2863_v35 = vld [vmem:[#allocation2 + $0xb0] sm:$0xf]  ;;  %v2459_v16 = vmax.f32 %v2385_v15, 0.0  ;;  %9555 = vst [vmem:[#allocation35_spill] sm:$0xff] %v8630_v1  ;;  %v9557_v15 = vld [vmem:[#allocation44_spill] sm:$0xff] }
 0x2d1   : > { %v8623_v49 = vld [vmem:[#allocation2 + $0xb0] sm:$0xff]   ;;  %5839 = vst [vmem:[#allocation2 + $0xb8] sm:$0xff] %v5811_v5   ;;  %v2286_v63 = vsel %vm2282_vm2, %v2277_v17, %v2278_v46  ;;  %v1991_v52 = vadd.f32 %v1990_v6, %v8433_v11  ;;  %v8628_v43 = vcombine.low %v2862_v30, %v2863_v35 }
 0x2d2   : > { %v2386_v34 = vadd.f32 %v2286_v63, %v9556_v23  ;;  %v6027_v54 = vpop.f32.mrf.mxu0  ;;  %4236 = vmatmul.mubr.bf16.gmra.mxu0 %v8623_v49  ;;  %v2525_v11 = vsel %vm2393_vm3, %v2459_v16, 0.0  ;;  %v2864_v6 = vld [vmem:[#allocation2 + $0xb4] sm:$0xf]  ;;  %v8648_v16 = vcombine.low %v2861_v4, %v2862_v30 }
 0x2d3   : > { %v2279_v14 = vrot.slane %v1991_v52, 2  ;;  %3972 = vmatprep.mubr.bf16.mxu1 %v8628_v43  ;;  %4245 = vmatprep.mubr.bf16.mxu0 %v9481_v38  ;;  %v8658_v33 = vcombine.low %v2863_v35, %v2864_v6  ;;  %v8675_v35 = vld [vmem:[#allocation2 + $0xd0] sm:$0xff]  }
 0x2d4   : > { %v2460_v12 = vmax.f32 %v2386_v34, 0.0  ;;  %3973 = vmatmul.mubr.bf16.gmra.mxu1 %v8630_v1  ;;  %v1995_v17 = vpop.f32.mrf.mxu0  ;;  %9559 = vst [vmem:[#allocation37_spill] sm:$0xff] %v8648_v16 }
 0x2d5   : > { %v2285_v27 = vsel %vm2282_vm2, %v2278_v46, %v2279_v14  ;;  %9561 = vst [vmem:[#allocation39_spill] sm:$0xff] %v8658_v33 }
 0x2d6   : > { %v5816_v47 = vpack.c.bf16 %v2460_v12, %v2525_v11  ;;  %v2387_v18 = vadd.f32 %v2285_v27, %v9557_v15  ;;  %v6030_v5 = vpop.f32.mrf.mxu0 }
 0x2d8   : > { %5840 = vst [vmem:[#allocation2 + $0xc0] sm:$0xff] %v5816_v47   ;;  %v2461_v63 = vmax.f32 %v2387_v18, 0.0  ;;  %v2865_v52 = vld [vmem:[#allocation2 + $0xb8] sm:$0xf]  ;;  %v1998_v34 = vpop.f32.mrf.mxu0  ;;  %v2866_v12 = vld [vmem:[#allocation2 + $0xbc] sm:$0xf] }
 0x2d9   : > { %v8642_v23 = vld [vmem:[#allocation2 + $0xb8] sm:$0xff]   ;;  %v8644_v54 = vcombine.low %v2864_v6, %v2865_v52  ;;  %v8669_v15 = vcombine.low %v2865_v52, %v2866_v12  ;;  %v6392_v6 = vld [vmem:[#allocation2] sm:$0xff]  }
 0x2da   : > { %v2527_v17 = vsel %vm2404_vm4, %v2461_v63, 0.0  ;;  %4246 = vmatmul.mubr.bf16.gmra.mxu0 %v8642_v23  ;;  %v6031_v46 = vpop.f32.mrf.mxu0  ;;  %v6391_v18 = vld [vmem:[#allocation2 + $0x18] sm:$0xff]  }
 0x2db   : > { %9558 = vst [vmem:[#allocation36_spill] sm:$0xff] %v8644_v54  ;;  %v5702_v14 = vpack.c.bf16 %v2527_v17, %v2527_v17  ;;  %3982 = vmatprep.mubr.bf16.mxu1 %v8644_v54  ;;  %4255 = vmatprep.mubr.bf16.mxu0 %v9481_v38  ;;  %9563 = vst [vmem:[#allocation3_spill] sm:$0xff] %v8669_v15  ;;  %v6393_v46 = vld [vmem:[#allocation2 + $0x20] sm:$0xff]  }
 0x2dc   : > { %3983 = vmatmul.mubr.bf16.gmra.mxu1 %v8648_v16 }
 0x2dd   : > { %2815 = vst [vmem:[#allocation2 + $0xc8] sm:$0xf] %v5702_v14 }
 0x2df   : > { %v2867_v11 = vld [vmem:[#allocation2 + $0xc0] sm:$0xf] }
 0x2e0   : > { %v8654_v27 = vcombine.low %v2866_v12, %v2867_v11  ;;  %v8656_v47 = vld [vmem:[#allocation2 + $0xc0] sm:$0xff]  }
 0x2e2   : > { %9560 = vst [vmem:[#allocation38_spill] sm:$0xff] %v8654_v27  ;;  %3992 = vmatprep.mubr.bf16.mxu1 %v8654_v27  ;;  %4256 = vmatmul.mubr.bf16.gmra.mxu0 %v8656_v47  ;;  %v6396_v27 = vld [vmem:[#allocation2 + $0x38] sm:$0xff]  }
 0x2e3   : > { %4265 = vmatprep.mubr.bf16.mxu0 %v9481_v38 }
 0x2e4   : > { %3993 = vmatmul.mubr.bf16.gmra.mxu1 %v8658_v33  ;;  %v8664_v4 = vld [vmem:[#allocation2 + $0xc4] sm:$0xff]   ;;  %v6395_v33 = vld [vmem:[#allocation2 + $0x30] sm:$0xff]  }
 0x2e5   : > { %9562 = vst [vmem:[#allocation40_spill] sm:$0xff] %v8664_v4  ;;  %4002 = vmatprep.mubr.bf16.mxu1 %v8664_v4  ;;  %v8667_v30 = vld [vmem:[#allocation2 + $0xc8] sm:$0xff]  }
 0x2ea   : > { %4266 = vmatmul.mubr.bf16.gmra.mxu0 %v8667_v30 }
 0x2eb   : > { %4275 = vmatprep.mubr.bf16.mxu0 %v9481_v38 }
 0x2ec   : > { %4003 = vmatmul.mubr.bf16.gmra.mxu1 %v8669_v15 }
 0x2ed   : > { %4318 = vmatprep.mubr.bf16.mxu1 %v8066_v2  ;;  %v6394_v2 = vld [vmem:[#allocation2 + $0x28] sm:$0xff]  }
 0x2f2   : > { %4276 = vmatmul.mubr.bf16.gmra.mxu0 %v8675_v35 }
 0x2f3   : > { %6048 = vmatprep.mubr.bf16.mxu0 %v6391_v18 }
 0x2f4   : > { %v3774_v5 = vpop.f32.mrf.mxu1  ;;  %4319 = vmatmul.mubr.bf16.vlgmr.msra.gmra.mxu1 %v6392_v6 }
 0x2f5   : > { %4326 = vmatprep.mubr.bf16.mxu1 %v8089_v28 }
 0x2f6   : > { %v3776_v63 = vpop.f32.mrf.mxu1 }
 0x2f8   : > { %v3778_v52 = vpop.f32.mrf.mxu1 }
 0x2f9   : > { %v4047_v34 = vpop.f32.mrf.mxu0 }
 0x2fa   : > { %v3780_v17 = vpop.f32.mrf.mxu1  ;;  %v4048_v38 = vadd.f32 %v4047_v34, %v3774_v5  ;;  %6049 = vmatmul.mubr.bf16.vlgmr.msra.gmra.mxu0 %v6393_v46  ;;  %v8686_v5 = vld [vmem:[%s9355_s4] ss:$0 sm:$0xff] }
 0x2fb   : > { %v4049_v14 = vpop.f32.mrf.mxu0  ;;  %6052 = vmatprep.mubr.bf16.mxu0 %v6394_v2 }
 0x2fc   : > { %v3784_v12 = vpop.f32.mrf.mxu1  ;;  %v8679_v11 = vadd.f32 %v4049_v14, %v3776_v63  ;;  %4327 = vmatmul.mubr.bf16.gmra.mxu1 %v8103_v26  ;;  %v4743_v26 = vadd.f32 %v8686_v5, %v4048_v38 }
 0x2fd   : > { %4334 = vmatprep.mubr.bf16.mxu1 %v8131_v41  ;;  %v4051_v18 = vpop.f32.mrf.mxu0 }
 0x2fe   : > { %9564 = vst [vmem:[#allocation12_spill] sm:$0xff] %v8679_v11  ;;  %v3786_v6 = vpop.f32.mrf.mxu1  ;;  %v4052_v28 = vadd.f32 %v4051_v18, %v3778_v52  ;;  %v9415_v2 = vrot.slane %v8679_v11, 1 }
 0x2ff   : > { %v4053_v15 = vpop.f32.mrf.mxu0 }
 0x300   : > { %v3788_v34 = vpop.f32.mrf.mxu1  ;;  %v4054_v46 = vadd.f32 %v4053_v15, %v3780_v17 }
 0x302   : > { %v4792_v4 = vrot.slane %v4054_v46, 1  ;;  %v3790_v63 = vpop.f32.mrf.mxu1  ;;  %v4057_v14 = vpop.f32.mrf.mxu0  ;;  %6053 = vmatmul.mubr.bf16.gmra.mxu0 %v6395_v33 }
 0x303   : > { %v4058_v41 = vadd.f32 %v4057_v14, %v3784_v12  ;;  %6056 = vmatprep.mubr.bf16.mxu0 %v6396_v27  ;;  %v4744_v27 = vadd.f32 %v8686_v5, %v4052_v28 }
 0x304   : > { %v4885_v52 = vsel %vm2119_vm0, %v9415_v2, %v4792_v4  ;;  %v3794_v18 = vpop.f32.mrf.mxu1  ;;  %4335 = vmatmul.mubr.bf16.gmra.mxu1 %v8137_v53  ;;  %v4059_v15 = vpop.f32.mrf.mxu0 }
 0x305   : > { %v8695_v17 = vadd.f32 %v4885_v52, %v4743_v26  ;;  %v4060_v46 = vadd.f32 %v4059_v15, %v3786_v6  ;;  %4342 = vmatprep.mubr.bf16.mxu1 %v8164_v32  ;;  %v6397_v52 = vld [vmem:[#allocation2 + $0x40] sm:$0xff]   ;;  %v6398_v15 = vld [vmem:[#allocation2 + $0x48] sm:$0xff]  }
 0x306   : > { %v3796_v33 = vpop.f32.mrf.mxu1  ;;  %v4061_v16 = vpop.f32.mrf.mxu0 }
 0x307   : > { %v4793_v38 = vrot.slane %v4060_v46, 1  ;;  %v4062_v12 = vadd.f32 %v4061_v16, %v3788_v34  ;;  %v4745_v16 = vadd.f32 %v8686_v5, %v4058_v41 }
 0x308   : > { %v3798_v14 = vpop.f32.mrf.mxu1  ;;  %v4063_v11 = vpop.f32.mrf.mxu0 }
 0x309   : > { %v4884_v2 = vsel %vm2119_vm0, %v4792_v4, %v4793_v38  ;;  %v4064_v54 = vadd.f32 %v4063_v11, %v3790_v63 }
 0x30a   : > { %v8701_v1 = vadd.f32 %v4884_v2, %v4744_v27  ;;  %v3800_v53 = vpop.f32.mrf.mxu1  ;;  %v4067_v26 = vpop.f32.mrf.mxu0  ;;  %6057 = vmatmul.mubr.bf16.gmra.mxu0 %v6397_v52  ;;  %v4746_v27 = vadd.f32 %v8686_v5, %v4062_v12 }
 0x30b   : > { %v4794_v6 = vrot.slane %v4064_v54, 1  ;;  %v4068_v32 = vadd.f32 %v4067_v26, %v3794_v18  ;;  %6060 = vmatprep.mubr.bf16.mxu0 %v6398_v15 }
 0x30c   : > { %v3804_v34 = vpop.f32.mrf.mxu1  ;;  %4343 = vmatmul.mubr.bf16.gmra.mxu1 %v8173_v21  ;;  %v4069_v28 = vpop.f32.mrf.mxu0 }
 0x30d   : > { %v4883_v4 = vsel %vm2119_vm0, %v4793_v38, %v4794_v6  ;;  %v4070_v11 = vadd.f32 %v4069_v28, %v3796_v33  ;;  %4350 = vmatprep.mubr.bf16.mxu1 %v8196_v36 }
 0x30e   : > { %v8708_v2 = vadd.f32 %v4883_v4, %v4745_v16  ;;  %v3806_v63 = vpop.f32.mrf.mxu1  ;;  %v4071_v46 = vpop.f32.mrf.mxu0 }
 0x30f   : > { %v4795_v54 = vrot.slane %v4070_v11, 1  ;;  %v4072_v18 = vadd.f32 %v4071_v46, %v3798_v14  ;;  %v4747_v14 = vadd.f32 %v8686_v5, %v4068_v32 }
 0x310   : > { %v3808_v26 = vpop.f32.mrf.mxu1  ;;  %v4073_v41 = vpop.f32.mrf.mxu0 }
 0x311   : > { %v4882_v21 = vsel %vm2119_vm0, %v4794_v6, %v4795_v54  ;;  %v4074_v52 = vadd.f32 %v4073_v41, %v3800_v53 }
 0x312   : > { %v8713_v15 = vadd.f32 %v4882_v21, %v4746_v27  ;;  %v3810_v38 = vpop.f32.mrf.mxu1  ;;  %v4077_v33 = vpop.f32.mrf.mxu0  ;;  %6061 = vmatmul.mubr.bf16.gmra.mxu0 %v8339_v48 }
 0x313   : > { %v4796_v36 = vrot.slane %v4074_v52, 1  ;;  %v4078_v16 = vadd.f32 %v4077_v33, %v3804_v34  ;;  %6064 = vmatprep.mubr.bf16.mxu0 %v8373_v0  ;;  %v4748_v0 = vadd.f32 %v8686_v5, %v4072_v18 }
 0x314   : > { %v3814_v28 = vpop.f32.mrf.mxu1  ;;  %4351 = vmatmul.mubr.bf16.gmra.mxu1 %v8208_v58  ;;  %v4079_v12 = vpop.f32.mrf.mxu0 }
 0x315   : > { %v4881_v6 = vsel %vm2119_vm0, %v4795_v54, %v4796_v36  ;;  %v4080_v53 = vadd.f32 %v4079_v12, %v3806_v63  ;;  %4358 = vmatprep.mubr.bf16.mxu1 %v8235_v22 }
 0x316   : > { %v8722_v4 = vadd.f32 %v4881_v6, %v4747_v14  ;;  %v3816_v11 = vpop.f32.mrf.mxu1  ;;  %v4081_v48 = vpop.f32.mrf.mxu0 }
 0x317   : > { %v4797_v46 = vrot.slane %v4080_v53, 1  ;;  %v4082_v34 = vadd.f32 %v4081_v48, %v3808_v26  ;;  %v4749_v26 = vadd.f32 %v8686_v5, %v4078_v16 }
 0x318   : > { %v3818_v27 = vpop.f32.mrf.mxu1  ;;  %v4083_v32 = vpop.f32.mrf.mxu0 }
 0x319   : > { %v4880_v58 = vsel %vm2119_vm0, %v4796_v36, %v4797_v46  ;;  %v4084_v41 = vadd.f32 %v4083_v32, %v3810_v38 }
 0x31a   : > { %v8727_v21 = vadd.f32 %v4880_v58, %v4748_v0  ;;  %v3820_v54 = vpop.f32.mrf.mxu1  ;;  %v4087_v63 = vpop.f32.mrf.mxu0  ;;  %6065 = vmatmul.mubr.bf16.gmra.mxu0 %v8402_v19 }
 0x31b   : > { %v4798_v22 = vrot.slane %v4084_v41, 1  ;;  %v4088_v52 = vadd.f32 %v4087_v63, %v3814_v28  ;;  %6068 = vmatprep.mubr.bf16.mxu0 %v8431_v55  ;;  %v4750_v55 = vadd.f32 %v8686_v5, %v4082_v34 }
 0x31c   : > { %v3824_v33 = vpop.f32.mrf.mxu1  ;;  %4359 = vmatmul.mubr.bf16.gmra.mxu1 %v8241_v37  ;;  %v4089_v18 = vpop.f32.mrf.mxu0 }
 0x31d   : > { %v4879_v36 = vsel %vm2119_vm0, %v4797_v46, %v4798_v22  ;;  %v4090_v38 = vadd.f32 %v4089_v18, %v3816_v11  ;;  %4366 = vmatprep.mubr.bf16.mxu1 %v8271_v51 }
 0x31e   : > { %v8736_v14 = vadd.f32 %v4879_v36, %v4749_v26  ;;  %v3826_v12 = vpop.f32.mrf.mxu1  ;;  %v4091_v19 = vpop.f32.mrf.mxu0 }
 0x31f   : > { %v4799_v6 = vrot.slane %v4090_v38, 1  ;;  %v4092_v28 = vadd.f32 %v4091_v19, %v3818_v27  ;;  %v4751_v27 = vadd.f32 %v8686_v5, %v4088_v52 }
 0x320   : > { %v3828_v53 = vpop.f32.mrf.mxu1  ;;  %v4093_v16 = vpop.f32.mrf.mxu0 }
 0x321   : > { %v4878_v37 = vsel %vm2119_vm0, %v4798_v22, %v4799_v6  ;;  %v4094_v48 = vadd.f32 %v4093_v16, %v3820_v54 }
 0x322   : > { %v8741_v0 = vadd.f32 %v4878_v37, %v4750_v55  ;;  %v3830_v46 = vpop.f32.mrf.mxu1  ;;  %v4097_v11 = vpop.f32.mrf.mxu0  ;;  %6069 = vmatmul.mubr.bf16.gmra.mxu0 %v8455_v61 }
 0x323   : > { %v4800_v51 = vrot.slane %v4094_v48, 1  ;;  %v4098_v32 = vadd.f32 %v4097_v11, %v3824_v33  ;;  %6072 = vmatprep.mubr.bf16.mxu0 %v8477_v31  ;;  %v4752_v31 = vadd.f32 %v8686_v5, %v4092_v28 }
 0x324   : > { %v3834_v58 = vpop.f32.mrf.mxu1  ;;  %4367 = vmatmul.mubr.bf16.gmra.mxu1 %v8277_v29  ;;  %v4099_v34 = vpop.f32.mrf.mxu0 }
 0x325   : > { %v4877_v41 = vsel %vm2119_vm0, %v4799_v6, %v4800_v51  ;;  %v4100_v54 = vadd.f32 %v4099_v34, %v3826_v12  ;;  %4374 = vmatprep.mubr.bf16.mxu1 %v8300_v7  ;;  %v4753_v55 = vadd.f32 %v8686_v5, %v4098_v32 }
 0x326   : > { %v8750_v63 = vadd.f32 %v4877_v41, %v4751_v27  ;;  %v3836_v22 = vpop.f32.mrf.mxu1  ;;  %v4101_v61 = vpop.f32.mrf.mxu0 }
 0x327   : > { %v4801_v26 = vrot.slane %v4100_v54, 1  ;;  %v4102_v33 = vadd.f32 %v4101_v61, %v3828_v53 }
 0x328   : > { %v3838_v18 = vpop.f32.mrf.mxu1  ;;  %v4103_v52 = vpop.f32.mrf.mxu0 }
 0x329   : > { %v4876_v29 = vsel %vm2119_vm0, %v4800_v51, %v4801_v26  ;;  %v4104_v36 = vadd.f32 %v4103_v52, %v3830_v46 }
 0x32a   : > { %v8755_v38 = vadd.f32 %v4876_v29, %v4752_v31  ;;  %v3840_v19 = vpop.f32.mrf.mxu1  ;;  %v4107_v12 = vpop.f32.mrf.mxu0  ;;  %6073 = vmatmul.mubr.bf16.gmra.mxu0 %v8499_v57  ;;  %v9566_v29 = vld [vmem:[#allocation17_spill] sm:$0xff] }
 0x32b   : > { %v4802_v7 = vrot.slane %v4104_v36, 1  ;;  %v4108_v6 = vadd.f32 %v4107_v12, %v3834_v58  ;;  %6076 = vmatprep.mubr.bf16.mxu0 %v8519_v42  ;;  %v4754_v42 = vadd.f32 %v8686_v5, %v4102_v33  ;;  %v9565_v33 = vld [vmem:[#allocation15_spill] sm:$0xff] }
 0x32c   : > { %v3844_v53 = vpop.f32.mrf.mxu1  ;;  %4375 = vmatmul.mubr.bf16.gmra.mxu1 %v8315_v8  ;;  %v4109_v28 = vpop.f32.mrf.mxu0 }
 0x32d   : > { %v4875_v16 = vsel %vm2119_vm0, %v4801_v26, %v4802_v7  ;;  %v4110_v37 = vadd.f32 %v4109_v28, %v3836_v22  ;;  %4382 = vmatprep.mubr.bf16.mxu1 %v8347_v62  ;;  %v4755_v61 = vadd.f32 %v8686_v5, %v4108_v6 }
 0x32e   : > { %v8764_v48 = vadd.f32 %v4875_v16, %v4753_v55  ;;  %v3846_v46 = vpop.f32.mrf.mxu1  ;;  %v4111_v57 = vpop.f32.mrf.mxu0 }
 0x32f   : > { %v4803_v11 = vrot.slane %v4110_v37, 1  ;;  %v4112_v51 = vadd.f32 %v4111_v57, %v3838_v18 }
 0x330   : > { %v3848_v27 = vpop.f32.mrf.mxu1  ;;  %v4113_v32 = vpop.f32.mrf.mxu0 }
 0x331   : > { %v4874_v8 = vsel %vm2119_vm0, %v4802_v7, %v4803_v11  ;;  %v4114_v58 = vadd.f32 %v4113_v32, %v3840_v19 }
 0x332   : > { %v8769_v34 = vadd.f32 %v4874_v8, %v4754_v42  ;;  %v3850_v41 = vpop.f32.mrf.mxu1  ;;  %v4117_v54 = vpop.f32.mrf.mxu0  ;;  %6077 = vmatmul.mubr.bf16.gmra.mxu0 %v8540_v9 }
 0x333   : > { %v4804_v62 = vrot.slane %v4114_v58, 1  ;;  %v4118_v22 = vadd.f32 %v4117_v54, %v3844_v53  ;;  %6080 = vmatprep.mubr.bf16.mxu0 %v8561_v50  ;;  %v4756_v50 = vadd.f32 %v8686_v5, %v4112_v51  ;;  %v9567_v51 = vld [vmem:[#allocation28_spill] sm:$0xff] }
 0x334   : > { %v3854_v26 = vpop.f32.mrf.mxu1  ;;  %4383 = vmatmul.mubr.bf16.gmra.mxu1 %v9565_v33  ;;  %v4119_v31 = vpop.f32.mrf.mxu0 }
 0x335   : > { %v4873_v18 = vsel %vm2119_vm0, %v4803_v11, %v4804_v62  ;;  %v4120_v52 = vadd.f32 %v4119_v31, %v3846_v46  ;;  %4390 = vmatprep.mubr.bf16.mxu1 %v9566_v29  ;;  %v4757_v42 = vadd.f32 %v8686_v5, %v4118_v22 }
 0x336   : > { %v8778_v36 = vadd.f32 %v4873_v18, %v4755_v61  ;;  %v3856_v19 = vpop.f32.mrf.mxu1  ;;  %v4121_v9 = vpop.f32.mrf.mxu0 }
 0x337   : > { %v4805_v12 = vrot.slane %v4120_v52, 1  ;;  %v4122_v7 = vadd.f32 %v4121_v9, %v3848_v27 }
 0x338   : > { %v3858_v55 = vpop.f32.mrf.mxu1  ;;  %v4123_v6 = vpop.f32.mrf.mxu0 }
 0x339   : > { %v4872_v53 = vsel %vm2119_vm0, %v4804_v62, %v4805_v12  ;;  %v4124_v28 = vadd.f32 %v4123_v6, %v3850_v41  ;;  %v9568_v41 = vld [vmem:[#allocation26_spill] sm:$0xff] }
 0x33a   : > { %v8783_v16 = vadd.f32 %v4872_v53, %v4756_v50  ;;  %v3860_v37 = vpop.f32.mrf.mxu1  ;;  %v4127_v46 = vpop.f32.mrf.mxu0  ;;  %6081 = vmatmul.mubr.bf16.gmra.mxu0 %v8581_v24 }
 0x33b   : > { %v4806_v57 = vrot.slane %v4124_v28, 1  ;;  %v4128_v11 = vadd.f32 %v4127_v46, %v3854_v26  ;;  %6084 = vmatprep.mubr.bf16.mxu0 %v8602_v44  ;;  %v4758_v44 = vadd.f32 %v8686_v5, %v4122_v7  ;;  %v9569_v7 = vld [vmem:[#allocation25_spill] sm:$0xff] }
 0x33c   : > { %v3864_v27 = vpop.f32.mrf.mxu1  ;;  %4391 = vmatmul.mubr.bf16.gmra.mxu1 %v9567_v51  ;;  %v4129_v32 = vpop.f32.mrf.mxu0 }
 0x33d   : > { %v4871_v8 = vsel %vm2119_vm0, %v4805_v12, %v4806_v57  ;;  %v4130_v58 = vadd.f32 %v4129_v32, %v3856_v19  ;;  %4398 = vmatprep.mubr.bf16.mxu1 %v9568_v41  ;;  %v4759_v50 = vadd.f32 %v8686_v5, %v4128_v11 }
 0x33e   : > { %v8792_v54 = vadd.f32 %v4871_v8, %v4757_v42  ;;  %v3866_v62 = vpop.f32.mrf.mxu1  ;;  %v4131_v24 = vpop.f32.mrf.mxu0 }
 0x33f   : > { %v4807_v61 = vrot.slane %v4130_v58, 1  ;;  %v4132_v26 = vadd.f32 %v4131_v24, %v3858_v55 }
 0x340   : > { %v3868_v33 = vpop.f32.mrf.mxu1  ;;  %v4133_v22 = vpop.f32.mrf.mxu0 }
 0x341   : > { %v4870_v31 = vsel %vm2119_vm0, %v4806_v57, %v4807_v61  ;;  %v4134_v18 = vadd.f32 %v4133_v22, %v3860_v37  ;;  %v9570_v37 = vld [vmem:[#allocation30_spill] sm:$0xff] }
 0x342   : > { %v8797_v52 = vadd.f32 %v4870_v31, %v4758_v44  ;;  %v3870_v29 = vpop.f32.mrf.mxu1  ;;  %v4137_v19 = vpop.f32.mrf.mxu0  ;;  %6085 = vmatmul.mubr.bf16.gmra.mxu0 %v8623_v49 }
 0x343   : > { %v4808_v9 = vrot.slane %v4134_v18, 1  ;;  %v4138_v12 = vadd.f32 %v4137_v19, %v3864_v27  ;;  %6088 = vmatprep.mubr.bf16.mxu0 %v8642_v23  ;;  %v4760_v23 = vadd.f32 %v8686_v5, %v4132_v26  ;;  %v9571_v26 = vld [vmem:[#allocation19_spill] sm:$0xff] }
 0x344   : > { %v3874_v55 = vpop.f32.mrf.mxu1  ;;  %4399 = vmatmul.mubr.bf16.gmra.mxu1 %v9569_v7  ;;  %v4139_v6 = vpop.f32.mrf.mxu0 }
 0x345   : > { %v4869_v53 = vsel %vm2119_vm0, %v4807_v61, %v4808_v9  ;;  %v4140_v28 = vadd.f32 %v4139_v6, %v3866_v62  ;;  %4406 = vmatprep.mubr.bf16.mxu1 %v9570_v37  ;;  %v4761_v44 = vadd.f32 %v8686_v5, %v4138_v12 }
 0x346   : > { %v8806_v46 = vadd.f32 %v4869_v53, %v4759_v50  ;;  %v3876_v57 = vpop.f32.mrf.mxu1  ;;  %v4141_v49 = vpop.f32.mrf.mxu0 }
 0x347   : > { %v4809_v42 = vrot.slane %v4140_v28, 1  ;;  %v4142_v27 = vadd.f32 %v4141_v49, %v3868_v33 }
 0x348   : > { %v3878_v51 = vpop.f32.mrf.mxu1  ;;  %v4143_v11 = vpop.f32.mrf.mxu0 }
 0x349   : > { %v4868_v32 = vsel %vm2119_vm0, %v4808_v9, %v4809_v42  ;;  %v4144_v8 = vadd.f32 %v4143_v11, %v3870_v29 }
 0x34a   : > { %v8811_v58 = vadd.f32 %v4868_v32, %v4760_v23  ;;  %v3880_v41 = vpop.f32.mrf.mxu1  ;;  %v4147_v62 = vpop.f32.mrf.mxu0  ;;  %6089 = vmatmul.mubr.bf16.gmra.mxu0 %v8656_v47 }
 0x34b   : > { %v4810_v24 = vrot.slane %v4144_v8, 1  ;;  %v4148_v61 = vadd.f32 %v4147_v62, %v3874_v55  ;;  %6092 = vmatprep.mubr.bf16.mxu0 %v8667_v30  ;;  %v4762_v30 = vadd.f32 %v8686_v5, %v4142_v27 }
 0x34c   : > { %v3884_v33 = vpop.f32.mrf.mxu1  ;;  %4407 = vmatmul.mubr.bf16.gmra.mxu1 %v9571_v26  ;;  %v4149_v22 = vpop.f32.mrf.mxu0 }
 0x34d   : > { %v4867_v31 = vsel %vm2119_vm0, %v4809_v42, %v4810_v24  ;;  %v4150_v18 = vadd.f32 %v4149_v22, %v3876_v57  ;;  %4414 = vmatprep.mubr.bf16.mxu1 %v8460_v10  ;;  %v4763_v49 = vadd.f32 %v8686_v5, %v4148_v61 }
 0x34e   : > { %v8820_v29 = vadd.f32 %v4867_v31, %v4761_v44  ;;  %v3886_v19 = vpop.f32.mrf.mxu1  ;;  %v4151_v47 = vpop.f32.mrf.mxu0 }
 0x34f   : > { %v4811_v9 = vrot.slane %v4150_v18, 1  ;;  %v4152_v50 = vadd.f32 %v4151_v47, %v3878_v51 }
 0x350   : > { %v3888_v55 = vpop.f32.mrf.mxu1  ;;  %v4153_v12 = vpop.f32.mrf.mxu0 }
 0x351   : > { %v4866_v7 = vsel %vm2119_vm0, %v4810_v24, %v4811_v9  ;;  %v4154_v6 = vadd.f32 %v4153_v12, %v3880_v41  ;;  %v4764_v62 = vadd.f32 %v8686_v5, %v4152_v50 }
 0x352   : > { %v8825_v53 = vadd.f32 %v4866_v7, %v4762_v30  ;;  %v3890_v28 = vpop.f32.mrf.mxu1  ;;  %v4157_v37 = vpop.f32.mrf.mxu0  ;;  %6093 = vmatmul.mubr.bf16.gmra.mxu0 %v8675_v35  ;;  %v9572_v30 = vld [vmem:[#allocation32_spill] sm:$0xff] }
 0x353   : > { %v4812_v10 = vrot.slane %v4154_v6, 1  ;;  %v4158_v57 = vadd.f32 %v4157_v37, %v3884_v33 }
 0x354   : > { %v3894_v42 = vpop.f32.mrf.mxu1  ;;  %4415 = vmatmul.mubr.bf16.gmra.mxu1 %v8463_v13  ;;  %v4159_v27 = vpop.f32.mrf.mxu0 }
 0x355   : > { %v4865_v23 = vsel %vm2119_vm0, %v4811_v9, %v4812_v10  ;;  %v4160_v51 = vadd.f32 %v4159_v27, %v3886_v19  ;;  %4422 = vmatprep.mubr.bf16.mxu1 %v8479_v60  ;;  %v4765_v18 = vadd.f32 %v8686_v5, %v4158_v57 }
 0x356   : > { %v8833_v11 = vadd.f32 %v4865_v23, %v4763_v49  ;;  %v3896_v32 = vpop.f32.mrf.mxu1  ;;  %v4161_v8 = vpop.f32.mrf.mxu0 }
 0x357   : > { %v4813_v41 = vrot.slane %v4160_v51, 1  ;;  %v4162_v35 = vadd.f32 %v4161_v8, %v3888_v55 }
 0x358   : > { %v3898_v24 = vpop.f32.mrf.mxu1  ;;  %v4163_v61 = vpop.f32.mrf.mxu0 }
 0x359   : > { %v4864_v13 = vsel %vm2119_vm0, %v4812_v10, %v4813_v41  ;;  %v4164_v44 = vadd.f32 %v4163_v61, %v3890_v28  ;;  %v4766_v37 = vadd.f32 %v8686_v5, %v4162_v35 }
 0x35a   : > { %v8838_v33 = vadd.f32 %v4864_v13, %v4764_v62  ;;  %v3900_v26 = vpop.f32.mrf.mxu1  ;;  %v4167_v22 = vpop.f32.mrf.mxu0  ;;  %v9573_v62 = vld [vmem:[#allocation27_spill] sm:$0xff] }
 0x35b   : > { %v4814_v31 = vrot.slane %v4164_v44, 1  ;;  %v4168_v60 = vadd.f32 %v4167_v22, %v3894_v42 }
 0x35c   : > { %v3904_v19 = vpop.f32.mrf.mxu1  ;;  %4423 = vmatmul.mubr.bf16.gmra.mxu1 %v8486_v59  ;;  %v4169_v47 = vpop.f32.mrf.mxu0 }
 0x35d   : > { %v4863_v9 = vsel %vm2119_vm0, %v4813_v41, %v4814_v31  ;;  %v4170_v50 = vadd.f32 %v4169_v47, %v3896_v32  ;;  %4430 = vmatprep.mubr.bf16.mxu1 %v9572_v30  ;;  %v4767_v8 = vadd.f32 %v8686_v5, %v4168_v60 }
 0x35e   : > { %v8845_v55 = vadd.f32 %v4863_v9, %v4765_v18  ;;  %v3906_v12 = vpop.f32.mrf.mxu1  ;;  %v4171_v7 = vpop.f32.mrf.mxu0 }
 0x35f   : > { %v4815_v6 = vrot.slane %v4170_v50, 1  ;;  %v4172_v28 = vadd.f32 %v4171_v7, %v3898_v24 }
 0x360   : > { %v3908_v10 = vpop.f32.mrf.mxu1  ;;  %v4173_v57 = vpop.f32.mrf.mxu0 }
 0x361   : > { %v4862_v59 = vsel %vm2119_vm0, %v4814_v31, %v4815_v6  ;;  %v4174_v49 = vadd.f32 %v4173_v57, %v3900_v26  ;;  %v4768_v18 = vadd.f32 %v8686_v5, %v4172_v28 }
 0x362   : > { %v8850_v42 = vadd.f32 %v4862_v59, %v4766_v37  ;;  %v3910_v27 = vpop.f32.mrf.mxu1  ;;  %v4177_v23 = vpop.f32.mrf.mxu0  ;;  %v9574_v59 = vld [vmem:[#allocation34_spill] sm:$0xff] }
 0x363   : > { %v4816_v51 = vrot.slane %v4174_v49, 1  ;;  %v4178_v32 = vadd.f32 %v4177_v23, %v3904_v19 }
 0x364   : > { %v3914_v41 = vpop.f32.mrf.mxu1  ;;  %4431 = vmatmul.mubr.bf16.gmra.mxu1 %v9573_v62  ;;  %v4179_v24 = vpop.f32.mrf.mxu0 }
 0x365   : > { %v4861_v35 = vsel %vm2119_vm0, %v4815_v6, %v4816_v51  ;;  %v4180_v61 = vadd.f32 %v4179_v24, %v3906_v12  ;;  %4438 = vmatprep.mubr.bf16.mxu1 %v8524_v45  ;;  %v4769_v6 = vadd.f32 %v8686_v5, %v4178_v32 }
 0x366   : > { %v8857_v13 = vadd.f32 %v4861_v35, %v4767_v8  ;;  %v3916_v44 = vpop.f32.mrf.mxu1  ;;  %v4181_v26 = vpop.f32.mrf.mxu0 }
 0x367   : > { %v4817_v22 = vrot.slane %v4180_v61, 1  ;;  %v4182_v31 = vadd.f32 %v4181_v26, %v3908_v10 }
 0x368   : > { %v3918_v19 = vpop.f32.mrf.mxu1  ;;  %v4183_v60 = vpop.f32.mrf.mxu0 }
 0x369   : > { %v4860_v47 = vsel %vm2119_vm0, %v4816_v51, %v4817_v22  ;;  %v4184_v9 = vadd.f32 %v4183_v60, %v3910_v27 }
 0x36a   : > { %v8862_v50 = vadd.f32 %v4860_v47, %v4768_v18  ;;  %v3920_v30 = vpop.f32.mrf.mxu1  ;;  %v4187_v12 = vpop.f32.mrf.mxu0 }
 0x36b   : > { %v4818_v7 = vrot.slane %v4184_v9, 1  ;;  %v4188_v45 = vadd.f32 %v4187_v12, %v3914_v41  ;;  %v4770_v41 = vadd.f32 %v8686_v5, %v4182_v31  ;;  %v9575_v9 = vld [vmem:[#allocation29_spill] sm:$0xff] }
 0x36c   : > { %v3924_v37 = vpop.f32.mrf.mxu1  ;;  %4439 = vmatmul.mubr.bf16.gmra.mxu1 %v8526_v3  ;;  %v4189_v10 = vpop.f32.mrf.mxu0 }
 0x36d   : > { %v4859_v28 = vsel %vm2119_vm0, %v4817_v22, %v4818_v7  ;;  %v4190_v57 = vadd.f32 %v4189_v10, %v3916_v44  ;;  %4446 = vmatprep.mubr.bf16.mxu1 %v9574_v59  ;;  %v4771_v18 = vadd.f32 %v8686_v5, %v4188_v45 }
 0x36e   : > { %v8869_v49 = vadd.f32 %v4859_v28, %v4769_v6  ;;  %v3926_v27 = vpop.f32.mrf.mxu1  ;;  %v4191_v23 = vpop.f32.mrf.mxu0 }
 0x36f   : > { %v4819_v51 = vrot.slane %v4190_v57, 1  ;;  %v4192_v8 = vadd.f32 %v4191_v23, %v3918_v19 }
 0x370   : > { %v3928_v62 = vpop.f32.mrf.mxu1  ;;  %v4193_v32 = vpop.f32.mrf.mxu0 }
 0x371   : > { %v4858_v3 = vsel %vm2119_vm0, %v4818_v7, %v4819_v51  ;;  %v4194_v24 = vadd.f32 %v4193_v32, %v3920_v30 }
 0x372   : > { %v8874_v35 = vadd.f32 %v4858_v3, %v4770_v41  ;;  %v3930_v61 = vpop.f32.mrf.mxu1  ;;  %v4197_v44 = vpop.f32.mrf.mxu0 }
 0x373   : > { %v4820_v26 = vrot.slane %v4194_v24, 1  ;;  %v4198_v22 = vadd.f32 %v4197_v44, %v3924_v37  ;;  %v4772_v37 = vadd.f32 %v8686_v5, %v4192_v8  ;;  %v9576_v24 = vld [vmem:[#allocation31_spill] sm:$0xff] }
 0x374   : > { %v3934_v60 = vpop.f32.mrf.mxu1  ;;  %4447 = vmatmul.mubr.bf16.gmra.mxu1 %v8548_v56  ;;  %v4199_v19 = vpop.f32.mrf.mxu0 }
 0x375   : > { %v4857_v31 = vsel %vm2119_vm0, %v4819_v51, %v4820_v26  ;;  %v4200_v47 = vadd.f32 %v4199_v19, %v3926_v27  ;;  %4454 = vmatprep.mubr.bf16.mxu1 %v9575_v9  ;;  %v4773_v32 = vadd.f32 %v8686_v5, %v4198_v22 }
 0x376   : > { %v8881_v12 = vadd.f32 %v4857_v31, %v4771_v18  ;;  %v3936_v30 = vpop.f32.mrf.mxu1  ;;  %v4201_v7 = vpop.f32.mrf.mxu0 }
 0x377   : > { %v4821_v6 = vrot.slane %v4200_v47, 1  ;;  %v4202_v10 = vadd.f32 %v4201_v7, %v3928_v62 }
 0x378   : > { %v3938_v28 = vpop.f32.mrf.mxu1  ;;  %v4203_v45 = vpop.f32.mrf.mxu0 }
 0x379   : > { %v4856_v56 = vsel %vm2119_vm0, %v4820_v26, %v4821_v6  ;;  %v4204_v57 = vadd.f32 %v4203_v45, %v3930_v61 }
 0x37a   : > { %v8886_v59 = vadd.f32 %v4856_v56, %v4772_v37  ;;  %v3940_v23 = vpop.f32.mrf.mxu1  ;;  %v4207_v27 = vpop.f32.mrf.mxu0 }
 0x37b   : > { %v4822_v51 = vrot.slane %v4204_v57, 1  ;;  %v4208_v41 = vadd.f32 %v4207_v27, %v3934_v60  ;;  %v4774_v60 = vadd.f32 %v8686_v5, %v4202_v10 }
 0x37c   : > { %v3944_v3 = vpop.f32.mrf.mxu1  ;;  %4455 = vmatmul.mubr.bf16.gmra.mxu1 %v9576_v24  ;;  %v4209_v62 = vpop.f32.mrf.mxu0 }
 0x37d   : > { %v4855_v8 = vsel %vm2119_vm0, %v4821_v6, %v4822_v51  ;;  %v4210_v44 = vadd.f32 %v4209_v62, %v3936_v30  ;;  %4462 = vmatprep.mubr.bf16.mxu1 %v8586_v20  ;;  %v4775_v56 = vadd.f32 %v8686_v5, %v4208_v41 }
 0x37e   : > { %v8893_v26 = vadd.f32 %v4855_v8, %v4773_v32  ;;  %v3946_v61 = vpop.f32.mrf.mxu1  ;;  %v4211_v18 = vpop.f32.mrf.mxu0  ;;  %v9577_v32 = vld [vmem:[#allocation33_spill] sm:$0xff] }
 0x37f   : > { %v4823_v19 = vrot.slane %v4210_v44, 1  ;;  %v4212_v31 = vadd.f32 %v4211_v18, %v3938_v28 }
 0x380   : > { %v3948_v47 = vpop.f32.mrf.mxu1  ;;  %v4213_v22 = vpop.f32.mrf.mxu0 }
 0x381   : > { %v4854_v9 = vsel %vm2119_vm0, %v4822_v51, %v4823_v19  ;;  %v4214_v7 = vadd.f32 %v4213_v22, %v3940_v23 }
 0x382   : > { %v8898_v37 = vadd.f32 %v4854_v9, %v4774_v60  ;;  %v3950_v6 = vpop.f32.mrf.mxu1  ;;  %v4217_v30 = vpop.f32.mrf.mxu0 }
 0x383   : > { %v4824_v45 = vrot.slane %v4214_v7, 1  ;;  %v4218_v20 = vadd.f32 %v4217_v30, %v3944_v3  ;;  %v4776_v3 = vadd.f32 %v8686_v5, %v4212_v31 }
 0x384   : > { %v3954_v57 = vpop.f32.mrf.mxu1  ;;  %4463 = vmatmul.mubr.bf16.gmra.mxu1 %v8588_v25  ;;  %v4219_v28 = vpop.f32.mrf.mxu0 }
 0x385   : > { %v4853_v10 = vsel %vm2119_vm0, %v4823_v19, %v4824_v45  ;;  %v4220_v27 = vadd.f32 %v4219_v28, %v3946_v61  ;;  %4470 = vmatprep.mubr.bf16.mxu1 %v9577_v32  ;;  %v4777_v7 = vadd.f32 %v8686_v5, %v4218_v20 }
 0x386   : > { %v8905_v51 = vadd.f32 %v4853_v10, %v4775_v56  ;;  %v3956_v23 = vpop.f32.mrf.mxu1  ;;  %v4221_v24 = vpop.f32.mrf.mxu0 }
 0x387   : > { %v4825_v62 = vrot.slane %v4220_v27, 1  ;;  %v4222_v8 = vadd.f32 %v4221_v24, %v3948_v47 }
 0x388   : > { %v3958_v44 = vpop.f32.mrf.mxu1  ;;  %v4223_v41 = vpop.f32.mrf.mxu0 }
 0x389   : > { %v4852_v25 = vsel %vm2119_vm0, %v4824_v45, %v4825_v62  ;;  %v4224_v18 = vadd.f32 %v4223_v41, %v3950_v6 }
 0x38a   : > { %v8910_v60 = vadd.f32 %v4852_v25, %v4776_v3  ;;  %v3960_v19 = vpop.f32.mrf.mxu1  ;;  %v4227_v61 = vpop.f32.mrf.mxu0 }
 0x38b   : > { %v4826_v22 = vrot.slane %v4224_v18, 1  ;;  %v4228_v9 = vadd.f32 %v4227_v61, %v3954_v57  ;;  %v4778_v57 = vadd.f32 %v8686_v5, %v4222_v8  ;;  %v9579_v61 = vld [vmem:[#allocation35_spill] sm:$0xff] }
 0x38c   : > { %v3964_v30 = vpop.f32.mrf.mxu1  ;;  %4471 = vmatmul.mubr.bf16.gmra.mxu1 %v8610_v39  ;;  %v4229_v47 = vpop.f32.mrf.mxu0 }
 0x38d   : > { %v4851_v31 = vsel %vm2119_vm0, %v4825_v62, %v4826_v22  ;;  %v4230_v56 = vadd.f32 %v4229_v47, %v3956_v23  ;;  %4478 = vmatprep.mubr.bf16.mxu1 %v8628_v43  ;;  %v4779_v25 = vadd.f32 %v8686_v5, %v4228_v9  ;;  %v9580_v47 = vld [vmem:[#allocation36_spill] sm:$0xff] }
 0x38e   : > { %v8917_v45 = vadd.f32 %v4851_v31, %v4777_v7  ;;  %v3966_v6 = vpop.f32.mrf.mxu1  ;;  %v4231_v28 = vpop.f32.mrf.mxu0 }
 0x38f   : > { %v4827_v10 = vrot.slane %v4230_v56, 1  ;;  %v4232_v27 = vadd.f32 %v4231_v28, %v3958_v44 }
 0x390   : > { %v3968_v32 = vpop.f32.mrf.mxu1  ;;  %v4233_v20 = vpop.f32.mrf.mxu0 }
 0x391   : > { %v4850_v39 = vsel %vm2119_vm0, %v4826_v22, %v4827_v10  ;;  %v4234_v24 = vadd.f32 %v4233_v20, %v3960_v19 }
 0x392   : > { %v8922_v3 = vadd.f32 %v4850_v39, %v4778_v57  ;;  %v3970_v62 = vpop.f32.mrf.mxu1  ;;  %v4237_v23 = vpop.f32.mrf.mxu0 }
 0x393   : > { %v4828_v41 = vrot.slane %v4234_v24, 1  ;;  %v4238_v43 = vadd.f32 %v4237_v23, %v3964_v30  ;;  %v4780_v30 = vadd.f32 %v8686_v5, %v4232_v27 }
 0x394   : > { %9578 = vst [vmem:[#allocation4_spill] sm:$0xff] %v8922_v3  ;;  %v3974_v18 = vpop.f32.mrf.mxu1  ;;  %4479 = vmatmul.mubr.bf16.gmra.mxu1 %v9579_v61  ;;  %v4239_v44 = vpop.f32.mrf.mxu0  ;;  %v5083_v3 = vld [vmem:[%s6490_s22 + $0x50] sm:$0xff] }
 0x395   : > { %v4849_v8 = vsel %vm2119_vm0, %v4827_v10, %v4828_v41  ;;  %v4240_v7 = vadd.f32 %v4239_v44, %v3966_v6  ;;  %4486 = vmatprep.mubr.bf16.mxu1 %v9580_v47  ;;  %v9584_v47 = vld [vmem:[#allocation38_spill] sm:$0xff] }
 0x396   : > { %v8929_v22 = vadd.f32 %v4849_v8, %v4779_v25  ;;  %v3976_v19 = vpop.f32.mrf.mxu1  ;;  %v4241_v31 = vpop.f32.mrf.mxu0  ;;  %v4781_v25 = vadd.f32 %v8686_v5, %v4238_v43  ;;  %v9583_v8 = vld [vmem:[#allocation37_spill] sm:$0xff] }
 0x397   : > { %v4829_v56 = vrot.slane %v4240_v7, 1  ;;  %v4242_v28 = vadd.f32 %v4241_v31, %v3968_v32 }
 0x398   : > { %9581 = vst [vmem:[#allocation14_spill] sm:$0xff] %v8929_v22  ;;  %v3978_v57 = vpop.f32.mrf.mxu1  ;;  %v4243_v9 = vpop.f32.mrf.mxu0 }
 0x399   : > { %v4848_v20 = vsel %vm2119_vm0, %v4828_v41, %v4829_v56  ;;  %v4244_v39 = vadd.f32 %v4243_v9, %v3970_v62 }
 0x39a   : > { %v8934_v24 = vadd.f32 %v4848_v20, %v4780_v30  ;;  %v3980_v10 = vpop.f32.mrf.mxu1  ;;  %v4247_v6 = vpop.f32.mrf.mxu0 }
 0x39b   : > { %v4830_v23 = vrot.slane %v4244_v39, 1  ;;  %v4248_v61 = vadd.f32 %v4247_v6, %v3974_v18  ;;  %v4782_v18 = vadd.f32 %v8686_v5, %v4242_v28 }
 0x39c   : > { %9582 = vst [vmem:[#allocation5_spill] sm:$0xff] %v8934_v24  ;;  %v3984_v44 = vpop.f32.mrf.mxu1  ;;  %4487 = vmatmul.mubr.bf16.gmra.mxu1 %v9583_v8  ;;  %v4249_v32 = vpop.f32.mrf.mxu0 }
 0x39d   : > { %v4847_v27 = vsel %vm2119_vm0, %v4829_v56, %v4830_v23  ;;  %v4250_v7 = vadd.f32 %v4249_v32, %v3976_v19  ;;  %4494 = vmatprep.mubr.bf16.mxu1 %v9584_v47 }
 0x39e   : > { %v8941_v41 = vadd.f32 %v4847_v27, %v4781_v25  ;;  %v3986_v62 = vpop.f32.mrf.mxu1  ;;  %v4251_v31 = vpop.f32.mrf.mxu0  ;;  %v4783_v25 = vadd.f32 %v8686_v5, %v4248_v61 }
 0x39f   : > { %v4831_v30 = vrot.slane %v4250_v7, 1  ;;  %v4252_v9 = vadd.f32 %v4251_v31, %v3978_v57  ;;  %v9588_v31 = vld [vmem:[#allocation40_spill] sm:$0xff] }
 0x3a0   : > { %9585 = vst [vmem:[#allocation16_spill] sm:$0xff] %v8941_v41  ;;  %v3988_v20 = vpop.f32.mrf.mxu1  ;;  %v4253_v43 = vpop.f32.mrf.mxu0  ;;  %v9587_v41 = vld [vmem:[#allocation39_spill] sm:$0xff] }
 0x3a1   : > { %v4846_v39 = vsel %vm2119_vm0, %v4830_v23, %v4831_v30  ;;  %v4254_v6 = vadd.f32 %v4253_v43, %v3980_v10 }
 0x3a2   : > { %v8946_v8 = vadd.f32 %v4846_v39, %v4782_v18  ;;  %v3990_v56 = vpop.f32.mrf.mxu1  ;;  %v4257_v19 = vpop.f32.mrf.mxu0 }
 0x3a3   : > { %v4832_v32 = vrot.slane %v4254_v6, 1  ;;  %v4258_v47 = vadd.f32 %v4257_v19, %v3984_v44  ;;  %v4784_v44 = vadd.f32 %v8686_v5, %v4252_v9 }
 0x3a4   : > { %9586 = vst [vmem:[#allocation6_spill] sm:$0xff] %v8946_v8  ;;  %v3994_v27 = vpop.f32.mrf.mxu1  ;;  %4495 = vmatmul.mubr.bf16.gmra.mxu1 %v9587_v41  ;;  %v4259_v57 = vpop.f32.mrf.mxu0 }
 0x3a5   : > { %v4845_v28 = vsel %vm2119_vm0, %v4831_v30, %v4832_v32  ;;  %v4260_v7 = vadd.f32 %v4259_v57, %v3986_v62  ;;  %4502 = vmatprep.mubr.bf16.mxu1 %v9588_v31 }
 0x3a6   : > { %v8953_v23 = vadd.f32 %v4845_v28, %v4783_v25  ;;  %v3996_v10 = vpop.f32.mrf.mxu1  ;;  %v4261_v18 = vpop.f32.mrf.mxu0  ;;  %v4785_v25 = vadd.f32 %v8686_v5, %v4258_v47 }
 0x3a7   : > { %v4833_v43 = vrot.slane %v4260_v7, 1  ;;  %v4262_v39 = vadd.f32 %v4261_v18, %v3988_v20 }
 0x3a8   : > { %9589 = vst [vmem:[#allocation18_spill] sm:$0xff] %v8953_v23  ;;  %v3998_v6 = vpop.f32.mrf.mxu1  ;;  %v4263_v61 = vpop.f32.mrf.mxu0  ;;  %v9591_v23 = vld [vmem:[#allocation3_spill] sm:$0xff] }
 0x3a9   : > { %v4844_v41 = vsel %vm2119_vm0, %v4832_v32, %v4833_v43  ;;  %v4264_v19 = vadd.f32 %v4263_v61, %v3990_v56 }
 0x3aa   : > { %v8958_v8 = vadd.f32 %v4844_v41, %v4784_v44  ;;  %v4000_v30 = vpop.f32.mrf.mxu1  ;;  %v4267_v62 = vpop.f32.mrf.mxu0  ;;  %v4786_v41 = vadd.f32 %v8686_v5, %v4262_v39 }
 0x3ab   : > { %v4834_v57 = vrot.slane %v4264_v19, 1  ;;  %v4268_v31 = vadd.f32 %v4267_v62, %v3994_v27 }
 0x3ac   : > { %9590 = vst [vmem:[#allocation7_spill] sm:$0xff] %v8958_v8  ;;  %v4004_v28 = vpop.f32.mrf.mxu1  ;;  %4503 = vmatmul.mubr.bf16.gmra.mxu1 %v9591_v23  ;;  %v4269_v20 = vpop.f32.mrf.mxu0 }
 0x3ad   : > { %v4843_v9 = vsel %vm2119_vm0, %v4833_v43, %v4834_v57  ;;  %v4270_v7 = vadd.f32 %v4269_v20, %v3996_v10 }
 0x3ae   : > { %v8964_v18 = vadd.f32 %v4843_v9, %v4785_v25  ;;  %v4006_v32 = vpop.f32.mrf.mxu1  ;;  %v4271_v56 = vpop.f32.mrf.mxu0  ;;  %v6399_v25 = vld [vmem:[%s9355_s4] ss:$0 sm:$0xff] }
 0x3af   : > { %v4835_v44 = vrot.slane %v4270_v7, 1  ;;  %v4272_v61 = vadd.f32 %v4271_v56, %v3998_v6  ;;  %v4787_v20 = vadd.f32 %v6399_v25, %v4268_v31 }
 0x3b0   : > { %9592 = vst [vmem:[#allocation20_spill] sm:$0xff] %v8964_v18  ;;  %v4008_v19 = vpop.f32.mrf.mxu1  ;;  %v4273_v27 = vpop.f32.mrf.mxu0 }
 0x3b1   : > { %v4842_v47 = vsel %vm2119_vm0, %v4834_v57, %v4835_v44  ;;  %v4274_v62 = vadd.f32 %v4273_v27, %v4000_v30  ;;  %v4788_v27 = vadd.f32 %v6399_v25, %v4272_v61 }
 0x3b2   : > { %v8969_v23 = vadd.f32 %v4842_v47, %v4786_v41  ;;  %v4010_v8 = vpop.f32.mrf.mxu1  ;;  %v4277_v24 = vpop.f32.mrf.mxu0 }
 0x3b3   : > { %v4836_v43 = vrot.slane %v4274_v62, 1  ;;  %v4278_v10 = vadd.f32 %v4277_v24, %v4004_v28 }
 0x3b4   : > { %9593 = vst [vmem:[#allocation8_spill] sm:$0xff] %v8969_v23  ;;  %v4320_v6 = vpop.f32.mrf.mxu1  ;;  %v4279_v9 = vpop.f32.mrf.mxu0 }
 0x3b5   : > { %v4841_v5 = vsel %vm2119_vm0, %v4835_v44, %v4836_v43  ;;  %v4280_v39 = vadd.f32 %v4279_v9, %v4006_v32  ;;  %v4789_v9 = vadd.f32 %v6399_v25, %v4278_v10 }
 0x3b6   : > { %v8976_v7 = vadd.f32 %v4841_v5, %v4787_v20  ;;  %v4322_v30 = vpop.f32.mrf.mxu1  ;;  %v4281_v57 = vpop.f32.mrf.mxu0 }
 0x3b7   : > { %v4837_v56 = vrot.slane %v4280_v39, 1  ;;  %v4282_v41 = vadd.f32 %v4281_v57, %v4008_v19  ;;  %v5081_v19 = vld [vmem:[%s6490_s22 + $0x40] sm:$0xff] }
 0x3b8   : > { %9594 = vst [vmem:[#allocation21_spill] sm:$0xff] %v8976_v7  ;;  %v4323_v24 = vpop.f32.mrf.mxu1  ;;  %v4283_v28 = vpop.f32.mrf.mxu0  ;;  %v9596_v57 = vld [vmem:[#allocation12_spill] sm:$0xff] }
 0x3b9   : > { %v4840_v31 = vsel %vm2119_vm0, %v4836_v43, %v4837_v56  ;;  %v4284_v47 = vadd.f32 %v4283_v28, %v4010_v8  ;;  %v4790_v5 = vadd.f32 %v6399_v25, %v4282_v41  ;;  %v9597_v7 = vrot.slane %v9596_v57, 1  ;;  %v5082_v43 = vld [vmem:[%s6490_s22 + $0x48] sm:$0xff]  ;;  %v8991_v8 = vld [vmem:[%s6490_s22 + $0x30] sm:$0xff] }
 0x3ba   : > { %v8980_v62 = vadd.f32 %v4840_v31, %v4788_v27  ;;  %v4325_v32 = vpop.f32.mrf.mxu1  ;;  %v6050_v44 = vpop.f32.mrf.mxu0  ;;  %v5080_v27 = vld [vmem:[%s6490_s22 + $0x38] sm:$0xff]  ;;  %v5130_v57 = vrot.slane %v5082_v43, 2 }
 0x3bb   : > { %v4838_v20 = vrot.slane %v4284_v47, 1  ;;  %v5129_v32 = vrot.slane %v5081_v19, 2  ;;  %v5131_v19 = vrot.slane %v5083_v3, 2 }
 0x3bc   : > { %9595 = vst [vmem:[#allocation9_spill] sm:$0xff] %v8980_v62  ;;  %v4328_v30 = vpop.f32.mrf.mxu1  ;;  %v4545_v39 = vpop.f32.mrf.mxu0 }
 0x3bd   : > { %v4839_v61 = vsel %vm2119_vm0, %v4837_v56, %v4838_v20  ;;  %v4886_v23 = vsel %vm2119_vm0, %v4838_v20, %v9597_v7  ;;  %v4554_v31 = vadd.f32 %v6050_v44, %v4328_v30  ;;  %v8998_v47 = vadd.f32 %v4545_v39, %v4320_v6 }
 0x3be   : > { %v8994_v28 = vadd.f32 %v4839_v61, %v4789_v9  ;;  %v8996_v10 = vadd.f32 %v4886_v23, %v4790_v5  ;;  %v4330_v25 = vpop.f32.mrf.mxu1  ;;  %v6051_v41 = vpop.f32.mrf.mxu0  ;;  %v5127_v7 = vrot.slane %v8991_v8, 2  ;;  %v5128_v20 = vrot.slane %v5080_v27, 2 }
 0x3bf   : > { %v4937_v23 = vrot.slane %v4554_v31, 2  ;;  %v4935_v5 = vrot.slane %v8998_v47, 2  ;;  %v5219_v6 = vsel %vm2282_vm2, %v5129_v32, %v5130_v57 }
 0x3c0   : > { %v4331_v56 = vpop.f32.mrf.mxu1  ;;  %v4548_v62 = vpop.f32.mrf.mxu0  ;;  %v5220_v30 = vsel %vm2282_vm2, %v5128_v20, %v5129_v32 }
 0x3c1   : > { %v4557_v18 = vadd.f32 %v6051_v41, %v4331_v56  ;;  %v4549_v22 = vadd.f32 %v4548_v62, %v4323_v24  ;;  %v5221_v24 = vsel %vm2282_vm2, %v5127_v7, %v5128_v20  ;;  %v5084_v20 = vld [vmem:[%s6490_s22 + $0x58] sm:$0xff] }
 0x3c2   : > { %v4333_v9 = vpop.f32.mrf.mxu1  ;;  %v6054_v61 = vpop.f32.mrf.mxu0 }
 0x3c3   : > { %v4938_v25 = vrot.slane %v4557_v18, 2  ;;  %v4936_v44 = vrot.slane %v4549_v22, 2 }
 0x3c4   : > { %v4336_v62 = vpop.f32.mrf.mxu1  ;;  %v4561_v39 = vpop.f32.mrf.mxu0 }
 0x3c5   : > { %v5027_v43 = vsel %vm2282_vm2, %v4937_v23, %v4938_v25  ;;  %v5028_v22 = vsel %vm2282_vm2, %v4936_v44, %v4937_v23  ;;  %v5029_v18 = vsel %vm2282_vm2, %v4935_v5, %v4936_v44  ;;  %v4562_v27 = vadd.f32 %v4561_v39, %v4336_v62 }
 0x3c6   : > { %v5033_v41 = vadd.f32 %v5027_v43, %v8708_v2  ;;  %v5031_v31 = vadd.f32 %v5029_v18, %v8695_v17  ;;  %v5032_v56 = vadd.f32 %v5028_v22, %v8701_v1  ;;  %v4338_v32 = vpop.f32.mrf.mxu1  ;;  %v6055_v3 = vpop.f32.mrf.mxu0  ;;  %v5218_v39 = vsel %vm2282_vm2, %v5130_v57, %v5131_v19 }
 0x3c7   : > { %v4939_v9 = vrot.slane %v4562_v27, 2  ;;  %v5132_v22 = vrot.slane %v5084_v20, 2 }
 0x3c8   : > { %v5225_v23 = vadd.f32 %v5219_v6, %v5033_v41  ;;  %v5223_v44 = vadd.f32 %v5221_v24, %v5031_v31  ;;  %v5224_v2 = vadd.f32 %v5220_v30, %v5032_v56  ;;  %v4339_v62 = vpop.f32.mrf.mxu1  ;;  %v4564_v17 = vpop.f32.mrf.mxu0  ;;  %v5085_v24 = vld [vmem:[%s6490_s22 + $0x60] sm:$0xff] }
 0x3c9   : > { %v5026_v1 = vsel %vm2282_vm2, %v4938_v25, %v4939_v9  ;;  %v4565_v43 = vadd.f32 %v4564_v17, %v4339_v62  ;;  %v5217_v57 = vsel %vm2282_vm2, %v5131_v19, %v5132_v22  ;;  %v5133_v32 = vrot.slane %v5085_v24, 2 }
 0x3ca   : > { %5273 = vst [vmem:[%s9027_s10 + $0x10] sm:$0xff] %v5225_v23  ;;  %5271 = vst [vmem:[%s9027_s10] sm:$0xff] %v5223_v44  ;;  %v5034_v18 = vadd.f32 %v5026_v1, %v8713_v15  ;;  %v4341_v6 = vpop.f32.mrf.mxu1  ;;  %v6058_v41 = vpop.f32.mrf.mxu0  ;;  %v5086_v23 = vld [vmem:[%s6490_s22 + $0x68] sm:$0xff] }
 0x3cb   : > { %5272 = vst [vmem:[%s9027_s10 + $0x8] sm:$0xff] %v5224_v2  ;;  %v4940_v30 = vrot.slane %v4565_v43, 2  ;;  %v5087_v43 = vld [vmem:[%s6490_s22 + $0x70] sm:$0xff] }
 0x3cc   : > { %v5226_v27 = vadd.f32 %v5218_v39, %v5034_v18  ;;  %v4344_v31 = vpop.f32.mrf.mxu1  ;;  %v4577_v62 = vpop.f32.mrf.mxu0 }
 0x3cd   : > { %v5025_v25 = vsel %vm2282_vm2, %v4939_v9, %v4940_v30  ;;  %v4570_v56 = vadd.f32 %v6054_v61, %v4344_v31  ;;  %v5216_v9 = vsel %vm2282_vm2, %v5132_v22, %v5133_v32  ;;  %v5134_v61 = vrot.slane %v5086_v23, 2 }
 0x3ce   : > { %5274 = vst [vmem:[%s9027_s10 + $0x18] sm:$0xff] %v5226_v27  ;;  %v5035_v20 = vadd.f32 %v5025_v25, %v8722_v4  ;;  %v4346_v15 = vpop.f32.mrf.mxu1  ;;  %v6059_v24 = vpop.f32.mrf.mxu0 }
 0x3cf   : > { %v4941_v44 = vrot.slane %v4570_v56, 2 }
 0x3d0   : > { %v5227_v2 = vadd.f32 %v5217_v57, %v5035_v20  ;;  %v4347_v17 = vpop.f32.mrf.mxu1  ;;  %v5088_v57 = vld [vmem:[%s6490_s22 + $0x78] sm:$0xff]  ;;  %v4580_v15 = vpop.f32.mrf.mxu0 }
 0x3d1   : > { %v5024_v1 = vsel %vm2282_vm2, %v4940_v30, %v4941_v44  ;;  %v4573_v19 = vadd.f32 %v6055_v3, %v4347_v17  ;;  %v5215_v30 = vsel %vm2282_vm2, %v5133_v32, %v5134_v61  ;;  %v5135_v3 = vrot.slane %v5087_v43, 2 }
 0x3d2   : > { %5275 = vst [vmem:[%s9027_s10 + $0x20] sm:$0xff] %v5227_v2  ;;  %v5036_v39 = vadd.f32 %v5024_v1, %v8727_v21  ;;  %v4349_v4 = vpop.f32.mrf.mxu1  ;;  %v5089_v1 = vld [vmem:[%s6490_s22 + $0x80] sm:$0xff] }
 0x3d3   : > { %v4942_v18 = vrot.slane %v4573_v19, 2  ;;  %v6062_v19 = vpop.f32.mrf.mxu0 }
 0x3d4   : > { %v5228_v6 = vadd.f32 %v5216_v9, %v5036_v39  ;;  %v4352_v27 = vpop.f32.mrf.mxu1 }
 0x3d5   : > { %v5023_v31 = vsel %vm2282_vm2, %v4941_v44, %v4942_v18  ;;  %v4578_v22 = vadd.f32 %v4577_v62, %v4352_v27  ;;  %v5214_v44 = vsel %vm2282_vm2, %v5134_v61, %v5135_v3  ;;  %v5136_v62 = vrot.slane %v5088_v57, 2 }
 0x3d6   : > { %5276 = vst [vmem:[%s9027_s10 + $0x28] sm:$0xff] %v5228_v6  ;;  %v5037_v25 = vadd.f32 %v5023_v31, %v8736_v14  ;;  %v4354_v21 = vpop.f32.mrf.mxu1  ;;  %v5137_v6 = vrot.slane %v5089_v1, 2  ;;  %v5090_v31 = vld [vmem:[%s6490_s22 + $0x88] sm:$0xff] }
 0x3d7   : > { %v4943_v56 = vrot.slane %v4578_v22, 2  ;;  %v4593_v22 = vpop.f32.mrf.mxu0 }
 0x3d8   : > { %v5229_v20 = vadd.f32 %v5215_v30, %v5037_v25  ;;  %v4355_v23 = vpop.f32.mrf.mxu1 }
 0x3d9   : > { %v5022_v2 = vsel %vm2282_vm2, %v4942_v18, %v4943_v56  ;;  %v4581_v32 = vadd.f32 %v4580_v15, %v4355_v23  ;;  %v5213_v18 = vsel %vm2282_vm2, %v5135_v3, %v5136_v62  ;;  %v5091_v15 = vld [vmem:[%s6490_s22 + $0x90] sm:$0xff] }
 0x3da   : > { %5277 = vst [vmem:[%s9027_s10 + $0x30] sm:$0xff] %v5229_v20  ;;  %v5038_v17 = vadd.f32 %v5022_v2, %v8741_v0  ;;  %v4357_v14 = vpop.f32.mrf.mxu1  ;;  %v6063_v2 = vpop.f32.mrf.mxu0 }
 0x3db   : > { %v4944_v9 = vrot.slane %v4581_v32, 2 }
 0x3dc   : > { %v5230_v39 = vadd.f32 %v5214_v44, %v5038_v17  ;;  %v4360_v4 = vpop.f32.mrf.mxu1 }
 0x3dd   : > { %v5021_v43 = vsel %vm2282_vm2, %v4943_v56, %v4944_v9  ;;  %v4586_v61 = vadd.f32 %v6058_v41, %v4360_v4  ;;  %v5212_v56 = vsel %vm2282_vm2, %v5136_v62, %v5137_v6  ;;  %v5138_v41 = vrot.slane %v5090_v31, 2  ;;  %v4596_v4 = vpop.f32.mrf.mxu0 }
 0x3de   : > { %5278 = vst [vmem:[%s9027_s10 + $0x38] sm:$0xff] %v5230_v39  ;;  %v5039_v27 = vadd.f32 %v5021_v43, %v8750_v63  ;;  %v4362_v0 = vpop.f32.mrf.mxu1 }
 0x3df   : > { %v4945_v30 = vrot.slane %v4586_v61, 2  ;;  %v5211_v14 = vsel %vm2282_vm2, %v5137_v6, %v5138_v41 }
 0x3e0   : > { %v5231_v25 = vadd.f32 %v5213_v18, %v5039_v27  ;;  %v4363_v21 = vpop.f32.mrf.mxu1 }
 0x3e1   : > { %v5020_v57 = vsel %vm2282_vm2, %v4944_v9, %v4945_v30  ;;  %v4589_v3 = vadd.f32 %v6059_v24, %v4363_v21  ;;  %v5139_v24 = vrot.slane %v5091_v15, 2  ;;  %v5092_v9 = vld [vmem:[%s6490_s22 + $0x98] sm:$0xff]  ;;  %v5094_v15 = vld [vmem:[%s6490_s22 + $0xa8] sm:$0xff] }
 0x3e2   : > { %5279 = vst [vmem:[%s9027_s10 + $0x40] sm:$0xff] %v5231_v25  ;;  %v5040_v20 = vadd.f32 %v5020_v57, %v8755_v38  ;;  %v4365_v63 = vpop.f32.mrf.mxu1  ;;  %v5140_v0 = vrot.slane %v5092_v9, 2  ;;  %v6066_v25 = vpop.f32.mrf.mxu0 }
 0x3e3   : > { %v4946_v23 = vrot.slane %v4589_v3, 2  ;;  %v5210_v27 = vsel %vm2282_vm2, %v5138_v41, %v5139_v24 }
 0x3e4   : > { %v5232_v44 = vadd.f32 %v5212_v56, %v5040_v20  ;;  %v4368_v32 = vpop.f32.mrf.mxu1  ;;  %v5209_v3 = vsel %vm2282_vm2, %v5139_v24, %v5140_v0 }
 0x3e5   : > { %v5019_v17 = vsel %vm2282_vm2, %v4945_v30, %v4946_v23  ;;  %v4594_v62 = vadd.f32 %v4593_v22, %v4368_v32  ;;  %v5093_v30 = vld [vmem:[%s6490_s22 + $0xa0] sm:$0xff] }
 0x3e6   : > { %5280 = vst [vmem:[%s9027_s10 + $0x48] sm:$0xff] %v5232_v44  ;;  %v5041_v1 = vadd.f32 %v5019_v17, %v8764_v48  ;;  %v4370_v38 = vpop.f32.mrf.mxu1  ;;  %v5141_v20 = vrot.slane %v5093_v30, 2  ;;  %v4609_v44 = vpop.f32.mrf.mxu0 }
 0x3e7   : > { %v4947_v39 = vrot.slane %v4594_v62, 2  ;;  %v5095_v38 = vld [vmem:[%s6490_s22 + $0xb0] sm:$0xff] }
 0x3e8   : > { %v5233_v43 = vadd.f32 %v5211_v14, %v5041_v1  ;;  %v4371_v18 = vpop.f32.mrf.mxu1  ;;  %v5208_v62 = vsel %vm2282_vm2, %v5140_v0, %v5141_v20  ;;  %v5096_v0 = vld [vmem:[%s6490_s22 + $0xb8] sm:$0xff] }
 0x3e9   : > { %v5018_v61 = vsel %vm2282_vm2, %v4946_v23, %v4947_v39  ;;  %v4597_v6 = vadd.f32 %v4596_v4, %v4371_v18 }
 0x3ea   : > { %5281 = vst [vmem:[%s9027_s10 + $0x50] sm:$0xff] %v5233_v43  ;;  %v5042_v31 = vadd.f32 %v5018_v61, %v8769_v34  ;;  %v4373_v48 = vpop.f32.mrf.mxu1 }
 0x3eb   : > { %v4948_v22 = vrot.slane %v4597_v6, 2 }
 0x3ec   : > { %v5234_v21 = vadd.f32 %v5210_v27, %v5042_v31  ;;  %v4376_v57 = vpop.f32.mrf.mxu1 }
 0x3ed   : > { %v5017_v56 = vsel %vm2282_vm2, %v4947_v39, %v4948_v22  ;;  %v4602_v41 = vadd.f32 %v6062_v19, %v4376_v57  ;;  %v5142_v19 = vrot.slane %v5094_v15, 2  ;;  %v6067_v39 = vpop.f32.mrf.mxu0 }
 0x3ee   : > { %5282 = vst [vmem:[%s9027_s10 + $0x58] sm:$0xff] %v5234_v21  ;;  %v5043_v63 = vadd.f32 %v5017_v56, %v8778_v36  ;;  %v4378_v34 = vpop.f32.mrf.mxu1 }
 0x3ef   : > { %v4949_v23 = vrot.slane %v4602_v41, 2  ;;  %v5207_v61 = vsel %vm2282_vm2, %v5141_v20, %v5142_v19  ;;  %v4612_v48 = vpop.f32.mrf.mxu0  ;;  %v5097_v20 = vld [vmem:[%s6490_s22 + $0xc0] sm:$0xff] }
 0x3f0   : > { %v5235_v32 = vadd.f32 %v5209_v3, %v5043_v63  ;;  %v4379_v17 = vpop.f32.mrf.mxu1  ;;  %v5144_v3 = vrot.slane %v5096_v0, 2 }
 0x3f1   : > { %v5016_v14 = vsel %vm2282_vm2, %v4948_v22, %v4949_v23  ;;  %v4605_v24 = vadd.f32 %v6063_v2, %v4379_v17  ;;  %v5143_v2 = vrot.slane %v5095_v38, 2  ;;  %v6070_v34 = vpop.f32.mrf.mxu0 }
 0x3f2   : > { %5283 = vst [vmem:[%s9027_s10 + $0x60] sm:$0xff] %v5235_v32  ;;  %v5044_v1 = vadd.f32 %v5016_v14, %v8783_v16  ;;  %v4381_v36 = vpop.f32.mrf.mxu1  ;;  %v5145_v14 = vrot.slane %v5097_v20, 2 }
 0x3f3   : > { %v4950_v9 = vrot.slane %v4605_v24, 2  ;;  %v5206_v57 = vsel %vm2282_vm2, %v5142_v19, %v5143_v2  ;;  %v5205_v32 = vsel %vm2282_vm2, %v5143_v2, %v5144_v3  ;;  %v5098_v24 = vld [vmem:[%s6490_s22 + $0xc8] sm:$0xff] }
 0x3f4   : > { %v5236_v4 = vadd.f32 %v5208_v62, %v5044_v1  ;;  %v4384_v43 = vpop.f32.mrf.mxu1  ;;  %v4625_v1 = vpop.f32.mrf.mxu0 }
 0x3f5   : > { %v5015_v18 = vsel %vm2282_vm2, %v4949_v23, %v4950_v9  ;;  %v4610_v27 = vadd.f32 %v4609_v44, %v4384_v43 }
 0x3f6   : > { %5284 = vst [vmem:[%s9027_s10 + $0x68] sm:$0xff] %v5236_v4  ;;  %v5045_v6 = vadd.f32 %v5015_v18, %v8792_v54  ;;  %v4386_v16 = vpop.f32.mrf.mxu1  ;;  %v5204_v4 = vsel %vm2282_vm2, %v5144_v3, %v5145_v14  ;;  %v6071_v2 = vpop.f32.mrf.mxu0 }
 0x3f7   : > { %v4951_v31 = vrot.slane %v4610_v27, 2 }
 0x3f8   : > { %v5237_v30 = vadd.f32 %v5207_v61, %v5045_v6  ;;  %v4387_v22 = vpop.f32.mrf.mxu1  ;;  %v5099_v61 = vld [vmem:[%s6490_s22 + $0xd0] sm:$0xff] }
 0x3f9   : > { %v5014_v21 = vsel %vm2282_vm2, %v4950_v9, %v4951_v31  ;;  %v4613_v56 = vadd.f32 %v4612_v48, %v4387_v22  ;;  %v5100_v22 = vld [vmem:[%s6490_s22 + $0xd8] sm:$0xff] }
 0x3fa   : > { %5285 = vst [vmem:[%s9027_s10 + $0x70] sm:$0xff] %v5237_v30  ;;  %v5046_v41 = vadd.f32 %v5014_v21, %v8797_v52  ;;  %v4389_v54 = vpop.f32.mrf.mxu1 }
 0x3fb   : > { %v4952_v63 = vrot.slane %v4613_v56, 2 }
 0x3fc   : > { %v5238_v15 = vadd.f32 %v5206_v57, %v5046_v41  ;;  %v4392_v23 = vpop.f32.mrf.mxu1  ;;  %v4628_v57 = vpop.f32.mrf.mxu0 }
 0x3fd   : > { %v5013_v44 = vsel %vm2282_vm2, %v4951_v31, %v4952_v63  ;;  %v4618_v17 = vadd.f32 %v6066_v25, %v4392_v23  ;;  %v5146_v25 = vrot.slane %v5098_v24, 2  ;;  %v5101_v23 = vld [vmem:[%s6490_s22 + $0xe0] sm:$0xff] }
 0x3fe   : > { %5286 = vst [vmem:[%s9027_s10 + $0x78] sm:$0xff] %v5238_v15  ;;  %v5047_v62 = vadd.f32 %v5013_v44, %v8806_v46  ;;  %v4394_v52 = vpop.f32.mrf.mxu1 }
 0x3ff   : > { %v4953_v19 = vrot.slane %v4618_v17, 2  ;;  %v5203_v31 = vsel %vm2282_vm2, %v5145_v14, %v5146_v25 }
 0x400   : > { %v5239_v36 = vadd.f32 %v5205_v32, %v5047_v62  ;;  %v4395_v38 = vpop.f32.mrf.mxu1  ;;  %v6074_v32 = vpop.f32.mrf.mxu0 }
 0x401   : > { %v5012_v9 = vsel %vm2282_vm2, %v4952_v63, %v4953_v19  ;;  %v4621_v43 = vadd.f32 %v6067_v39, %v4395_v38  ;;  %v5147_v39 = vrot.slane %v5099_v61, 2  ;;  %v5148_v63 = vrot.slane %v5100_v22, 2  ;;  %v5104_v22 = vld [vmem:[%s6490_s22 + $0xf8] sm:$0xff] }
 0x402   : > { %5287 = vst [vmem:[%s9027_s10 + $0x80] sm:$0xff] %v5239_v36  ;;  %v5048_v18 = vadd.f32 %v5012_v9, %v8811_v58  ;;  %v4397_v46 = vpop.f32.mrf.mxu1  ;;  %v5102_v36 = vld [vmem:[%s6490_s22 + $0xe8] sm:$0xff]  ;;  %v4641_v9 = vpop.f32.mrf.mxu0 }
 0x403   : > { %v4954_v27 = vrot.slane %v4621_v43, 2  ;;  %v5202_v54 = vsel %vm2282_vm2, %v5146_v25, %v5147_v39  ;;  %v5201_v52 = vsel %vm2282_vm2, %v5147_v39, %v5148_v63 }
 0x404   : > { %v5240_v6 = vadd.f32 %v5204_v4, %v5048_v18  ;;  %v4400_v16 = vpop.f32.mrf.mxu1 }
 0x405   : > { %v5011_v0 = vsel %vm2282_vm2, %v4953_v19, %v4954_v27  ;;  %v4626_v48 = vadd.f32 %v4625_v1, %v4400_v16  ;;  %v5149_v19 = vrot.slane %v5101_v23, 2  ;;  %v6075_v16 = vpop.f32.mrf.mxu0 }
 0x406   : > { %5288 = vst [vmem:[%s9027_s10 + $0x88] sm:$0xff] %v5240_v6  ;;  %v5049_v30 = vadd.f32 %v5011_v0, %v8820_v29  ;;  %v4402_v58 = vpop.f32.mrf.mxu1 }
 0x407   : > { %v4955_v21 = vrot.slane %v4626_v48, 2  ;;  %v5200_v18 = vsel %vm2282_vm2, %v5148_v63, %v5149_v19  ;;  %v5152_v63 = vrot.slane %v5104_v22, 2 }
 0x408   : > { %v5241_v56 = vadd.f32 %v5203_v31, %v5049_v30  ;;  %v4403_v3 = vpop.f32.mrf.mxu1 }
 0x409   : > { %v5010_v41 = vsel %vm2282_vm2, %v4954_v27, %v4955_v21  ;;  %v4629_v20 = vadd.f32 %v4628_v57, %v4403_v3  ;;  %v5103_v27 = vld [vmem:[%s6490_s22 + $0xf0] sm:$0xff]  ;;  %v4644_v57 = vpop.f32.mrf.mxu0 }
 0x40a   : > { %5289 = vst [vmem:[%s9027_s10 + $0x90] sm:$0xff] %v5241_v56  ;;  %v5050_v15 = vadd.f32 %v5010_v41, %v8825_v53  ;;  %v4405_v29 = vpop.f32.mrf.mxu1 }
 0x40b   : > { %v4956_v44 = vrot.slane %v4629_v20, 2  ;;  %v5105_v29 = vld [vmem:[%s6490_s22 + $0x100] sm:$0xff] }
 0x40c   : > { %v5242_v17 = vadd.f32 %v5202_v54, %v5050_v15  ;;  %v4408_v14 = vpop.f32.mrf.mxu1 }
 0x40d   : > { %v5009_v62 = vsel %vm2282_vm2, %v4955_v21, %v4956_v44  ;;  %v4634_v24 = vadd.f32 %v6070_v34, %v4408_v14  ;;  %v5150_v34 = vrot.slane %v5102_v36, 2 }
 0x40e   : > { %5290 = vst [vmem:[%s9027_s10 + $0x98] sm:$0xff] %v5242_v17  ;;  %v5051_v1 = vadd.f32 %v5009_v62, %v8833_v11  ;;  %v4410_v53 = vpop.f32.mrf.mxu1 }
 0x40f   : > { %v4957_v38 = vrot.slane %v4634_v24, 2  ;;  %v5199_v39 = vsel %vm2282_vm2, %v5149_v19, %v5150_v34  ;;  %v5153_v19 = vrot.slane %v5105_v29, 2  ;;  %v5106_v53 = vld [vmem:[%s6490_s22 + $0x108] sm:$0xff] }
 0x410   : > { %v5243_v4 = vadd.f32 %v5201_v52, %v5051_v1  ;;  %v4411_v43 = vpop.f32.mrf.mxu1 }
 0x411   : > { %v5008_v25 = vsel %vm2282_vm2, %v4956_v44, %v4957_v38  ;;  %v4637_v46 = vadd.f32 %v6071_v2, %v4411_v43  ;;  %v5151_v2 = vrot.slane %v5103_v27, 2  ;;  %v6078_v44 = vpop.f32.mrf.mxu0 }
 0x412   : > { %5291 = vst [vmem:[%s9027_s10 + $0xa0] sm:$0xff] %v5243_v4  ;;  %v5052_v61 = vadd.f32 %v5008_v25, %v8838_v33  ;;  %v4413_v11 = vpop.f32.mrf.mxu1  ;;  %v5196_v25 = vsel %vm2282_vm2, %v5152_v63, %v5153_v19 }
 0x413   : > { %v4958_v6 = vrot.slane %v4637_v46, 2  ;;  %v5198_v54 = vsel %vm2282_vm2, %v5150_v34, %v5151_v2  ;;  %v5197_v52 = vsel %vm2282_vm2, %v5151_v2, %v5152_v63  ;;  %v5107_v34 = vld [vmem:[%s6490_s22 + $0x110] sm:$0xff] }
 0x414   : > { %v5244_v0 = vadd.f32 %v5200_v18, %v5052_v61  ;;  %v4416_v31 = vpop.f32.mrf.mxu1 }
 0x415   : > { %v5007_v48 = vsel %vm2282_vm2, %v4957_v38, %v4958_v6  ;;  %v4642_v30 = vadd.f32 %v4641_v9, %v4416_v31  ;;  %v4657_v38 = vpop.f32.mrf.mxu0 }
 0x416   : > { %5292 = vst [vmem:[%s9027_s10 + $0xa8] sm:$0xff] %v5244_v0  ;;  %v5053_v58 = vadd.f32 %v5007_v48, %v8845_v55  ;;  %v4418_v33 = vpop.f32.mrf.mxu1 }
 0x417   : > { %v4959_v21 = vrot.slane %v4642_v30, 2  ;;  %v6079_v11 = vpop.f32.mrf.mxu0  ;;  %v5108_v30 = vld [vmem:[%s6490_s22 + $0x118] sm:$0xff] }
 0x418   : > { %v5245_v56 = vadd.f32 %v5199_v39, %v5053_v58  ;;  %v4419_v3 = vpop.f32.mrf.mxu1 }
 0x419   : > { %v5006_v41 = vsel %vm2282_vm2, %v4958_v6, %v4959_v21  ;;  %v4645_v20 = vadd.f32 %v4644_v57, %v4419_v3  ;;  %v4660_v58 = vpop.f32.mrf.mxu0  ;;  %v5156_v3 = vrot.slane %v5108_v30, 2 }
 0x41a   : > { %5293 = vst [vmem:[%s9027_s10 + $0xb0] sm:$0xff] %v5245_v56  ;;  %v5054_v15 = vadd.f32 %v5006_v41, %v8850_v42  ;;  %v4421_v55 = vpop.f32.mrf.mxu1 }
 0x41b   : > { %v4960_v23 = vrot.slane %v4645_v20, 2  ;;  %v6082_v63 = vpop.f32.mrf.mxu0 }
 0x41c   : > { %v5246_v17 = vadd.f32 %v5198_v54, %v5054_v15  ;;  %v4424_v14 = vpop.f32.mrf.mxu1  ;;  %v5109_v54 = vld [vmem:[%s6490_s22 + $0x120] sm:$0xff] }
 0x41d   : > { %v5005_v62 = vsel %vm2282_vm2, %v4959_v21, %v4960_v23  ;;  %v4650_v24 = vadd.f32 %v6074_v32, %v4424_v14  ;;  %v5154_v32 = vrot.slane %v5106_v53, 2  ;;  %v5157_v14 = vrot.slane %v5109_v54, 2 }
 0x41e   : > { %5294 = vst [vmem:[%s9027_s10 + $0xb8] sm:$0xff] %v5246_v17  ;;  %v5055_v1 = vadd.f32 %v5005_v62, %v8857_v13  ;;  %v4426_v42 = vpop.f32.mrf.mxu1 }
 0x41f   : > { %v4961_v36 = vrot.slane %v4650_v24, 2  ;;  %v5195_v31 = vsel %vm2282_vm2, %v5153_v19, %v5154_v32  ;;  %v4673_v19 = vpop.f32.mrf.mxu0 }
 0x420   : > { %v5247_v9 = vadd.f32 %v5197_v52, %v5055_v1  ;;  %v4427_v4 = vpop.f32.mrf.mxu1  ;;  %v5110_v52 = vld [vmem:[%s6490_s22 + $0x128] sm:$0xff] }
 0x421   : > { %v5004_v43 = vsel %vm2282_vm2, %v4960_v23, %v4961_v36  ;;  %v4653_v18 = vadd.f32 %v6075_v16, %v4427_v4  ;;  %v5155_v16 = vrot.slane %v5107_v34, 2  ;;  %v5111_v4 = vld [vmem:[%s6490_s22 + $0x130] sm:$0xff] }
 0x422   : > { %5295 = vst [vmem:[%s9027_s10 + $0xc0] sm:$0xff] %v5247_v9  ;;  %v5056_v46 = vadd.f32 %v5004_v43, %v8862_v50  ;;  %v4429_v13 = vpop.f32.mrf.mxu1 }
 0x423   : > { %v4962_v61 = vrot.slane %v4653_v18, 2  ;;  %v5194_v57 = vsel %vm2282_vm2, %v5154_v32, %v5155_v16  ;;  %v5193_v23 = vsel %vm2282_vm2, %v5155_v16, %v5156_v3 }
 0x424   : > { %v5248_v27 = vadd.f32 %v5196_v25, %v5056_v46  ;;  %v4432_v6 = vpop.f32.mrf.mxu1  ;;  %v6083_v25 = vpop.f32.mrf.mxu0 }
 0x425   : > { %v5003_v0 = vsel %vm2282_vm2, %v4961_v36, %v4962_v61  ;;  %v4658_v48 = vadd.f32 %v4657_v38, %v4432_v6  ;;  %v5192_v36 = vsel %vm2282_vm2, %v5156_v3, %v5157_v14 }
 0x426   : > { %5296 = vst [vmem:[%s9027_s10 + $0xc8] sm:$0xff] %v5248_v27  ;;  %v5057_v39 = vadd.f32 %v5003_v0, %v8869_v49  ;;  %v4434_v50 = vpop.f32.mrf.mxu1  ;;  %v5112_v27 = vld [vmem:[%s6490_s22 + $0x138] sm:$0xff]  ;;  %v4676_v0 = vpop.f32.mrf.mxu0 }
 0x427   : > { %v4963_v2 = vrot.slane %v4658_v48, 2  ;;  %v5160_v30 = vrot.slane %v5112_v27, 2 }
 0x428   : > { %v5249_v33 = vadd.f32 %v5195_v31, %v5057_v39  ;;  %v4435_v22 = vpop.f32.mrf.mxu1 }
 0x429   : > { %v5002_v21 = vsel %vm2282_vm2, %v4962_v61, %v4963_v2  ;;  %v4661_v56 = vadd.f32 %v4660_v58, %v4435_v22  ;;  %v5159_v61 = vrot.slane %v5111_v4, 2  ;;  %v5113_v58 = vld [vmem:[%s6490_s22 + $0x140] sm:$0xff]  ;;  %v6086_v22 = vpop.f32.mrf.mxu0 }
 0x42a   : > { %5297 = vst [vmem:[%s9027_s10 + $0xd0] sm:$0xff] %v5249_v33  ;;  %v5058_v41 = vadd.f32 %v5002_v21, %v8874_v35  ;;  %v4437_v49 = vpop.f32.mrf.mxu1 }
 0x42b   : > { %v4964_v20 = vrot.slane %v4661_v56, 2  ;;  %v5189_v3 = vsel %vm2282_vm2, %v5159_v61, %v5160_v30  ;;  %v5161_v49 = vrot.slane %v5113_v58, 2  ;;  %v5118_v58 = vld [vmem:[%s6490_s22 + $0x168] sm:$0xff] }
 0x42c   : > { %v5250_v15 = vadd.f32 %v5194_v57, %v5058_v41  ;;  %v4440_v55 = vpop.f32.mrf.mxu1 }
 0x42d   : > { %v5001_v29 = vsel %vm2282_vm2, %v4963_v2, %v4964_v20  ;;  %v4666_v17 = vadd.f32 %v6078_v44, %v4440_v55  ;;  %v5158_v44 = vrot.slane %v5110_v52, 2  ;;  %v4689_v55 = vpop.f32.mrf.mxu0  ;;  %v5115_v52 = vld [vmem:[%s6490_s22 + $0x150] sm:$0xff] }
 0x42e   : > { %5298 = vst [vmem:[%s9027_s10 + $0xd8] sm:$0xff] %v5250_v15  ;;  %v5059_v62 = vadd.f32 %v5001_v29, %v8881_v12  ;;  %v4442_v35 = vpop.f32.mrf.mxu1 }
 0x42f   : > { %v4965_v24 = vrot.slane %v4666_v17, 2  ;;  %v5191_v13 = vsel %vm2282_vm2, %v5157_v14, %v5158_v44  ;;  %v5190_v39 = vsel %vm2282_vm2, %v5158_v44, %v5159_v61  ;;  %v5188_v14 = vsel %vm2282_vm2, %v5160_v30, %v5161_v49  ;;  %v9598_v61 = vld [vmem:[#allocation4_spill] sm:$0xff]  ;;  %v9599_v30 = vld [vmem:[#allocation14_spill] sm:$0xff] }
 0x430   : > { %v5251_v1 = vadd.f32 %v5193_v23, %v5059_v62  ;;  %v4443_v42 = vpop.f32.mrf.mxu1  ;;  %v5163_v44 = vrot.slane %v5115_v52, 2 }
 0x431   : > { %v5000_v53 = vsel %vm2282_vm2, %v4964_v20, %v4965_v24  ;;  %v4669_v38 = vadd.f32 %v6079_v11, %v4443_v42  ;;  %v5114_v20 = vld [vmem:[%s6490_s22 + $0x148] sm:$0xff] }
 0x432   : > { %5299 = vst [vmem:[%s9027_s10 + $0xe0] sm:$0xff] %v5251_v1  ;;  %v5060_v9 = vadd.f32 %v5000_v53, %v8886_v59  ;;  %v4445_v12 = vpop.f32.mrf.mxu1 }
 0x433   : > { %v4966_v43 = vrot.slane %v4669_v38, 2  ;;  %v5116_v12 = vld [vmem:[%s6490_s22 + $0x158] sm:$0xff] }
 0x434   : > { %v5252_v18 = vadd.f32 %v5192_v36, %v5060_v9  ;;  %v4448_v32 = vpop.f32.mrf.mxu1 }
 0x435   : > { %v4999_v46 = vsel %vm2282_vm2, %v4965_v24, %v4966_v43  ;;  %v4674_v34 = vadd.f32 %v4673_v19, %v4448_v32  ;;  %v6087_v19 = vpop.f32.mrf.mxu0 }
 0x436   : > { %5300 = vst [vmem:[%s9027_s10 + $0xe8] sm:$0xff] %v5252_v18  ;;  %v5061_v11 = vadd.f32 %v4999_v46, %v8893_v26  ;;  %v4450_v59 = vpop.f32.mrf.mxu1 }
 0x437   : > { %v4967_v6 = vrot.slane %v4674_v34, 2  ;;  %v5164_v34 = vrot.slane %v5116_v12, 2  ;;  %v5117_v59 = vld [vmem:[%s6490_s22 + $0x160] sm:$0xff]  ;;  %v9602_v12 = vld [vmem:[#allocation6_spill] sm:$0xff] }
 0x438   : > { %v5253_v31 = vadd.f32 %v5191_v13, %v5061_v11  ;;  %v4451_v48 = vpop.f32.mrf.mxu1 }
 0x439   : > { %v4998_v16 = vsel %vm2282_vm2, %v4966_v43, %v4967_v6  ;;  %v4677_v50 = vadd.f32 %v4676_v0, %v4451_v48  ;;  %v4692_v43 = vpop.f32.mrf.mxu0 }
 0x43a   : > { %5301 = vst [vmem:[%s9027_s10 + $0xf0] sm:$0xff] %v5253_v31  ;;  %v5062_v2 = vadd.f32 %v4998_v16, %v8898_v37  ;;  %v4453_v26 = vpop.f32.mrf.mxu1  ;;  %v5185_v16 = vsel %vm2282_vm2, %v5163_v44, %v5164_v34 }
 0x43b   : > { %v4968_v33 = vrot.slane %v4677_v50, 2  ;;  %v5165_v50 = vrot.slane %v5117_v59, 2  ;;  %v9603_v59 = vld [vmem:[#allocation18_spill] sm:$0xff] }
 0x43c   : > { %v5254_v21 = vadd.f32 %v5190_v39, %v5062_v2  ;;  %v4456_v57 = vpop.f32.mrf.mxu1 }
 0x43d   : > { %v4997_v56 = vsel %vm2282_vm2, %v4967_v6, %v4968_v33  ;;  %v4682_v41 = vadd.f32 %v6082_v63, %v4456_v57  ;;  %v5162_v63 = vrot.slane %v5114_v20, 2  ;;  %v6090_v6 = vpop.f32.mrf.mxu0 }
 0x43e   : > { %5302 = vst [vmem:[%s9027_s10 + $0xf8] sm:$0xff] %v5254_v21  ;;  %v5063_v54 = vadd.f32 %v4997_v56, %v8905_v51  ;;  %v4458_v37 = vpop.f32.mrf.mxu1 }
 0x43f   : > { %v4969_v15 = vrot.slane %v4682_v41, 2  ;;  %v5187_v36 = vsel %vm2282_vm2, %v5161_v49, %v5162_v63  ;;  %v5186_v46 = vsel %vm2282_vm2, %v5162_v63, %v5163_v44  ;;  %v4705_v21 = vpop.f32.mrf.mxu0  ;;  %v5184_v41 = vsel %vm2282_vm2, %v5164_v34, %v5165_v50 }
 0x440   : > { %v5255_v29 = vadd.f32 %v5189_v3, %v5063_v54  ;;  %v4459_v23 = vpop.f32.mrf.mxu1  ;;  %v9600_v54 = vld [vmem:[#allocation5_spill] sm:$0xff] }
 0x441   : > { %v4996_v17 = vsel %vm2282_vm2, %v4968_v33, %v4969_v15  ;;  %v4685_v62 = vadd.f32 %v6083_v25, %v4459_v23 }
 0x442   : > { %5303 = vst [vmem:[%s9027_s10 + $0x100] sm:$0xff] %v5255_v29  ;;  %v5064_v35 = vadd.f32 %v4996_v17, %v8910_v60  ;;  %v4461_v51 = vpop.f32.mrf.mxu1  ;;  %v6091_v29 = vpop.f32.mrf.mxu0 }
 0x443   : > { %v4970_v24 = vrot.slane %v4685_v62, 2  ;;  %v9601_v51 = vld [vmem:[#allocation16_spill] sm:$0xff] }
 0x444   : > { %v5256_v1 = vadd.f32 %v5188_v14, %v5064_v35  ;;  %v4464_v42 = vpop.f32.mrf.mxu1 }
 0x445   : > { %v4995_v53 = vsel %vm2282_vm2, %v4969_v15, %v4970_v24  ;;  %v4690_v38 = vadd.f32 %v4689_v55, %v4464_v42  ;;  %v5119_v15 = vld [vmem:[%s6490_s22 + $0x170] sm:$0xff]  ;;  %v4708_v42 = vpop.f32.mrf.mxu0 }
 0x446   : > { %5304 = vst [vmem:[%s9027_s10 + $0x108] sm:$0xff] %v5256_v1  ;;  %v5065_v9 = vadd.f32 %v4995_v53, %v8917_v45  ;;  %v4466_v60 = vpop.f32.mrf.mxu1  ;;  %v5167_v35 = vrot.slane %v5119_v15, 2  ;;  %v9605_v15 = vld [vmem:[#allocation20_spill] sm:$0xff] }
 0x447   : > { %v4971_v4 = vrot.slane %v4690_v38, 2 }
 0x448   : > { %v5257_v25 = vadd.f32 %v5187_v36, %v5065_v9  ;;  %v4467_v18 = vpop.f32.mrf.mxu1 }
 0x449   : > { %v4994_v32 = vsel %vm2282_vm2, %v4970_v24, %v4971_v4  ;;  %v4693_v13 = vadd.f32 %v4692_v43, %v4467_v18  ;;  %v6094_v18 = vpop.f32.mrf.mxu0 }
 0x44a   : > { %5305 = vst [vmem:[%s9027_s10 + $0x110] sm:$0xff] %v5257_v25  ;;  %v5066_v11 = vadd.f32 %v4994_v32, %v9598_v61  ;;  %v4469_v45 = vpop.f32.mrf.mxu1  ;;  %v5121_v25 = vld [vmem:[%s6490_s22 + $0x180] sm:$0xff] }
 0x44b   : > { %v4972_v27 = vrot.slane %v4693_v13, 2  ;;  %v5169_v45 = vrot.slane %v5121_v25, 2 }
 0x44c   : > { %v5258_v0 = vadd.f32 %v5186_v46, %v5066_v11  ;;  %v4472_v31 = vpop.f32.mrf.mxu1 }
 0x44d   : > { %v4993_v48 = vsel %vm2282_vm2, %v4971_v4, %v4972_v27  ;;  %v4698_v39 = vadd.f32 %v6086_v22, %v4472_v31  ;;  %v5166_v22 = vrot.slane %v5118_v58, 2  ;;  %v5122_v31 = vld [vmem:[%s6490_s22 + $0x188] sm:$0xff]  ;;  %v9604_v58 = vld [vmem:[#allocation7_spill] sm:$0xff] }
 0x44e   : > { %5306 = vst [vmem:[%s9027_s10 + $0x118] sm:$0xff] %v5258_v0  ;;  %v5067_v2 = vadd.f32 %v4993_v48, %v9599_v30  ;;  %v4474_v26 = vpop.f32.mrf.mxu1  ;;  %v4721_v48 = vpop.f32.mrf.mxu0 }
 0x44f   : > { %v4973_v33 = vrot.slane %v4698_v39, 2  ;;  %v5183_v62 = vsel %vm2282_vm2, %v5165_v50, %v5166_v22  ;;  %v5182_v44 = vsel %vm2282_vm2, %v5166_v22, %v5167_v35 }
 0x450   : > { %v5259_v57 = vadd.f32 %v5185_v16, %v5067_v2  ;;  %v4475_v56 = vpop.f32.mrf.mxu1 }
 0x451   : > { %v4992_v3 = vsel %vm2282_vm2, %v4972_v27, %v4973_v33  ;;  %v4701_v49 = vadd.f32 %v6087_v19, %v4475_v56  ;;  %v5120_v19 = vld [vmem:[%s6490_s22 + $0x178] sm:$0xff]  ;;  %v6095_v56 = vpop.f32.mrf.mxu0 }
 0x452   : > { %5307 = vst [vmem:[%s9027_s10 + $0x120] sm:$0xff] %v5259_v57  ;;  %v5068_v37 = vadd.f32 %v4992_v3, %v9600_v54  ;;  %v4477_v20 = vpop.f32.mrf.mxu1  ;;  %v5168_v60 = vrot.slane %v5120_v19, 2  ;;  %v5123_v57 = vld [vmem:[%s6490_s22 + $0x190] sm:$0xff]  ;;  %v9606_v19 = vld [vmem:[#allocation8_spill] sm:$0xff] }
 0x453   : > { %v4974_v55 = vrot.slane %v4701_v49, 2  ;;  %v5171_v20 = vrot.slane %v5123_v57, 2 }
 0x454   : > { %v5260_v23 = vadd.f32 %v5184_v41, %v5068_v37  ;;  %v4480_v17 = vpop.f32.mrf.mxu1  ;;  %v5181_v61 = vsel %vm2282_vm2, %v5167_v35, %v5168_v60  ;;  %v5180_v2 = vsel %vm2282_vm2, %v5168_v60, %v5169_v45 }
 0x455   : > { %v4991_v14 = vsel %vm2282_vm2, %v4973_v33, %v4974_v55  ;;  %v4706_v63 = vadd.f32 %v4705_v21, %v4480_v17  ;;  %v5124_v17 = vld [vmem:[%s6490_s22 + $0x198] sm:$0xff] }
 0x456   : > { %5308 = vst [vmem:[%s9027_s10 + $0x128] sm:$0xff] %v5260_v23  ;;  %v5069_v52 = vadd.f32 %v4991_v14, %v9601_v51  ;;  %v4482_v24 = vpop.f32.mrf.mxu1  ;;  %v4724_v23 = vpop.f32.mrf.mxu0 }
 0x457   : > { %v4975_v1 = vrot.slane %v4706_v63, 2  ;;  %v5172_v24 = vrot.slane %v5124_v17, 2 }
 0x458   : > { %v5261_v53 = vadd.f32 %v5183_v62, %v5069_v52  ;;  %v4483_v36 = vpop.f32.mrf.mxu1 }
 0x459   : > { %v4990_v38 = vsel %vm2282_vm2, %v4974_v55, %v4975_v1  ;;  %v4709_v9 = vadd.f32 %v4708_v42, %v4483_v36  ;;  %v5177_v60 = vsel %vm2282_vm2, %v5171_v20, %v5172_v24 }
 0x45a   : > { %5309 = vst [vmem:[%s9027_s10 + $0x130] sm:$0xff] %v5261_v53  ;;  %v5070_v4 = vadd.f32 %v4990_v38, %v9602_v12  ;;  %v4485_v43 = vpop.f32.mrf.mxu1  ;;  %v5125_v53 = vld [vmem:[%s6490_s22 + $0x1a0] sm:$0xff] }
 0x45b   : > { %v4976_v32 = vrot.slane %v4709_v9, 2  ;;  %v9607_v43 = vld [vmem:[#allocation21_spill] sm:$0xff] }
 0x45c   : > { %v5262_v46 = vadd.f32 %v5182_v44, %v5070_v4  ;;  %v4488_v13 = vpop.f32.mrf.mxu1  ;;  %v5173_v4 = vrot.slane %v5125_v53, 2 }
 0x45d   : > { %v4989_v34 = vsel %vm2282_vm2, %v4975_v1, %v4976_v32  ;;  %v4714_v11 = vadd.f32 %v6090_v6, %v4488_v13  ;;  %v5170_v6 = vrot.slane %v5122_v31, 2 }
 0x45e   : > { %5310 = vst [vmem:[%s9027_s10 + $0x138] sm:$0xff] %v5262_v46  ;;  %v5071_v27 = vadd.f32 %v4989_v34, %v9603_v59  ;;  %v4490_v0 = vpop.f32.mrf.mxu1  ;;  %v5126_v46 = vld [vmem:[%s6490_s22 + $0x1a8] sm:$0xff] }
 0x45f   : > { %v4977_v16 = vrot.slane %v4714_v11, 2  ;;  %v5179_v54 = vsel %vm2282_vm2, %v5169_v45, %v5170_v6  ;;  %v5178_v51 = vsel %vm2282_vm2, %v5170_v6, %v5171_v20  ;;  %v5176_v45 = vsel %vm2282_vm2, %v5172_v24, %v5173_v4 }
 0x460   : > { %v5263_v39 = vadd.f32 %v5181_v61, %v5071_v27  ;;  %v4491_v50 = vpop.f32.mrf.mxu1  ;;  %v5174_v27 = vrot.slane %v5126_v46, 2 }
 0x461   : > { %v4988_v30 = vsel %vm2282_vm2, %v4976_v32, %v4977_v16  ;;  %v4717_v26 = vadd.f32 %v6091_v29, %v4491_v50 }
 0x462   : > { %5311 = vst [vmem:[%s9027_s10 + $0x140] sm:$0xff] %v5263_v39  ;;  %v5072_v33 = vadd.f32 %v4988_v30, %v9604_v58  ;;  %v4493_v21 = vpop.f32.mrf.mxu1  ;;  %v5175_v30 = vsel %vm2282_vm2, %v5173_v4, %v5174_v27 }
 0x463   : > { %v4978_v3 = vrot.slane %v4717_v26, 2 }
 0x464   : > { %v5264_v41 = vadd.f32 %v5180_v2, %v5072_v33  ;;  %v4496_v49 = vpop.f32.mrf.mxu1  ;;  %v5222_v2 = vsel %vm2282_vm2, %v5174_v27, %v5127_v7 }
 0x465   : > { %v4987_v22 = vsel %vm2282_vm2, %v4977_v16, %v4978_v3  ;;  %v4722_v37 = vadd.f32 %v4721_v48, %v4496_v49 }
 0x466   : > { %5312 = vst [vmem:[%s9027_s10 + $0x148] sm:$0xff] %v5264_v41  ;;  %v5073_v55 = vadd.f32 %v4987_v22, %v9605_v15  ;;  %v4498_v29 = vpop.f32.mrf.mxu1 }
 0x467   : > { %v4979_v14 = vrot.slane %v4722_v37, 2 }
 0x468   : > { %v5265_v62 = vadd.f32 %v5179_v54, %v5073_v55  ;;  %v4499_v63 = vpop.f32.mrf.mxu1 }
 0x469   : > { %v4986_v35 = vsel %vm2282_vm2, %v4978_v3, %v4979_v14  ;;  %v4725_v52 = vadd.f32 %v4724_v23, %v4499_v63 }
 0x46a   : > { %5313 = vst [vmem:[%s9027_s10 + $0x150] sm:$0xff] %v5265_v62  ;;  %v5074_v1 = vadd.f32 %v4986_v35, %v9606_v19  ;;  %v4501_v42 = vpop.f32.mrf.mxu1 }
 0x46b   : > { %v4980_v36 = vrot.slane %v4725_v52, 2 }
 0x46c   : > { %v5266_v38 = vadd.f32 %v5178_v51, %v5074_v1  ;;  %v4504_v44 = vpop.f32.mrf.mxu1 }
 0x46d   : > { %v4985_v9 = vsel %vm2282_vm2, %v4979_v14, %v4980_v36  ;;  %v4730_v12 = vadd.f32 %v6094_v18, %v4504_v44  ;;  %v9608_v18 = vld [vmem:[#allocation9_spill] sm:$0xff] }
 0x46e   : > { %5314 = vst [vmem:[%s9027_s10 + $0x158] sm:$0xff] %v5266_v38  ;;  %v5075_v25 = vadd.f32 %v4985_v9, %v9607_v43  ;;  %v4506_v32 = vpop.f32.mrf.mxu1 }
 0x46f   : > { %v4981_v13 = vrot.slane %v4730_v12, 2 }
 0x470   : > { %v5267_v34 = vadd.f32 %v5177_v60, %v5075_v25  ;;  %v4507_v61 = vpop.f32.mrf.mxu1 }
 0x471   : > { %v4984_v11 = vsel %vm2282_vm2, %v4980_v36, %v4981_v13  ;;  %v4733_v59 = vadd.f32 %v6095_v56, %v4507_v61 }
 0x472   : > { %5315 = vst [vmem:[%s9027_s10 + $0x160] sm:$0xff] %v5267_v34  ;;  %v5076_v0 = vadd.f32 %v4984_v11, %v9608_v18  ;;  %v4509_v31 = vpop.f32.mrf.mxu1 }
 0x473   : > { %v4982_v48 = vrot.slane %v4733_v59, 2 }
 0x474   : > { %v5268_v16 = vadd.f32 %v5176_v45, %v5076_v0 }
 0x475   : > { %v4983_v39 = vsel %vm2282_vm2, %v4981_v13, %v4982_v48  ;;  %v5030_v50 = vsel %vm2282_vm2, %v4982_v48, %v4935_v5 }
 0x476   : > { %5316 = vst [vmem:[%s9027_s10 + $0x168] sm:$0xff] %v5268_v16  ;;  %v5077_v26 = vadd.f32 %v4983_v39, %v8994_v28  ;;  %v5078_v6 = vadd.f32 %v5030_v50, %v8996_v10 }
 0x478   : > { %v5269_v58 = vadd.f32 %v5175_v30, %v5077_v26  ;;  %v5270_v33 = vadd.f32 %v5222_v2, %v5078_v6 }
 0x47a   : > { %5317 = vst [vmem:[%s9027_s10 + $0x170] sm:$0xff] %v5269_v58  ;;  %5318 = vst [vmem:[%s9027_s10 + $0x178] sm:$0xff] %v5270_v33 }
 0x47b PF: > { %s15_s18 = sadd.s32 1, %s6406_s18  }
 0x47c   : > { %p12_p4 = scmp.ge.s32.totalorder %s15_s18, 4  }
 0x47e   :  { %14 = sbr.rel (!%p12_p4) target bundleno = 1 (0x1), region = 70 }

</bundles_post_ra>
